<compile_context>
chip_gen: v5e
topology: v5e:2x2
jax: 0.10.0
libtpu: 0.0.40
codegen_flags: <defaults>
</compile_context>

<pallas_src>
import functools

import jax
import jax.numpy as jnp
import numpy as np
from jax.experimental import pallas as pl
from jax.experimental.pallas import tpu as pltpu

_VMEM_LIMIT = 32 * 1024 * 1024   # explicit scoped-VMEM budget, valid on v5e/v6e/v7x


def _round_up(v, m):
    return ((v + m - 1) // m) * m


# ----------------------------------------------------------------------------
# Pallas kernels
# ----------------------------------------------------------------------------
def _act_quant_kernel(sw_ref, sf_ref, inv_sf_ref, clip_ref, x_ref, o_ref, *, nbits):
    """QuantPaCTActiv: clamp(0, clip) -> floor(sf*x)/sf per bit, one-hot mixed.
    sw/sf/inv_sf/clip: (nbits,) f32 scalars in SMEM; x_ref: (tr, tc) f32 tile."""
    x = x_ref[...].astype(jnp.float32)
    acc = jnp.zeros_like(x)
    for i in range(nbits):                          # static -> fully unrolled
        y = jnp.clip(x, 0.0, clip_ref[i])           # clamp(x, 0, clip_val)
        y = jnp.floor(sf_ref[i] * y) * inv_sf_ref[i]
        y = jnp.where(jnp.isnan(y), 0.0, y)         # torch.nan_to_num
        acc = acc + sw_ref[i] * y
    o_ref[...] = acc.astype(o_ref.dtype)            # bf16 output


def _weight_mix_kernel(w_ref, sw_ref, sc_ref, inv_ref, o_ref, *, bits):
    """FQConvWeightQuantization per bit + per-channel one-hot mixing.
    w_ref: (tn_w, tk) f32 (out-channels on sublanes, K on lanes)
    sw/sc/inv: (tn_w, nbits) f32 per-(channel, bit) tables
    o_ref: (tk, tn_w) bf16 -- written TRANSPOSED so the matmul RHS is a
           lane-dense (Kp, Cout_pad) slab, no host transpose/pad round trip."""
    w = w_ref[...]
    sw_all = sw_ref[...]
    sc_all = sc_ref[...]
    inv_all = inv_ref[...]
    acc = jnp.zeros_like(w)
    for i, bit in enumerate(bits):                  # static -> unrolled
        n = float(2 ** (bit - 1) - 1)
        sc = sc_all[:, i:i + 1]
        inv = inv_all[:, i:i + 1]                   # reciprocal multiply, no divide
        swv = sw_all[:, i:i + 1]
        q = jnp.clip(w * inv, -1.0, 1.0)            # FQQuantizationSTE, lower_bound=-1
        q = jnp.round(q * n) * (1.0 / n)
        acc = acc + swv * (q * sc)
    o_ref[...] = acc.T.astype(o_ref.dtype)


def _conv_mm_kernel(x_ref, w_ref, b_ref, o_ref, acc_ref):
    """One (tm, tn) output tile of the im2col matmul, accumulated over K tiles.
    bf16 MXU inputs, f32 VMEM accumulator, bias added at the last K step."""
    kstep = pl.program_id(2)

    @pl.when(kstep == 0)
    def _():
        acc_ref[...] = jnp.zeros_like(acc_ref)

    acc_ref[...] += jnp.dot(x_ref[...], w_ref[...],
                            preferred_element_type=jnp.float32)

    @pl.when(kstep == pl.num_programs(2) - 1)
    def _():
        o_ref[...] = (acc_ref[...] + b_ref[...]).astype(o_ref.dtype)


# ----------------------------------------------------------------------------
# Host-side helpers (tiny, plain JAX)
# ----------------------------------------------------------------------------
def _weight_scales(w_scale_params, wbits, cout):
    """Effective per-(bit, channel) FQConvWeightQuantization scales.
    bit == 2 : n_s == cout, round_pow2=False -> exp(scale_param) per channel
    bit != 2 : n_s == 1,    round_pow2=True  -> exp2(floor(log2(scale_param)))."""
    rows = []
    for i, bit in enumerate(wbits):
        sp = jnp.asarray(w_scale_params[i], jnp.float32)
        if bit == 2:
            rows.append(jnp.exp(sp).reshape(cout))
        else:
            rows.append(jnp.broadcast_to(
                jnp.exp2(jnp.floor(jnp.log2(sp))).reshape(()), (cout,)))
    return jnp.stack(rows, axis=0)                  # (nbits, cout)


def _mix_bias(bias, scale_w, sw_w, wbits, abit0, act_scale):
    """FQConvBiasQuantization (b_prec=16) per bit, one-hot mixed.  Cout-sized."""
    n_b = float(2 ** 15 - 1)
    n_a = float(2 ** abit0 - 1)
    bias = bias.astype(jnp.float32)
    mixed = jnp.zeros_like(bias)
    for i, bit in enumerate(wbits):
        n_w = float(2 ** (bit - 1) - 1)
        s = n_b * (scale_w[i] / n_w) * (act_scale / n_a)
        bq = jnp.clip(bias / s, -1.0, 1.0)
        bq = jnp.round(bq * n_b) / n_b
        mixed = mixed + sw_w[i] * (bq * s)
    return mixed


def _im2col(x, kh, kw, stride, padding, dilation):
    """NCHW im2col; K order = (cin, ki, kj), matching weight.reshape(Cout, Cin*kh*kw).
    TODO(synk): fuse im2col into the matmul kernel (strided DMA of the padded
    activation per K tile) to avoid the kh*kw inflation of activation HBM traffic."""
    n, c, h, w = x.shape
    sh, sw_ = stride
    ph, pw = padding
    dh, dw = dilation
    hout = (h + 2 * ph - dh * (kh - 1) - 1) // sh + 1
    wout = (w + 2 * pw - dw * (kw - 1) - 1) // sw_ + 1
    xp = jnp.pad(x, ((0, 0), (0, 0), (ph, ph), (pw, pw)))
    cols = []
    for i in range(kh):
        for j in range(kw):
            hi, wj = i * dh, j * dw
            cols.append(xp[:, :, hi:hi + (hout - 1) * sh + 1:sh,
                           wj:wj + (wout - 1) * sw_ + 1:sw_])
    cols = jnp.stack(cols, axis=-1)                   # (N, C, Hout, Wout, kh*kw)
    cols = cols.transpose(0, 2, 3, 1, 4)              # (N, Hout, Wout, C, kh*kw)
    cols = cols.reshape(n * hout * wout, c * kh * kw)
    return cols, hout, wout


# ----------------------------------------------------------------------------
# Pallas-call wrappers
# ----------------------------------------------------------------------------
def quant_pact_activ(x, alpha_activ, clip_vals, abits, *, round_pow2=True,
                     out_dtype=jnp.bfloat16, row_tile=256, col_tile=512):
    """QuantPaCTActiv forward.  Returns (quantized activation, updated clip_vals)."""
    nbits = len(abits)
    n_steps = jnp.asarray([2.0 ** b - 1.0 for b in abits], jnp.float32)
    clip_vals = clip_vals.astype(jnp.float32)
    sf = n_steps / clip_vals
    if round_pow2:
        sf = jnp.exp2(jnp.floor(jnp.log2(sf)))
        clip_new = n_steps / sf            # LearnedClippedLinearQuantizeSTE clip update
    else:
        clip_new = clip_vals
    inv_sf = 1.0 / sf
    sw = jax.nn.one_hot(jnp.argmax(alpha_activ), nbits, dtype=jnp.float32)

    n, c, h, w = x.shape
    rows, cols = n * c, h * w
    x2 = x.reshape(rows, cols).astype(jnp.float32)
    # Full-dim tiles when small (always layout-legal); otherwise (16, 128)-aligned
    # tiles with pl.cdiv partial-block handling on the edges.
    tr = rows if rows <= row_tile else (row_tile // 16) * 16
    tc = cols if cols <= col_tile else (col_tile // 128) * 128
    grid = (pl.cdiv(rows, tr), pl.cdiv(cols, tc))

    smem_spec = pl.BlockSpec(memory_space=pltpu.MemorySpace.SMEM)
    out = pl.pallas_call(
        functools.partial(_act_quant_kernel, nbits=nbits),
        out_shape=jax.ShapeDtypeStruct((rows, cols), out_dtype),
        grid=grid,
        in_specs=[smem_spec, smem_spec, smem_spec, smem_spec,
                  pl.BlockSpec((tr, tc), lambda i, j: (i, j))],
        out_specs=pl.BlockSpec((tr, tc), lambda i, j: (i, j)),
        compiler_params=pltpu.CompilerParams(
            dimension_semantics=("parallel", "parallel"),
            vmem_limit_bytes=_VMEM_LIMIT),
    )(sw, sf, inv_sf, clip_new, x2)
    return out.reshape(n, c, h, w), clip_new


def quant_mix_weight_transposed(weight, alpha_weight, w_scale_params, wbits, *,
                                cout_pad, kp, tn_w, tk_w, out_dtype=jnp.bfloat16):
    """Quantize + one-hot mix the conv weight; output is the matmul RHS
    (Kp, Cout_pad) in out_dtype.  Also returns the per-channel one-hot sw."""
    cout, cin, kh, kw = weight.shape
    k = cin * kh * kw
    nbits = len(wbits)

    scale_w = _weight_scales(w_scale_params, wbits, cout)            # (nbits, cout)
    sw_w = jax.nn.one_hot(jnp.argmax(alpha_weight, axis=0), nbits,
                          dtype=jnp.float32).T                        # (nbits, cout)

    w_flat = weight.reshape(cout, k).astype(jnp.float32)
    w_pad = jnp.pad(w_flat, ((0, cout_pad - cout), (0, kp - k)))
    sc_t = jnp.pad(scale_w.T, ((0, cout_pad - cout), (0, 0)), constant_values=1.0)
    inv_t = 1.0 / sc_t
    sw_t = jnp.pad(sw_w.T, ((0, cout_pad - cout), (0, 0)))

    grid = (cout_pad // tn_w, kp // tk_w)
    w_q = pl.pallas_call(
        functools.partial(_weight_mix_kernel, bits=tuple(wbits)),
        out_shape=jax.ShapeDtypeStruct((kp, cout_pad), out_dtype),
        grid=grid,
        in_specs=[
            pl.BlockSpec((tn_w, tk_w), lambda c, kk: (c, kk)),
            pl.BlockSpec((tn_w, nbits), lambda c, kk: (c, 0)),
            pl.BlockSpec((tn_w, nbits), lambda c, kk: (c, 0)),
            pl.BlockSpec((tn_w, nbits), lambda c, kk: (c, 0)),
        ],
        out_specs=pl.BlockSpec((tk_w, tn_w), lambda c, kk: (kk, c)),
        compiler_params=pltpu.CompilerParams(
            dimension_semantics=("parallel", "parallel"),
            vmem_limit_bytes=_VMEM_LIMIT),
    )(w_pad, sw_t, sc_t, inv_t)
    return w_q, sw_w, scale_w


def conv2d_matmul(patches, w_q, bias_row, n, hout, wout, cout, *, tm, tn, tk):
    """(M, Kp)@(Kp, Cout_pad) + bias via a tiled MXU matmul; returns NCHW f32."""
    m, kp = patches.shape
    kp2, cout_pad = w_q.shape
    assert kp == kp2 and cout_pad % tn == 0 and kp % tk == 0
    grid = (pl.cdiv(m, tm), cout_pad // tn, kp // tk)   # no M padding: partial last
    out = pl.pallas_call(                               # M block masked on writeback
        _conv_mm_kernel,
        out_shape=jax.ShapeDtypeStruct((m, cout_pad), jnp.float32),
        grid=grid,
        in_specs=[
            pl.BlockSpec((tm, tk), lambda i, j, kk: (i, kk)),
            pl.BlockSpec((tk, tn), lambda i, j, kk: (kk, j)),
            pl.BlockSpec((1, tn), lambda i, j, kk: (0, j)),
        ],
        out_specs=pl.BlockSpec((tm, tn), lambda i, j, kk: (i, j)),
        scratch_shapes=[pltpu.VMEM((tm, tn), jnp.float32)],
        compiler_params=pltpu.CompilerParams(
            dimension_semantics=("parallel", "parallel", "arbitrary"),
            vmem_limit_bytes=_VMEM_LIMIT),
    )(patches, w_q, bias_row)
    return out[:, :cout].reshape(n, hout, wout, cout).transpose(0, 3, 1, 2)


# ----------------------------------------------------------------------------
# Full forward (jitted once per static config)
# ----------------------------------------------------------------------------
@functools.partial(
    jax.jit,
    static_argnames=("wbits", "abits", "stride", "padding", "dilation",
                     "round_pow2", "tm", "tn", "tk", "matmul_dtype"))
def _forward_impl(x, params, *, wbits, abits, stride, padding, dilation,
                  round_pow2, tm, tn, tk, matmul_dtype):
    weight = params["weight"]
    bias = params.get("bias", None)

    n, cin, h, w = x.shape
    cout, _, kh, kw = weight.shape
    k = cin * kh * kw

    # 1) activation quantization (QuantPaCTActiv) -> bf16
    activ, act_clip = quant_pact_activ(x, params["alpha_activ"], params["clip_vals"],
                                       abits, round_pow2=round_pow2,
                                       out_dtype=matmul_dtype)

    # tiling (tiles keep VMEM bounded and lane/sublane aligned on every TPU gen)
    hout = (h + 2 * padding[0] - dilation[0] * (kh - 1) - 1) // stride[0] + 1
    wout = (w + 2 * padding[1] - dilation[1] * (kw - 1) - 1) // stride[1] + 1
    m = n * hout * wout
    tk_eff = min(_round_up(tk, 128), _round_up(k, 128))
    kp = _round_up(k, tk_eff)
    tn_eff = min(_round_up(tn, 128), _round_up(cout, 128))
    cout_pad = _round_up(cout, tn_eff)
    tm_eff = m if m <= tm else max(16, (tm // 16) * 16)

    # 2) weight quantization + per-channel one-hot mixing -> (Kp, Cout_pad) bf16 RHS
    w_q, sw_w, scale_w = quant_mix_weight_transposed(
        weight, params["alpha_weight"], params["w_scale_params"], wbits,
        cout_pad=cout_pad, kp=kp, tn_w=min(128, cout_pad), tk_w=tk_eff,
        out_dtype=matmul_dtype)

    # bias quantization + mixing (Cout-sized, plain JAX)
    if bias is not None:
        mixed_bias = _mix_bias(bias, scale_w, sw_w, wbits, abits[0], act_clip[0])
    else:
        mixed_bias = jnp.zeros((cout,), jnp.float32)
    bias_row = jnp.pad(mixed_bias.reshape(1, cout).astype(jnp.float32),
                       ((0, 0), (0, cout_pad - cout)))

    # 3) im2col (XLA glue, bf16) + tiled MXU matmul.  Only K / Cout are zero-padded.
    patches, hout, wout = _im2col(activ, kh, kw, stride, padding, dilation)
    patches = jnp.pad(patches, ((0, 0), (0, kp - k)))

    out = conv2d_matmul(patches, w_q, bias_row, n, hout, wout, cout,
                        tm=tm_eff, tn=tn_eff, tk=tk_eff)
    return out


def quant_multi_prec_activ_conv2d_forward(x, params, wbits, abits, *,
                                          stride=(1, 1), padding=(0, 0),
                                          dilation=(1, 1), groups=1,
                                          first_layer=False, round_pow2=True,
                                          tm=512, tn=256, tk=512,
                                          matmul_dtype=jnp.bfloat16):
    """Mirrors QuantMultiPrecActivConv2d.forward (first_layer=False, fc=False)."""
    if groups != 1:
        raise NotImplementedError("TODO(synk): grouped/depthwise conv not implemented")
    if first_layer:
        raise NotImplementedError("TODO(synk): first_layer 8-bit input path not implemented")
    if len(abits) != 1:
        raise NotImplementedError("TODO(synk): only a single activation bit-width branch")
    assert all(b >= 2 for b in wbits)

    out = _forward_impl(x, params, wbits=tuple(wbits), abits=tuple(abits),
                        stride=tuple(stride), padding=tuple(padding),
                        dilation=tuple(dilation), round_pow2=round_pow2,
                        tm=tm, tn=tn, tk=tk, matmul_dtype=matmul_dtype)

    # bookkeeping buffers of the torch module, returned as plain values
    n, cin, h, w = x.shape
    cout, _, kh, kw = params["weight"].shape
    hout = (h + 2 * padding[0] - dilation[0] * (kh - 1) - 1) // stride[0] + 1
    wout = (w + 2 * padding[1] - dilation[1] * (kw - 1) - 1) // stride[1] + 1
    k_size = kh * kw
    param_size = cin * cout * k_size / groups * 1e-6
    filter_size = param_size / float(stride[0] ** 2.0)
    aux = dict(memory_size=cin * h * w * 0.001,
               size_product=filter_size * h * w, out_x=hout, out_y=wout)
    return out, aux


# ----------------------------------------------------------------------------
# Pure-JAX reference (for correctness check), same bf16 MXU-input cast
# ----------------------------------------------------------------------------
@functools.partial(
    jax.jit,
    static_argnames=("wbits", "abits", "stride", "padding", "dilation", "groups",
                     "round_pow2", "matmul_dtype"))
def reference_forward(x, params, *, wbits, abits, stride, padding, dilation, groups,
                      round_pow2=True, matmul_dtype=jnp.float32):
    weight = params["weight"].astype(jnp.float32)
    bias = params["bias"].astype(jnp.float32)
    nb_a = len(abits)
    n_steps_a = jnp.asarray([2.0 ** b - 1.0 for b in abits], jnp.float32)
    sf = n_steps_a / params["clip_vals"].astype(jnp.float32)
    if round_pow2:
        sf = jnp.exp2(jnp.floor(jnp.log2(sf)))
        clip_new = n_steps_a / sf
    else:
        clip_new = params["clip_vals"].astype(jnp.float32)
    sw_a = jax.nn.one_hot(jnp.argmax(params["alpha_activ"]), nb_a, dtype=jnp.float32)
    activ = jnp.zeros_like(x)
    for i in range(nb_a):
        y = jnp.clip(x, 0.0, clip_new[i])
        y = jnp.floor(sf[i] * y) * (1.0 / sf[i])
        y = jnp.where(jnp.isnan(y), 0.0, y)
        activ = activ + sw_a[i] * y

    cout = weight.shape[0]
    nb_w = len(wbits)
    sw_w = jax.nn.one_hot(jnp.argmax(params["alpha_weight"], axis=0), nb_w,
                          dtype=jnp.float32).T
    scale_w = _weight_scales(params["w_scale_params"], wbits, cout)
    mixed_w = jnp.zeros_like(weight)
    for i, bit in enumerate(wbits):
        n_w = float(2 ** (bit - 1) - 1)
        sc4 = scale_w[i].reshape(cout, 1, 1, 1)
        q = jnp.clip(weight * (1.0 / sc4), -1.0, 1.0)
        q = jnp.round(q * n_w) * (1.0 / n_w)
        mixed_w = mixed_w + sw_w[i].reshape(cout, 1, 1, 1) * (q * sc4)
    mixed_b = _mix_bias(bias, scale_w, sw_w, wbits, abits[0], clip_new[0])

    aq = activ.astype(matmul_dtype).astype(jnp.float32)
    wq = mixed_w.astype(matmul_dtype).astype(jnp.float32)
    out = jax.lax.conv_general_dilated(
        aq, wq, window_strides=stride,
        padding=[(padding[0], padding[0]), (padding[1], padding[1])],
        rhs_dilation=dilation,
        dimension_numbers=("NCHW", "OIHW", "NCHW"),
        feature_group_count=groups)
    return out + mixed_b.reshape(1, -1, 1, 1)


# ----------------------------------------------------------------------------
if __name__ == "__main__":
    key = jax.random.PRNGKey(0)
    # module config: inplane=16, outplane=32, kernel_size=3, stride=1, padding=1,
    # dilation=1, groups=1, bias=True, wbits=(2,4,8), abits=(8,), round_pow2=True
    N, Cin, H, W = 2, 16, 16, 16
    Cout, KSZ = 32, 3
    wbits, abits = (2, 4, 8), (8,)
    stride, padding, dilation, groups = (1, 1), (1, 1), (1, 1), 1

    ks = jax.random.split(key, 5)
    x = jax.random.normal(ks[0], (N, Cin, H, W), jnp.float32) * 2.0
    weight = jax.random.normal(ks[1], (Cout, Cin, KSZ, KSZ), jnp.float32) * 0.1
    bias = jax.random.normal(ks[2], (Cout,), jnp.float32) * 0.1
    alpha_weight = jax.random.normal(ks[3], (len(wbits), Cout), jnp.float32)
    alpha_activ = jnp.full((len(abits),), 0.01, jnp.float32)
    clip_vals = jnp.full((len(abits),), 6.0, jnp.float32)
    # learned weight-quantizer scale params; positive so log2 of the pow2-rounded
    # branches is defined (mimics a trained checkpoint)
    w_scale_params = []
    for i, b in enumerate(wbits):
        if b == 2:
            w_scale_params.append(
                jax.random.uniform(ks[4], (Cout,), jnp.float32, -1.0, -0.4))
        else:
            w_scale_params.append(jnp.full((1,), 0.30 + 0.05 * i, jnp.float32))
    params = dict(weight=weight, bias=bias, alpha_weight=alpha_weight,
                  alpha_activ=alpha_activ, clip_vals=clip_vals,
                  w_scale_params=tuple(w_scale_params))

    # small tiles so the test exercises multi-step M and K grids + the accumulator
    out, aux = quant_multi_prec_activ_conv2d_forward(
        x, params, wbits, abits, stride=stride, padding=padding,
        dilation=dilation, groups=groups, tm=256, tn=128, tk=128)
    out = jax.block_until_ready(out)

    # tight check: reference with the same bf16 MXU-input cast
    ref_bf16 = reference_forward(x, params, wbits=wbits, abits=abits, stride=stride,
                                 padding=padding, dilation=dilation, groups=groups,
                                 matmul_dtype=jnp.bfloat16)
    ref_bf16 = jax.block_until_ready(ref_bf16)
    np.testing.assert_allclose(np.asarray(out), np.asarray(ref_bf16),
                               rtol=1e-3, atol=1e-3)
    assert out.shape == (N, Cout, H, W)
    assert aux["out_x"] == 16 and aux["out_y"] == 16
    assert np.isfinite(np.asarray(out)).all()
    print("KERNEL_OK")
</pallas_src>

<mosaic_0001>
module attributes {stable_mosaic.version = 11 : i64} {
  func.func @_act_quant_kernel(%arg0: i32, %arg1: i32, %arg2: memref<1xf32, #tpu.memory_space<smem>>, %arg3: memref<1xf32, #tpu.memory_space<smem>>, %arg4: memref<1xf32, #tpu.memory_space<smem>>, %arg5: memref<1xf32, #tpu.memory_space<smem>>, %arg6: memref<32x256xf32, #tpu.memory_space<vmem>>, %arg7: memref<32x256xbf16, #tpu.memory_space<vmem>>) attributes {dimension_semantics = [#tpu.dimension_semantics<parallel>, #tpu.dimension_semantics<parallel>], iteration_bounds = array<i64: 1, 1>, scalar_prefetch = 0 : i64, scratch_operands = 0 : i64, tpu.core_type = #tpu.core_type<tc>, window_params = [{transform_indices = @transform_0, window_bounds = array<i64: 1>}, {transform_indices = @transform_1, window_bounds = array<i64: 1>}, {transform_indices = @transform_2, window_bounds = array<i64: 1>}, {transform_indices = @transform_3, window_bounds = array<i64: 1>}, {transform_indices = @transform_4, window_bounds = array<i64: 32, 256>}, {transform_indices = @transform_5, window_bounds = array<i64: 32, 256>}]} {
    %c0 = arith.constant 0 : index
    %c0_0 = arith.constant 0 : index
    %0 = vector.load %arg6[%c0, %c0_0] : memref<32x256xf32, #tpu.memory_space<vmem>>, vector<32x256xf32>
    %cst = arith.constant 0.000000e+00 : f32
    %1 = vector.broadcast %cst : f32 to vector<32x256xf32>
    %c0_1 = arith.constant 0 : index
    %2 = memref.load %arg5[%c0_1] : memref<1xf32, #tpu.memory_space<smem>>
    %cst_2 = arith.constant 0.000000e+00 : f32
    %3 = vector.broadcast %cst_2 : f32 to vector<32x256xf32>
    %4 = arith.maximumf %3, %0 : vector<32x256xf32>
    %5 = vector.broadcast %2 : f32 to vector<32x256xf32>
    %6 = arith.minimumf %5, %4 : vector<32x256xf32>
    %c0_3 = arith.constant 0 : index
    %7 = memref.load %arg3[%c0_3] : memref<1xf32, #tpu.memory_space<smem>>
    %8 = vector.broadcast %7 : f32 to vector<32x256xf32>
    %9 = arith.mulf %8, %6 : vector<32x256xf32>
    %10 = math.floor %9 : vector<32x256xf32>
    %c0_4 = arith.constant 0 : index
    %11 = memref.load %arg4[%c0_4] : memref<1xf32, #tpu.memory_space<smem>>
    %12 = vector.broadcast %11 : f32 to vector<32x256xf32>
    %13 = arith.mulf %10, %12 : vector<32x256xf32>
    %14 = arith.cmpf one, %13, %13 : vector<32x256xf32>
    %cst_5 = arith.constant 0.000000e+00 : f32
    %15 = vector.broadcast %cst_5 : f32 to vector<32x256xf32>
    %16 = arith.select %14, %15, %13 : vector<32x256xi1>, vector<32x256xf32>
    %c0_6 = arith.constant 0 : index
    %17 = memref.load %arg2[%c0_6] : memref<1xf32, #tpu.memory_space<smem>>
    %18 = vector.broadcast %17 : f32 to vector<32x256xf32>
    %19 = arith.mulf %18, %16 : vector<32x256xf32>
    %20 = arith.addf %1, %19 : vector<32x256xf32>
    %21 = arith.truncf %20 : vector<32x256xf32> to vector<32x256xbf16>
    %c0_7 = arith.constant 0 : index
    %c0_8 = arith.constant 0 : index
    %22 = vector.load %arg7[%c0_7, %c0_8] : memref<32x256xbf16, #tpu.memory_space<vmem>>, vector<32x256xbf16>
    tpu.vector_store %arg7[%c0_7, %c0_8], %21 {strides = array<i32>} : memref<32x256xbf16, #tpu.memory_space<vmem>>, vector<32x256xbf16>,
    return
  }
  func.func @transform_0(%arg0: i32, %arg1: i32) -> i32 {
    %c0_i32 = arith.constant 0 : i32
    %c0_i32_0 = arith.constant 0 : i32
    return %c0_i32 : i32
  }
  func.func @transform_1(%arg0: i32, %arg1: i32) -> i32 {
    %c0_i32 = arith.constant 0 : i32
    %c0_i32_0 = arith.constant 0 : i32
    return %c0_i32 : i32
  }
  func.func @transform_2(%arg0: i32, %arg1: i32) -> i32 {
    %c0_i32 = arith.constant 0 : i32
    %c0_i32_0 = arith.constant 0 : i32
    return %c0_i32 : i32
  }
  func.func @transform_3(%arg0: i32, %arg1: i32) -> i32 {
    %c0_i32 = arith.constant 0 : i32
    %c0_i32_0 = arith.constant 0 : i32
    return %c0_i32 : i32
  }
  func.func @transform_4(%arg0: i32, %arg1: i32) -> (i32, i32) {
    %c0_i32 = arith.constant 0 : i32
    return %arg0, %arg1 : i32, i32
  }
  func.func @transform_5(%arg0: i32, %arg1: i32) -> (i32, i32) {
    %c0_i32 = arith.constant 0 : i32
    return %arg0, %arg1 : i32, i32
  }
}

module attributes {stable_mosaic.version = 11 : i64} {
  func.func @_conv_mm_kernel(%arg0: i32, %arg1: i32, %arg2: i32, %arg3: memref<256x128xbf16, #tpu.memory_space<vmem>>, %arg4: memref<128x128xbf16, #tpu.memory_space<vmem>>, %arg5: memref<1x128xf32, #tpu.memory_space<vmem>>, %arg6: memref<256x128xf32, #tpu.memory_space<vmem>>, %arg7: memref<256x128xf32, #tpu.memory_space<vmem>>) attributes {dimension_semantics = [#tpu.dimension_semantics<parallel>, #tpu.dimension_semantics<parallel>, #tpu.dimension_semantics<arbitrary>], iteration_bounds = array<i64: 2, 1, 2>, scalar_prefetch = 0 : i64, scratch_operands = 1 : i64, tpu.core_type = #tpu.core_type<tc>, window_params = [{transform_indices = @transform_0, window_bounds = array<i64: 256, 128>}, {transform_indices = @transform_1, window_bounds = array<i64: 128, 128>}, {transform_indices = @transform_2, window_bounds = array<i64: 1, 128>}, {transform_indices = @transform_3, window_bounds = array<i64: 256, 128>}]} {
    %c0_i32 = arith.constant 0 : i32
    %0 = arith.cmpi eq, %arg2, %c0_i32 : i32
    %1 = arith.extui %0 : i1 to i32
    %c0_i32_0 = arith.constant 0 : i32
    %2 = arith.cmpi ne, %1, %c0_i32_0 : i32
    scf.if %2 {
      %cst_9 = arith.constant 0.000000e+00 : f32
      %12 = vector.broadcast %cst_9 : f32 to vector<256x128xf32>
      %c0_10 = arith.constant 0 : index
      %c0_11 = arith.constant 0 : index
      %13 = vector.load %arg7[%c0_10, %c0_11] : memref<256x128xf32, #tpu.memory_space<vmem>>, vector<256x128xf32>
      tpu.vector_store %arg7[%c0_10, %c0_11], %12 {strides = array<i32>} : memref<256x128xf32, #tpu.memory_space<vmem>>, vector<256x128xf32>,
    } else {
    }
    %c0 = arith.constant 0 : index
    %c0_1 = arith.constant 0 : index
    %3 = vector.load %arg7[%c0, %c0_1] : memref<256x128xf32, #tpu.memory_space<vmem>>, vector<256x128xf32>
    %c0_2 = arith.constant 0 : index
    %c0_3 = arith.constant 0 : index
    %4 = vector.load %arg3[%c0_2, %c0_3] : memref<256x128xbf16, #tpu.memory_space<vmem>>, vector<256x128xbf16>
    %c0_4 = arith.constant 0 : index
    %c0_5 = arith.constant 0 : index
    %5 = vector.load %arg4[%c0_4, %c0_5] : memref<128x128xbf16, #tpu.memory_space<vmem>>, vector<128x128xbf16>
    %cst = arith.constant dense<0.000000e+00> : vector<256x128xf32>
    %6 = tpu.matmul %4, %5, %cst {dimension_numbers = #tpu.dot_dimension_numbers<[1], [0], [0], [1], [0, 0, 1, 1], [], []>} : vector<256x128xbf16>, vector<128x128xbf16>, vector<256x128xf32> -> vector<256x128xf32>
    %7 = arith.addf %3, %6 : vector<256x128xf32>
    %c0_6 = arith.constant 0 : index
    %c0_7 = arith.constant 0 : index
    %8 = vector.load %arg7[%c0_6, %c0_7] : memref<256x128xf32, #tpu.memory_space<vmem>>, vector<256x128xf32>
    tpu.vector_store %arg7[%c0_6, %c0_7], %7 {strides = array<i32>} : memref<256x128xf32, #tpu.memory_space<vmem>>, vector<256x128xf32>,
    %c1_i32 = arith.constant 1 : i32
    %9 = arith.cmpi eq, %arg2, %c1_i32 : i32
    %10 = arith.extui %9 : i1 to i32
    %c0_i32_8 = arith.constant 0 : i32
    %11 = arith.cmpi ne, %10, %c0_i32_8 : i32
    scf.if %11 {
      %c0_9 = arith.constant 0 : index
      %c0_10 = arith.constant 0 : index
      %12 = vector.load %arg7[%c0_9, %c0_10] : memref<256x128xf32, #tpu.memory_space<vmem>>, vector<256x128xf32>
      %c0_11 = arith.constant 0 : index
      %c0_12 = arith.constant 0 : index
      %13 = vector.load %arg5[%c0_11, %c0_12] : memref<1x128xf32, #tpu.memory_space<vmem>>, vector<1x128xf32>
      %14 = vector.broadcast %13 : vector<1x128xf32> to vector<256x128xf32>
      %15 = arith.addf %12, %14 : vector<256x128xf32>
      %c0_13 = arith.constant 0 : index
      %c0_14 = arith.constant 0 : index
      %16 = vector.load %arg6[%c0_13, %c0_14] : memref<256x128xf32, #tpu.memory_space<vmem>>, vector<256x128xf32>
      tpu.vector_store %arg6[%c0_13, %c0_14], %15 {strides = array<i32>} : memref<256x128xf32, #tpu.memory_space<vmem>>, vector<256x128xf32>,
    } else {
    }
    return
  }
  func.func @transform_0(%arg0: i32, %arg1: i32, %arg2: i32) -> (i32, i32) {
    %c0_i32 = arith.constant 0 : i32
    return %arg0, %arg2 : i32, i32
  }
  func.func @transform_1(%arg0: i32, %arg1: i32, %arg2: i32) -> (i32, i32) {
    %c0_i32 = arith.constant 0 : i32
    return %arg2, %arg1 : i32, i32
  }
  func.func @transform_2(%arg0: i32, %arg1: i32, %arg2: i32) -> (i32, i32) {
    %c0_i32 = arith.constant 0 : i32
    %c0_i32_0 = arith.constant 0 : i32
    return %c0_i32, %arg1 : i32, i32
  }
  func.func @transform_3(%arg0: i32, %arg1: i32, %arg2: i32) -> (i32, i32) {
    %c0_i32 = arith.constant 0 : i32
    return %arg0, %arg1 : i32, i32
  }
}

module attributes {stable_mosaic.version = 11 : i64} {
  func.func @_weight_mix_kernel(%arg0: i32, %arg1: i32, %arg2: memref<128x128xf32, #tpu.memory_space<vmem>>, %arg3: memref<128x3xf32, #tpu.memory_space<vmem>>, %arg4: memref<128x3xf32, #tpu.memory_space<vmem>>, %arg5: memref<128x3xf32, #tpu.memory_space<vmem>>, %arg6: memref<128x128xbf16, #tpu.memory_space<vmem>>) attributes {dimension_semantics = [#tpu.dimension_semantics<parallel>, #tpu.dimension_semantics<parallel>], iteration_bounds = array<i64: 1, 2>, scalar_prefetch = 0 : i64, scratch_operands = 0 : i64, tpu.core_type = #tpu.core_type<tc>, window_params = [{transform_indices = @transform_0, window_bounds = array<i64: 128, 128>}, {transform_indices = @transform_1, window_bounds = array<i64: 128, 3>}, {transform_indices = @transform_2, window_bounds = array<i64: 128, 3>}, {transform_indices = @transform_3, window_bounds = array<i64: 128, 3>}, {transform_indices = @transform_4, window_bounds = array<i64: 128, 128>}]} {
    %c0 = arith.constant 0 : index
    %c0_0 = arith.constant 0 : index
    %0 = vector.load %arg2[%c0, %c0_0] : memref<128x128xf32, #tpu.memory_space<vmem>>, vector<128x128xf32>
    %c0_1 = arith.constant 0 : index
    %c0_2 = arith.constant 0 : index
    %1 = vector.load %arg3[%c0_1, %c0_2] : memref<128x3xf32, #tpu.memory_space<vmem>>, vector<128x3xf32>
    %c0_3 = arith.constant 0 : index
    %c0_4 = arith.constant 0 : index
    %2 = vector.load %arg4[%c0_3, %c0_4] : memref<128x3xf32, #tpu.memory_space<vmem>>, vector<128x3xf32>
    %c0_5 = arith.constant 0 : index
    %c0_6 = arith.constant 0 : index
    %3 = vector.load %arg5[%c0_5, %c0_6] : memref<128x3xf32, #tpu.memory_space<vmem>>, vector<128x3xf32>
    %cst = arith.constant 0.000000e+00 : f32
    %4 = vector.broadcast %cst : f32 to vector<128x128xf32>
    %5 = vector.extract_strided_slice %2 {offsets = [0, 0], sizes = [128, 1], strides = [1, 1]} : vector<128x3xf32> to vector<128x1xf32>
    %6 = vector.extract_strided_slice %3 {offsets = [0, 0], sizes = [128, 1], strides = [1, 1]} : vector<128x3xf32> to vector<128x1xf32>
    %7 = vector.extract_strided_slice %1 {offsets = [0, 0], sizes = [128, 1], strides = [1, 1]} : vector<128x3xf32> to vector<128x1xf32>
    %8 = vector.broadcast %6 : vector<128x1xf32> to vector<128x128xf32>
    %9 = arith.mulf %0, %8 : vector<128x128xf32>
    %cst_7 = arith.constant -1.000000e+00 : f32
    %cst_8 = arith.constant 1.000000e+00 : f32
    %10 = vector.broadcast %cst_7 : f32 to vector<128x128xf32>
    %11 = arith.maximumf %10, %9 : vector<128x128xf32>
    %12 = vector.broadcast %cst_8 : f32 to vector<128x128xf32>
    %13 = arith.minimumf %12, %11 : vector<128x128xf32>
    %cst_9 = arith.constant 1.000000e+00 : f32
    %14 = vector.broadcast %cst_9 : f32 to vector<128x128xf32>
    %15 = arith.mulf %13, %14 : vector<128x128xf32>
    %16 = math.roundeven %15 : vector<128x128xf32>
    %cst_10 = arith.constant 1.000000e+00 : f32
    %17 = vector.broadcast %cst_10 : f32 to vector<128x128xf32>
    %18 = arith.mulf %16, %17 : vector<128x128xf32>
    %19 = vector.broadcast %5 : vector<128x1xf32> to vector<128x128xf32>
    %20 = arith.mulf %18, %19 : vector<128x128xf32>
    %21 = vector.broadcast %7 : vector<128x1xf32> to vector<128x128xf32>
    %22 = arith.mulf %21, %20 : vector<128x128xf32>
    %23 = arith.addf %4, %22 : vector<128x128xf32>
    %24 = vector.extract_strided_slice %2 {offsets = [0, 1], sizes = [128, 1], strides = [1, 1]} : vector<128x3xf32> to vector<128x1xf32>
    %25 = vector.extract_strided_slice %3 {offsets = [0, 1], sizes = [128, 1], strides = [1, 1]} : vector<128x3xf32> to vector<128x1xf32>
    %26 = vector.extract_strided_slice %1 {offsets = [0, 1], sizes = [128, 1], strides = [1, 1]} : vector<128x3xf32> to vector<128x1xf32>
    %27 = vector.broadcast %25 : vector<128x1xf32> to vector<128x128xf32>
    %28 = arith.mulf %0, %27 : vector<128x128xf32>
    %cst_11 = arith.constant -1.000000e+00 : f32
    %cst_12 = arith.constant 1.000000e+00 : f32
    %29 = vector.broadcast %cst_11 : f32 to vector<128x128xf32>
    %30 = arith.maximumf %29, %28 : vector<128x128xf32>
    %31 = vector.broadcast %cst_12 : f32 to vector<128x128xf32>
    %32 = arith.minimumf %31, %30 : vector<128x128xf32>
    %cst_13 = arith.constant 7.000000e+00 : f32
    %33 = vector.broadcast %cst_13 : f32 to vector<128x128xf32>
    %34 = arith.mulf %32, %33 : vector<128x128xf32>
    %35 = math.roundeven %34 : vector<128x128xf32>
    %cst_14 = arith.constant 0.142857149 : f32
    %36 = vector.broadcast %cst_14 : f32 to vector<128x128xf32>
    %37 = arith.mulf %35, %36 : vector<128x128xf32>
    %38 = vector.broadcast %24 : vector<128x1xf32> to vector<128x128xf32>
    %39 = arith.mulf %37, %38 : vector<128x128xf32>
    %40 = vector.broadcast %26 : vector<128x1xf32> to vector<128x128xf32>
    %41 = arith.mulf %40, %39 : vector<128x128xf32>
    %42 = arith.addf %23, %41 : vector<128x128xf32>
    %43 = vector.extract_strided_slice %2 {offsets = [0, 2], sizes = [128, 1], strides = [1, 1]} : vector<128x3xf32> to vector<128x1xf32>
    %44 = vector.extract_strided_slice %3 {offsets = [0, 2], sizes = [128, 1], strides = [1, 1]} : vector<128x3xf32> to vector<128x1xf32>
    %45 = vector.extract_strided_slice %1 {offsets = [0, 2], sizes = [128, 1], strides = [1, 1]} : vector<128x3xf32> to vector<128x1xf32>
    %46 = vector.broadcast %44 : vector<128x1xf32> to vector<128x128xf32>
    %47 = arith.mulf %0, %46 : vector<128x128xf32>
    %cst_15 = arith.constant -1.000000e+00 : f32
    %cst_16 = arith.constant 1.000000e+00 : f32
    %48 = vector.broadcast %cst_15 : f32 to vector<128x128xf32>
    %49 = arith.maximumf %48, %47 : vector<128x128xf32>
    %50 = vector.broadcast %cst_16 : f32 to vector<128x128xf32>
    %51 = arith.minimumf %50, %49 : vector<128x128xf32>
    %cst_17 = arith.constant 1.270000e+02 : f32
    %52 = vector.broadcast %cst_17 : f32 to vector<128x128xf32>
    %53 = arith.mulf %51, %52 : vector<128x128xf32>
    %54 = math.roundeven %53 : vector<128x128xf32>
    %cst_18 = arith.constant 0.00787401571 : f32
    %55 = vector.broadcast %cst_18 : f32 to vector<128x128xf32>
    %56 = arith.mulf %54, %55 : vector<128x128xf32>
    %57 = vector.broadcast %43 : vector<128x1xf32> to vector<128x128xf32>
    %58 = arith.mulf %56, %57 : vector<128x128xf32>
    %59 = vector.broadcast %45 : vector<128x1xf32> to vector<128x128xf32>
    %60 = arith.mulf %59, %58 : vector<128x128xf32>
    %61 = arith.addf %42, %60 : vector<128x128xf32>
    %62 = tpu.transpose %61, [1, 0] : vector<128x128xf32> -> vector<128x128xf32>
    %63 = arith.truncf %62 : vector<128x128xf32> to vector<128x128xbf16>
    %c0_19 = arith.constant 0 : index
    %c0_20 = arith.constant 0 : index
    %64 = vector.load %arg6[%c0_19, %c0_20] : memref<128x128xbf16, #tpu.memory_space<vmem>>, vector<128x128xbf16>
    tpu.vector_store %arg6[%c0_19, %c0_20], %63 {strides = array<i32>} : memref<128x128xbf16, #tpu.memory_space<vmem>>, vector<128x128xbf16>,
    return
  }
  func.func @transform_0(%arg0: i32, %arg1: i32) -> (i32, i32) {
    %c0_i32 = arith.constant 0 : i32
    return %arg0, %arg1 : i32, i32
  }
  func.func @transform_1(%arg0: i32, %arg1: i32) -> (i32, i32) {
    %c0_i32 = arith.constant 0 : i32
    %c0_i32_0 = arith.constant 0 : i32
    return %arg0, %c0_i32 : i32, i32
  }
  func.func @transform_2(%arg0: i32, %arg1: i32) -> (i32, i32) {
    %c0_i32 = arith.constant 0 : i32
    %c0_i32_0 = arith.constant 0 : i32
    return %arg0, %c0_i32 : i32, i32
  }
  func.func @transform_3(%arg0: i32, %arg1: i32) -> (i32, i32) {
    %c0_i32 = arith.constant 0 : i32
    %c0_i32_0 = arith.constant 0 : i32
    return %arg0, %c0_i32 : i32, i32
  }
  func.func @transform_4(%arg0: i32, %arg1: i32) -> (i32, i32) {
    %c0_i32 = arith.constant 0 : i32
    return %arg1, %arg0 : i32, i32
  }
}

</mosaic_0001>

<bundles_post_ra>
// kernel: _forward_impl.3
= control target key start
LH: loop header
LB: loop body
LE: loop exit
PB: predicated region body
PF: predicated region fallthrough
CT: control target
= control target key end

     0   :  { %s222_s0 = inlined_call_operand.<no memory space> [shape: f32[1], index: 0, kind: input, shape index: {}]   ;;  %s223_s1 = inlined_call_operand.<no memory space> [shape: f32[1], index: 1, kind: input, shape index: {}]   ;;  %s224_s2 = inlined_call_operand.<no memory space> [shape: f32[1], index: 2, kind: input, shape index: {}]   ;;  %s225_s3 = inlined_call_operand.<no memory space> [shape: f32[1], index: 3, kind: input, shape index: {}]   ;;  %s226_s4 = inlined_call_operand.vmem [shape: f32[32,256], index: 4, kind: input, shape index: {}]   ;;  %s227_s5 = inlined_call_operand.vmem [shape: bf16[32,256], index: 5, kind: output, shape index: {}]  }
   0x1   :  { %v24_v0 = vld [vmem:[%s226_s4] sm:$0xff]  ;;  %v25_v1 = vld [vmem:[%s226_s4 + $0x8] sm:$0xff]  ;;  %v41_v2 = vstv %s225_s3  ;;  %v51_v5 = vstv %s223_s1 }
   0x2   :  { %v33_v3 = vmax.f32 %v24_v0, 0.0  ;;  %v34_v4 = vmax.f32 %v25_v1, 0.0  ;;  %v169_v6 = vstv %s224_s2  ;;  %v26_v7 = vld [vmem:[%s226_s4 + $0x10] sm:$0xff]  ;;  %v27_v8 = vld [vmem:[%s226_s4 + $0x18] sm:$0xff]  ;;  %v180_v9 = vstv %s222_s0 }
   0x3   :  { %v35_v10 = vmax.f32 %v26_v7, 0.0  ;;  %v36_v11 = vmax.f32 %v27_v8, 0.0  ;;  %v28_v12 = vld [vmem:[%s226_s4 + $0x20] sm:$0xff]  ;;  %v29_v13 = vld [vmem:[%s226_s4 + $0x28] sm:$0xff]  ;;  %v30_v14 = vld [vmem:[%s226_s4 + $0x30] sm:$0xff] }
   0x4   :  { %v42_v15 = vmin.f32 %v41_v2, %v33_v3  ;;  %v43_v16 = vmin.f32 %v41_v2, %v34_v4  ;;  %v37_v17 = vmax.f32 %v28_v12, 0.0  ;;  %v38_v18 = vmax.f32 %v29_v13, 0.0  ;;  %v31_v19 = vld [vmem:[%s226_s4 + $0x38] sm:$0xff] }
   0x5   :  { %v44_v20 = vmin.f32 %v41_v2, %v35_v10  ;;  %v45_v21 = vmin.f32 %v41_v2, %v36_v11  ;;  %v39_v22 = vmax.f32 %v30_v14, 0.0  ;;  %v40_v23 = vmax.f32 %v31_v19, 0.0 }
   0x6   :  { %v52_v24 = vmul.f32 %v51_v5, %v42_v15  ;;  %v53_v25 = vmul.f32 %v51_v5, %v43_v16  ;;  %v46_v26 = vmin.f32 %v41_v2, %v37_v17  ;;  %v47_v27 = vmin.f32 %v41_v2, %v38_v18 }
   0x7   :  { %v54_v28 = vmul.f32 %v51_v5, %v44_v20  ;;  %v55_v29 = vmul.f32 %v51_v5, %v45_v21  ;;  %v48_v30 = vmin.f32 %v41_v2, %v39_v22  ;;  %v49_v31 = vmin.f32 %v41_v2, %v40_v23 }
   0x8   :  { %v60_v32 = vfloor.f32 %v52_v24  ;;  %v61_v33 = vfloor.f32 %v53_v25  ;;  %v56_v34 = vmul.f32 %v51_v5, %v46_v26  ;;  %v57_v35 = vmul.f32 %v51_v5, %v47_v27 }
   0x9   :  { %v62_v36 = vfloor.f32 %v54_v28  ;;  %v63_v37 = vfloor.f32 %v55_v29  ;;  %v58_v38 = vmul.f32 %v51_v5, %v48_v30  ;;  %v59_v39 = vmul.f32 %v51_v5, %v49_v31 }
   0xa   :  { %v70_v40 = vmul.f32 %v169_v6, %v60_v32  ;;  %v71_v41 = vmul.f32 %v169_v6, %v61_v33  ;;  %v64_v42 = vfloor.f32 %v56_v34  ;;  %v65_v43 = vfloor.f32 %v57_v35 }
   0xb   :  { %v72_v44 = vmul.f32 %v169_v6, %v62_v36  ;;  %v73_v45 = vmul.f32 %v169_v6, %v63_v37  ;;  %v66_v46 = vfloor.f32 %v58_v38  ;;  %v67_v47 = vfloor.f32 %v59_v39 }
   0xc   :  { %vm78_vm0 = vcmp.ne.f32.partialorder %v70_v40, %v70_v40  ;;  %vm79_vm1 = vcmp.ne.f32.partialorder %v71_v41, %v71_v41  ;;  %v74_v48 = vmul.f32 %v169_v6, %v64_v42  ;;  %v75_v49 = vmul.f32 %v169_v6, %v65_v43 }
   0xd   :  { %v86_v50 = vsel %vm78_vm0, 0.0, %v70_v40  ;;  %v87_v51 = vsel %vm79_vm1, 0.0, %v71_v41  ;;  %vm80_vm2 = vcmp.ne.f32.partialorder %v72_v44, %v72_v44  ;;  %vm81_vm3 = vcmp.ne.f32.partialorder %v73_v45, %v73_v45 }
   0xe   :  { %v96_v52 = vmul.f32 %v180_v9, %v86_v50  ;;  %v97_v53 = vmul.f32 %v180_v9, %v87_v51  ;;  %v88_v54 = vsel %vm80_vm2, 0.0, %v72_v44  ;;  %v89_v55 = vsel %vm81_vm3, 0.0, %v73_v45 }
   0xf   :  { %v98_v56 = vmul.f32 %v180_v9, %v88_v54  ;;  %v99_v57 = vmul.f32 %v180_v9, %v89_v55  ;;  %vm82_vm4 = vcmp.ne.f32.partialorder %v74_v48, %v74_v48  ;;  %vm83_vm5 = vcmp.ne.f32.partialorder %v75_v49, %v75_v49 }
  0x10   :  { %v112_v58 = vpack.c.bf16 %v97_v53, %v96_v52  ;;  %v90_v59 = vsel %vm82_vm4, 0.0, %v74_v48  ;;  %v91_v60 = vsel %vm83_vm5, 0.0, %v75_v49  ;;  %v76_v61 = vmul.f32 %v169_v6, %v66_v46 }
  0x11   :  { %v113_v62 = vpack.c.bf16 %v99_v57, %v98_v56  ;;  %v100_v63 = vmul.f32 %v180_v9, %v90_v59  ;;  %v101_v0 = vmul.f32 %v180_v9, %v91_v60  ;;  %v77_v1 = vmul.f32 %v169_v6, %v67_v47 }
  0x12   :  { %116 = vst [vmem:[%s227_s5] sm:$0xff] %v112_v58  ;;  %vm84_vm6 = vcmp.ne.f32.partialorder %v76_v61, %v76_v61 }
  0x13   :  { %117 = vst [vmem:[%s227_s5 + $0x8] sm:$0xff] %v113_v62  ;;  %v114_v2 = vpack.c.bf16 %v101_v0, %v100_v63  ;;  %vm85_vm7 = vcmp.ne.f32.partialorder %v77_v1, %v77_v1  ;;  %v92_v3 = vsel %vm84_vm6, 0.0, %v76_v61 }
  0x14   :  { %v93_v4 = vsel %vm85_vm7, 0.0, %v77_v1  ;;  %v102_v5 = vmul.f32 %v180_v9, %v92_v3 }
  0x15   :  { %118 = vst [vmem:[%s227_s5 + $0x10] sm:$0xff] %v114_v2  ;;  %v103_v6 = vmul.f32 %v180_v9, %v93_v4 }
  0x17   :  { %v115_v7 = vpack.c.bf16 %v103_v6, %v102_v5 }
  0x19   :  { %119 = vst [vmem:[%s227_s5 + $0x18] sm:$0xff] %v115_v7 }

// kernel: _forward_impl.5
= control target key start
LH: loop header
LB: loop body
LE: loop exit
PB: predicated region body
PF: predicated region fallthrough
CT: control target
= control target key end

     0   :  { %s1780_s0 = inlined_call_operand.vmem [shape: bf16[512,256], index: 0, kind: input, shape index: {}]   ;;  %s1781_s1 = inlined_call_operand.vmem [shape: bf16[256,128], index: 1, kind: input, shape index: {}]   ;;  %s1782_s2 = inlined_call_operand.vmem [shape: f32[1,128], index: 2, kind: input, shape index: {}]   ;;  %s1783_s3 = inlined_call_operand.hbm [shape: f32[512,128], index: 3, kind: output, shape index: {}]  }
   0x1   :  { %1784 = sst [smem:[#allocation7_spill]] %s1780_s0 }
   0x2   :  { %8 = vsyncpa [#allocation5], 0 }
   0x3   :  { %10 = vsyncpa [#allocation5 + $0x1], 0  ;;  %s1451_s12 = smov 0   ;;  %s1453_s13 = smov 0  }
   0x4   :  { %s1455_s14 = smov 0   ;;  %s1457_s15 = smov 0  }
   0x5   :  { %s1459_s16 = smov 0   ;;  %s1461_s17 = smov 0  }
   0x6   :  { %s1463_s18 = smov 0   ;;  %s1465_s19 = smov 0  }
   0x7   :  { %s1467_s20 = smov 0   ;;  %s1469_s21 = smov 0  }
   0x8 LB: > { %s1058_s22 = sadd.s32 4294967295, %s1426_s21   ;;  %s1059_s23 = sadd.s32 4294967294, %s1426_s21   ;;  %s1426_s21 = sphi %s1469_s21, %s16_s21   ;;  %s1422_s20 = sphi %s1467_s20, %s1797_s20   ;;  %s1418_s19 = sphi %s1465_s19, %s1796_s19   ;;  %s1414_s18 = sphi %s1463_s18, %s1795_s18   ;;  %s1410_s17 = sphi %s1461_s17, %s1794_s17   ;;  %s1406_s16 = sphi %s1459_s16, %s1793_s16   ;;  %s1402_s15 = sphi %s1457_s15, %s1792_s15   ;;  %s1398_s14 = sphi %s1455_s14, %s1791_s14   ;;  %s1394_s13 = sphi %s1453_s13, %s1790_s13   ;;  %s1390_s12 = sphi %s1451_s12, %s1789_s12  }
   0x9   : > { %s28_s24 = sadd.s32 1, %s1418_s19  ;;  %s35_s25 = sadd.s32 1, %s1422_s20 }
   0xa   : > { %p29_p0 = scmp.ge.s32.totalorder %s28_s24, 2  ;;  %s44_s26 = sadd.s32 1, %s1406_s16 }
   0xb   : > { %p51_p1 = scmp.ne.s32.totalorder %s1406_s16, %s1402_s15  ;;  %p52_p2 = scmp.eq.s32.totalorder %s1426_s21, 0 }
   0xc   : > { %s1799_s24 = smov (%p29_p0, %s28_s24), 0  ;;  %s1801_s25 = smov (!%p29_p0, %s35_s25), %s1422_s20 }
   0xd   : > { %s40_s27 = ssub.s32 %s1418_s19, %s1799_s24  ;;  %p1514_p3 = por %p52_p2, %p51_p1 }
   0xe   : > { %p37_p4 = scmp.ge.s32.totalorder %s1801_s25, 2  ;;  %s126_s29 = sadd.s32 1, %s1398_s14 }
   0xf   : > { %p136_p5 = scmp.ne.s32.totalorder %s1398_s14, %s1394_s13  ;;  %p137_p6 = scmp.eq.s32.totalorder %s1058_s22, 3 }
  0x10   : > { %s1803_s25 = smov (%p37_p4, %s1801_s25), 0  ;;  %p142_p8 = scmp.ne.s32.totalorder %s1394_s13, %s1390_s12 }
  0x11   : > { %p1523_p7 = por %p137_p6, %p136_p5  ;;  %s39_s4 = ssub.s32 %s1422_s20, %s1803_s25 }
  0x12   : > { %p143_p9 = scmp.eq.s32.totalorder %s1059_s23, 3  ;;  %s41_s5 = sor.u32 %s40_s27, %s39_s4 }
  0x13   : > { %p124_p10 = scmp.eq.s32.totalorder %s39_s4, 0  ;;  %p42_p11 = scmp.eq.s32.totalorder %s41_s5, 0 }
  0x14   : > { %p1531_p12 = por %p143_p9, %p142_p8  ;;  %p1062_p13 = scmp.ge.s32.totalorder %s1426_s21, 4 }
  0x15   : > { %s1536_s7 = scalar_select %p124_p10, %s1398_s14, %s126_s29  }
  0x16   : > { %s1539_s8 = scalar_select %p42_p11, %s1406_s16, %s44_s26  }
  0x17   : > { %165 = sbr.rel (%p1062_p13) target bundleno = 70 (0x46), region = 20 }
  0x1c   : > { %168 = sbr.rel (!%p1514_p3) target bundleno = 70 (0x46), region = 24  ;;  %s170_s9 = sand.u32 (%p1514_p3), 1, %s1406_s16  }
  0x1d   : > { %s1175_s10 = sshll.u32 (%p1514_p3), %s1422_s20, 6  ;;  %s1063_s11 = sshll.u32 (%p1514_p3), %s170_s9, 7 }
  0x1e   : > { %s175_s22 = sadd.s32 (%p1514_p3), %s1418_s19, %s1175_s10  ;;  %s1788_s0 = sld [smem:[#allocation7_spill]] (%p1514_p3) }
  0x1f   : > { %s1066_s23 = sshll.u32 (%p1514_p3), %s175_s22, 2  ;;  %s1555_s26 = scalar_lea.vmem (%p1514_p3), [#allocation3], %s1063_s11 }
  0x24   : > { %s1550_s29 = scalar_lea.vmem %s1788_s0, %s1066_s23 }
  0x25   : > { %v194_v0 = vld [vmem:[%s1550_s29] sm:$0xf]  ;;  %v196_v1 = vld [vmem:[%s1550_s29 + $0x8] sm:$0xf]  ;;  %v198_v2 = vld [vmem:[%s1550_s29 + $0x10] sm:$0xf] }
  0x26   : > { %195 = vst [vmem:[%s1555_s26] sm:$0xf] %v194_v0  ;;  %v200_v3 = vld [vmem:[%s1550_s29 + $0x18] sm:$0xf]  ;;  %v202_v4 = vld [vmem:[%s1550_s29 + $0x20] sm:$0xf] }
  0x27   : > { %197 = vst [vmem:[%s1555_s26 + $0x4] sm:$0xf] %v196_v1  ;;  %v204_v5 = vld [vmem:[%s1550_s29 + $0x28] sm:$0xf]  ;;  %v206_v6 = vld [vmem:[%s1550_s29 + $0x30] sm:$0xf] }
  0x28   : > { %199 = vst [vmem:[%s1555_s26 + $0x8] sm:$0xf] %v198_v2  ;;  %v208_v7 = vld [vmem:[%s1550_s29 + $0x38] sm:$0xf]  ;;  %v210_v8 = vld [vmem:[%s1550_s29 + $0x40] sm:$0xf] }
  0x29   : > { %201 = vst [vmem:[%s1555_s26 + $0xc] sm:$0xf] %v200_v3  ;;  %v212_v9 = vld [vmem:[%s1550_s29 + $0x48] sm:$0xf]  ;;  %v214_v10 = vld [vmem:[%s1550_s29 + $0x50] sm:$0xf] }
  0x2a   : > { %203 = vst [vmem:[%s1555_s26 + $0x10] sm:$0xf] %v202_v4  ;;  %v216_v11 = vld [vmem:[%s1550_s29 + $0x58] sm:$0xf]  ;;  %v218_v12 = vld [vmem:[%s1550_s29 + $0x60] sm:$0xf] }
  0x2b   : > { %205 = vst [vmem:[%s1555_s26 + $0x14] sm:$0xf] %v204_v5  ;;  %v220_v13 = vld [vmem:[%s1550_s29 + $0x68] sm:$0xf]  ;;  %v222_v14 = vld [vmem:[%s1550_s29 + $0x70] sm:$0xf] }
  0x2c   : > { %207 = vst [vmem:[%s1555_s26 + $0x18] sm:$0xf] %v206_v6  ;;  %v224_v15 = vld [vmem:[%s1550_s29 + $0x78] sm:$0xf]  ;;  %v226_v16 = vld [vmem:[%s1550_s29 + $0x80] sm:$0xf] }
  0x2d   : > { %209 = vst [vmem:[%s1555_s26 + $0x1c] sm:$0xf] %v208_v7  ;;  %v228_v17 = vld [vmem:[%s1550_s29 + $0x88] sm:$0xf]  ;;  %v230_v18 = vld [vmem:[%s1550_s29 + $0x90] sm:$0xf] }
  0x2e   : > { %211 = vst [vmem:[%s1555_s26 + $0x20] sm:$0xf] %v210_v8  ;;  %v232_v19 = vld [vmem:[%s1550_s29 + $0x98] sm:$0xf]  ;;  %v234_v20 = vld [vmem:[%s1550_s29 + $0xa0] sm:$0xf] }
  0x2f   : > { %213 = vst [vmem:[%s1555_s26 + $0x24] sm:$0xf] %v212_v9  ;;  %v236_v21 = vld [vmem:[%s1550_s29 + $0xa8] sm:$0xf]  ;;  %v238_v22 = vld [vmem:[%s1550_s29 + $0xb0] sm:$0xf] }
  0x30   : > { %215 = vst [vmem:[%s1555_s26 + $0x28] sm:$0xf] %v214_v10  ;;  %v240_v23 = vld [vmem:[%s1550_s29 + $0xb8] sm:$0xf]  ;;  %v242_v24 = vld [vmem:[%s1550_s29 + $0xc0] sm:$0xf] }
  0x31   : > { %217 = vst [vmem:[%s1555_s26 + $0x2c] sm:$0xf] %v216_v11  ;;  %v244_v25 = vld [vmem:[%s1550_s29 + $0xc8] sm:$0xf]  ;;  %v246_v26 = vld [vmem:[%s1550_s29 + $0xd0] sm:$0xf] }
  0x32   : > { %219 = vst [vmem:[%s1555_s26 + $0x30] sm:$0xf] %v218_v12  ;;  %v248_v27 = vld [vmem:[%s1550_s29 + $0xd8] sm:$0xf]  ;;  %v250_v28 = vld [vmem:[%s1550_s29 + $0xe0] sm:$0xf] }
  0x33   : > { %221 = vst [vmem:[%s1555_s26 + $0x34] sm:$0xf] %v220_v13  ;;  %v252_v29 = vld [vmem:[%s1550_s29 + $0xe8] sm:$0xf]  ;;  %v254_v30 = vld [vmem:[%s1550_s29 + $0xf0] sm:$0xf] }
  0x34   : > { %223 = vst [vmem:[%s1555_s26 + $0x38] sm:$0xf] %v222_v14  ;;  %v256_v31 = vld [vmem:[%s1550_s29 + $0xf8] sm:$0xf] }
  0x35   : > { %225 = vst [vmem:[%s1555_s26 + $0x3c] sm:$0xf] %v224_v15 }
  0x36   : > { %227 = vst [vmem:[%s1555_s26 + $0x40] sm:$0xf] %v226_v16 }
  0x37   : > { %229 = vst [vmem:[%s1555_s26 + $0x44] sm:$0xf] %v228_v17 }
  0x38   : > { %231 = vst [vmem:[%s1555_s26 + $0x48] sm:$0xf] %v230_v18 }
  0x39   : > { %233 = vst [vmem:[%s1555_s26 + $0x4c] sm:$0xf] %v232_v19 }
  0x3a   : > { %235 = vst [vmem:[%s1555_s26 + $0x50] sm:$0xf] %v234_v20 }
  0x3b   : > { %237 = vst [vmem:[%s1555_s26 + $0x54] sm:$0xf] %v236_v21 }
  0x3c   : > { %239 = vst [vmem:[%s1555_s26 + $0x58] sm:$0xf] %v238_v22 }
  0x3d   : > { %241 = vst [vmem:[%s1555_s26 + $0x5c] sm:$0xf] %v240_v23 }
  0x3e   : > { %243 = vst [vmem:[%s1555_s26 + $0x60] sm:$0xf] %v242_v24 }
  0x3f   : > { %245 = vst [vmem:[%s1555_s26 + $0x64] sm:$0xf] %v244_v25 }
  0x40   : > { %247 = vst [vmem:[%s1555_s26 + $0x68] sm:$0xf] %v246_v26 }
  0x41   : > { %249 = vst [vmem:[%s1555_s26 + $0x6c] sm:$0xf] %v248_v27 }
  0x42   : > { %251 = vst [vmem:[%s1555_s26 + $0x70] sm:$0xf] %v250_v28 }
  0x43   : > { %253 = vst [vmem:[%s1555_s26 + $0x74] sm:$0xf] %v252_v29 }
  0x44   : > { %255 = vst [vmem:[%s1555_s26 + $0x78] sm:$0xf] %v254_v30 }
  0x45   : > { %257 = vst [vmem:[%s1555_s26 + $0x7c] sm:$0xf] %v256_v31 }
  0x46 PF: > { %p1067_p0 = scmp.ge.s32.totalorder %s1426_s21, 1  ;;  %p356_p1 = scmp.lt.s32.totalorder %s1426_s21, 5 }
  0x48   : > { %p357_p2 = pnand %p1067_p0, %p356_p1 }
  0x49   : > { %s363_s28 = sand.u32 (!%p357_p2), 1, %s1402_s15   ;;  %s394_s5 = sand.u32 (!%p357_p2), 1, %s1394_s13  }
  0x4a   : > { %360 = sbr.rel (%p357_p2) target bundleno = 393 (0x189), region = 69  ;;  %s1068_s9 = sshll.u32 (!%p357_p2), %s363_s28, 7 }
  0x4b   : > { %s1069_s10 = sshll.u32 (!%p357_p2), %s394_s5, 8  ;;  %s1070_s11 = sshll.u32 (!%p357_p2), %s1410_s17, 4 }
  0x4c   : > { %p399_p3 = scmp.lt.s32.totalorder (!%p357_p2), %s1070_s11, 31  ;;  %s1630_s29 = scalar_lea.vmem (!%p357_p2), [#allocation3], %s1068_s9 }
  0x4d   : > { %s1632_s26 = scalar_lea.vmem (!%p357_p2), [#allocation4], %s1069_s10  ;;  %p1072_p4 = scmp.ne.s32.totalorder (!%p357_p2), %s1410_s17, 0 }
  0x4f   : > { %s1805_s11 = smov (!%p399_p3, %s1070_s11), 31  ;;  %414 = sbr.rel (%p1072_p4) target bundleno = 117 (0x75), region = 77 }
  0x50   : > { %s1071_s22 = sshll.u32 %s1805_s11, 2 }
  0x51   : > { %s1628_s4 = scalar_lea.vmem %s1781_s1, %s1071_s22 }
  0x54   : > { %v1428_v32 = vmov 0.0  }
  0x55   : > { %415 = vst [vmem:[#allocation2 + $0xb0] sm:$0xff] %v1428_v32 }
  0x56   : > { %416 = vst [vmem:[#allocation2] sm:$0xff] %v1428_v32 }
  0x57   : > { %417 = vst [vmem:[#allocation2 + $0xd8] sm:$0xff] %v1428_v32 }
  0x58   : > { %418 = vst [vmem:[#allocation2 + $0x18] sm:$0xff] %v1428_v32 }
  0x59   : > { %419 = vst [vmem:[#allocation2 + $0x50] sm:$0xff] %v1428_v32 }
  0x5a   : > { %420 = vst [vmem:[#allocation2 + $0x68] sm:$0xff] %v1428_v32 }
  0x5b   : > { %421 = vst [vmem:[#allocation2 + $0x30] sm:$0xff] %v1428_v32 }
  0x5c   : > { %422 = vst [vmem:[#allocation2 + $0x48] sm:$0xff] %v1428_v32 }
  0x5d   : > { %423 = vst [vmem:[#allocation2 + $0x80] sm:$0xff] %v1428_v32 }
  0x5e   : > { %424 = vst [vmem:[#allocation2 + $0x88] sm:$0xff] %v1428_v32 }
  0x5f   : > { %425 = vst [vmem:[#allocation2 + $0xe8] sm:$0xff] %v1428_v32 }
  0x60   : > { %426 = vst [vmem:[#allocation2 + $0xb8] sm:$0xff] %v1428_v32 }
  0x61   : > { %427 = vst [vmem:[#allocation2 + $0x60] sm:$0xff] %v1428_v32 }
  0x62   : > { %428 = vst [vmem:[#allocation2 + $0xf0] sm:$0xff] %v1428_v32 }
  0x63   : > { %429 = vst [vmem:[#allocation2 + $0x8] sm:$0xff] %v1428_v32 }
  0x64   : > { %430 = vst [vmem:[#allocation2 + $0x78] sm:$0xff] %v1428_v32 }
  0x65   : > { %431 = vst [vmem:[#allocation2 + $0x38] sm:$0xff] %v1428_v32 }
  0x66   : > { %432 = vst [vmem:[#allocation2 + $0x58] sm:$0xff] %v1428_v32 }
  0x67   : > { %433 = vst [vmem:[#allocation2 + $0x40] sm:$0xff] %v1428_v32 }
  0x68   : > { %434 = vst [vmem:[#allocation2 + $0xc8] sm:$0xff] %v1428_v32 }
  0x69   : > { %435 = vst [vmem:[#allocation2 + $0xe0] sm:$0xff] %v1428_v32 }
  0x6a   : > { %436 = vst [vmem:[#allocation2 + $0x90] sm:$0xff] %v1428_v32 }
  0x6b   : > { %437 = vst [vmem:[#allocation2 + $0x70] sm:$0xff] %v1428_v32 }
  0x6c   : > { %438 = vst [vmem:[#allocation2 + $0xc0] sm:$0xff] %v1428_v32 }
  0x6d   : > { %439 = vst [vmem:[#allocation2 + $0xa8] sm:$0xff] %v1428_v32 }
  0x6e   : > { %440 = vst [vmem:[#allocation2 + $0xd0] sm:$0xff] %v1428_v32 }
  0x6f   : > { %441 = vst [vmem:[#allocation2 + $0x10] sm:$0xff] %v1428_v32 }
  0x70   : > { %442 = vst [vmem:[#allocation2 + $0x28] sm:$0xff] %v1428_v32 }
  0x71   : > { %443 = vst [vmem:[#allocation2 + $0xa0] sm:$0xff] %v1428_v32 }
  0x72   : > { %444 = vst [vmem:[#allocation2 + $0xf8] sm:$0xff] %v1428_v32 }
  0x73   : > { %445 = vst [vmem:[#allocation2 + $0x20] sm:$0xff] %v1428_v32 }
  0x74   : > { %446 = vst [vmem:[#allocation2 + $0x98] sm:$0xff] %v1428_v32 }
  0x75 PF: > { %v1199_v33 = vld [vmem:[%s1628_s4 + $0x38] sm:$0xff]  ;;  %v1198_v34 = vld [vmem:[%s1628_s4 + $0x30] sm:$0xff]  ;;  %v1197_v35 = vld [vmem:[%s1628_s4 + $0x28] sm:$0xff]  ;;  %p1169_p5 = scmp.ne.s32.totalorder %s1410_s17, 1 }
  0x76   : > { %671 = vmatpush.bf16.msra.mxu0 %v1199_v33  ;;  %1201 = vmatpush.bf16.msra.mxu1 %v1199_v33  ;;  %v1196_v36 = vld [vmem:[%s1628_s4 + $0x20] sm:$0xff]  ;;  %v1195_v37 = vld [vmem:[%s1628_s4 + $0x18] sm:$0xff]  ;;  %v1194_v38 = vld [vmem:[%s1628_s4 + $0x10] sm:$0xff] }
  0x77   : > { %1202 = vmatpush.bf16.msra.mxu2 %v1199_v33  ;;  %1203 = vmatpush.bf16.msra.mxu3 %v1199_v33  ;;  %v1193_v39 = vld [vmem:[%s1628_s4 + $0x8] sm:$0xff]  ;;  %v1192_v40 = vld [vmem:[%s1628_s4] sm:$0xff]  ;;  %v1178_v49 = vld [vmem:[%s1630_s29 + $0x10] sm:$0xff] }
  0x78   : > { %v1176_v41 = vld [vmem:[%s1630_s29] sm:$0xff]  ;;  %v1177_v45 = vld [vmem:[%s1630_s29 + $0x8] sm:$0xff]  ;;  %v1182_v50 = vld [vmem:[%s1630_s29 + $0x30] sm:$0xff] }
  0x79   : > { %v1180_v42 = vld [vmem:[%s1630_s29 + $0x20] sm:$0xff]  ;;  %v1181_v46 = vld [vmem:[%s1630_s29 + $0x28] sm:$0xff]  ;;  %v1186_v51 = vld [vmem:[%s1630_s29 + $0x50] sm:$0xff] }
  0x7a   : > { %672 = vmatpush.bf16.msra.mxu0 %v1198_v34  ;;  %1204 = vmatpush.bf16.msra.mxu1 %v1198_v34  ;;  %v1184_v43 = vld [vmem:[%s1630_s29 + $0x40] sm:$0xff]  ;;  %v1185_v47 = vld [vmem:[%s1630_s29 + $0x48] sm:$0xff]  ;;  %v1190_v52 = vld [vmem:[%s1630_s29 + $0x70] sm:$0xff] }
  0x7b   : > { %1205 = vmatpush.bf16.msra.mxu2 %v1198_v34  ;;  %1206 = vmatpush.bf16.msra.mxu3 %v1198_v34  ;;  %v1188_v44 = vld [vmem:[%s1630_s29 + $0x60] sm:$0xff]  ;;  %v1189_v48 = vld [vmem:[%s1630_s29 + $0x68] sm:$0xff]  ;;  %v1179_v53 = vld [vmem:[%s1630_s29 + $0x18] sm:$0xff] }
  0x7c   : > { %v1183_v54 = vld [vmem:[%s1630_s29 + $0x38] sm:$0xff]  ;;  %v447_v57 = vld [vmem:[#allocation2 + $0xb0] sm:$0xff]  ;;  %v455_v58 = vld [vmem:[#allocation2 + $0x80] sm:$0xff] }
  0x7d   : > { %v1187_v55 = vld [vmem:[%s1630_s29 + $0x58] sm:$0xff]  ;;  %v471_v0 = vld [vmem:[#allocation2 + $0xa8] sm:$0xff]  ;;  %v448_v1 = vld [vmem:[#allocation2] sm:$0xff] }
  0x7e   : > { %673 = vmatpush.bf16.msra.mxu0 %v1197_v35  ;;  %1207 = vmatpush.bf16.msra.mxu1 %v1197_v35  ;;  %v1191_v56 = vld [vmem:[%s1630_s29 + $0x78] sm:$0xff]  ;;  %v456_v2 = vld [vmem:[#allocation2 + $0x88] sm:$0xff]  ;;  %v472_v12 = vld [vmem:[#allocation2 + $0xd0] sm:$0xff] }
  0x7f   : > { %1208 = vmatpush.bf16.msra.mxu2 %v1197_v35  ;;  %1209 = vmatpush.bf16.msra.mxu3 %v1197_v35  ;;  %v463_v63 = vld [vmem:[#allocation2 + $0x38] sm:$0xff]  ;;  %v457_v14 = vld [vmem:[#allocation2 + $0xe8] sm:$0xff]  ;;  %v465_v23 = vld [vmem:[#allocation2 + $0x40] sm:$0xff] }
  0x80   : > { %v464_v11 = vld [vmem:[#allocation2 + $0x58] sm:$0xff]  ;;  %v473_v24 = vld [vmem:[#allocation2 + $0x10] sm:$0xff]  ;;  %v466_v35 = vld [vmem:[#allocation2 + $0xc8] sm:$0xff] }
  0x81   : > { %v449_v13 = vld [vmem:[#allocation2 + $0xd8] sm:$0xff] }
  0x82   : > { %674 = vmatpush.bf16.msra.mxu0 %v1196_v36  ;;  %1210 = vmatpush.bf16.msra.mxu1 %v1196_v36  ;;  %v450_v25 = vld [vmem:[#allocation2 + $0x18] sm:$0xff] }
  0x83   : > { %1211 = vmatpush.bf16.msra.mxu2 %v1196_v36  ;;  %1212 = vmatpush.bf16.msra.mxu3 %v1196_v36  ;;  %v458_v26 = vld [vmem:[#allocation2 + $0xb8] sm:$0xff]  ;;  %v474_v36 = vld [vmem:[#allocation2 + $0x28] sm:$0xff] }
  0x86   : > { %675 = vmatpush.bf16.msra.mxu0 %v1195_v37  ;;  %1213 = vmatpush.bf16.msra.mxu1 %v1195_v37 }
  0x87   : > { %1214 = vmatpush.bf16.msra.mxu2 %v1195_v37  ;;  %1215 = vmatpush.bf16.msra.mxu3 %v1195_v37  ;;  %v451_v37 = vld [vmem:[#allocation2 + $0x50] sm:$0xff] }
  0x8a   : > { %676 = vmatpush.bf16.msra.mxu0 %v1194_v38  ;;  %1216 = vmatpush.bf16.msra.mxu1 %v1194_v38 }
  0x8b   : > { %1217 = vmatpush.bf16.msra.mxu2 %v1194_v38  ;;  %1218 = vmatpush.bf16.msra.mxu3 %v1194_v38  ;;  %v459_v38 = vld [vmem:[#allocation2 + $0x60] sm:$0xff] }
  0x8e   : > { %677 = vmatpush.bf16.msra.mxu0 %v1193_v39  ;;  %1219 = vmatpush.bf16.msra.mxu1 %v1193_v39 }
  0x8f   : > { %1220 = vmatpush.bf16.msra.mxu2 %v1193_v39  ;;  %1221 = vmatpush.bf16.msra.mxu3 %v1193_v39 }
  0x92   : > { %678 = vmatpush.bf16.msra.mxu0 %v1192_v40  ;;  %1222 = vmatpush.bf16.msra.mxu1 %v1192_v40 }
  0x93   : > { %1223 = vmatpush.bf16.msra.mxu2 %v1192_v40  ;;  %1224 = vmatpush.bf16.msra.mxu3 %v1192_v40 }
  0x95   : > { %679 = vmatmul.bf16.vlgmr.msra.gmra.mxu0 %v1176_v41  ;;  %699 = vmatmul.bf16.vlgmr.msra.gmra.mxu1 %v1180_v42 }
  0x96   : > { %719 = vmatmul.bf16.vlgmr.msra.gmra.mxu2 %v1184_v43  ;;  %739 = vmatmul.bf16.vlgmr.msra.gmra.mxu3 %v1188_v44 }
  0xa5   : > { %684 = vmatmul.bf16.gmra.mxu0 %v1177_v45  ;;  %704 = vmatmul.bf16.gmra.mxu1 %v1181_v46 }
  0xa6   : > { %724 = vmatmul.bf16.gmra.mxu2 %v1185_v47  ;;  %744 = vmatmul.bf16.gmra.mxu3 %v1189_v48  ;;  %v467_v47 = vld [vmem:[#allocation2 + $0xe0] sm:$0xff] }
  0xa7   : > { %v475_v48 = vld [vmem:[#allocation2 + $0xa0] sm:$0xff] }
  0xb5   : > { %689 = vmatmul.bf16.gmra.mxu0 %v1178_v49  ;;  %709 = vmatmul.bf16.gmra.mxu1 %v1182_v50  ;;  %v452_v49 = vld [vmem:[#allocation2 + $0x68] sm:$0xff]  ;;  %v460_v50 = vld [vmem:[#allocation2 + $0xf0] sm:$0xff] }
  0xb6   : > { %729 = vmatmul.bf16.gmra.mxu2 %v1186_v51  ;;  %749 = vmatmul.bf16.gmra.mxu3 %v1190_v52 }
  0xc5   : > { %694 = vmatmul.bf16.gmra.mxu0 %v1179_v53  ;;  %714 = vmatmul.bf16.gmra.mxu1 %v1183_v54 }
  0xc6   : > { %734 = vmatmul.bf16.gmra.mxu2 %v1187_v55  ;;  %754 = vmatmul.bf16.gmra.mxu3 %v1191_v56 }
 0x112   : > { %v680_v59 = vpop.f32.mrf.mxu0  ;;  %v700_v60 = vpop.f32.mrf.mxu1 }
 0x113   : > { %v760_v61 = vadd.f32 %v680_v59, %v447_v57  ;;  %v768_v62 = vadd.f32 %v700_v60, %v455_v58  ;;  %v468_v59 = vld [vmem:[#allocation2 + $0x90] sm:$0xff]  ;;  %v476_v60 = vld [vmem:[#allocation2 + $0xf8] sm:$0xff] }
 0x115   : > { %792 = vst [vmem:[#allocation2 + $0xb0] sm:$0xff] %v760_v61  ;;  %v453_v61 = vld [vmem:[#allocation2 + $0x30] sm:$0xff] }
 0x116   : > { %800 = vst [vmem:[#allocation2 + $0x80] sm:$0xff] %v768_v62  ;;  %v461_v62 = vld [vmem:[#allocation2 + $0x8] sm:$0xff] }
 0x119   : > { %v720_v3 = vpop.f32.mrf.mxu2  ;;  %v740_v4 = vpop.f32.mrf.mxu3 }
 0x11a   : > { %v776_v5 = vadd.f32 %v720_v3, %v463_v63  ;;  %v784_v6 = vadd.f32 %v740_v4, %v471_v0  ;;  %v682_v7 = vpop.f32.mrf.mxu0  ;;  %v702_v8 = vpop.f32.mrf.mxu1 }
 0x11b   : > { %v761_v9 = vadd.f32 %v682_v7, %v448_v1  ;;  %v769_v10 = vadd.f32 %v702_v8, %v456_v2  ;;  %v469_v7 = vld [vmem:[#allocation2 + $0x70] sm:$0xff]  ;;  %v477_v8 = vld [vmem:[#allocation2 + $0x20] sm:$0xff] }
 0x11c   : > { %808 = vst [vmem:[#allocation2 + $0x38] sm:$0xff] %v776_v5 }
 0x11d   : > { %816 = vst [vmem:[#allocation2 + $0xa8] sm:$0xff] %v784_v6 }
 0x11e   : > { %793 = vst [vmem:[#allocation2] sm:$0xff] %v761_v9  ;;  %v454_v9 = vld [vmem:[#allocation2 + $0x48] sm:$0xff] }
 0x11f   : > { %801 = vst [vmem:[#allocation2 + $0x88] sm:$0xff] %v769_v10  ;;  %v462_v10 = vld [vmem:[#allocation2 + $0x78] sm:$0xff] }
 0x121   : > { %v722_v15 = vpop.f32.mrf.mxu2  ;;  %v742_v16 = vpop.f32.mrf.mxu3 }
 0x122   : > { %v777_v17 = vadd.f32 %v722_v15, %v464_v11  ;;  %v785_v18 = vadd.f32 %v742_v16, %v472_v12  ;;  %v685_v19 = vpop.f32.mrf.mxu0  ;;  %v705_v20 = vpop.f32.mrf.mxu1 }
 0x123   : > { %v762_v21 = vadd.f32 %v685_v19, %v449_v13  ;;  %v770_v22 = vadd.f32 %v705_v20, %v457_v14  ;;  %v470_v19 = vld [vmem:[#allocation2 + $0xc0] sm:$0xff]  ;;  %v478_v20 = vld [vmem:[#allocation2 + $0x98] sm:$0xff] }
 0x124   : > { %809 = vst [vmem:[#allocation2 + $0x58] sm:$0xff] %v777_v17 }
 0x125   : > { %817 = vst [vmem:[#allocation2 + $0xd0] sm:$0xff] %v785_v18 }
 0x126   : > { %794 = vst [vmem:[#allocation2 + $0xd8] sm:$0xff] %v762_v21 }
 0x127   : > { %802 = vst [vmem:[#allocation2 + $0xe8] sm:$0xff] %v770_v22 }
 0x129   : > { %v725_v27 = vpop.f32.mrf.mxu2  ;;  %v745_v28 = vpop.f32.mrf.mxu3 }
 0x12a   : > { %v778_v29 = vadd.f32 %v725_v27, %v465_v23  ;;  %v786_v30 = vadd.f32 %v745_v28, %v473_v24  ;;  %v687_v31 = vpop.f32.mrf.mxu0  ;;  %v707_v32 = vpop.f32.mrf.mxu1 }
 0x12b   : > { %v763_v33 = vadd.f32 %v687_v31, %v450_v25  ;;  %v771_v34 = vadd.f32 %v707_v32, %v458_v26 }
 0x12c   : > { %810 = vst [vmem:[#allocation2 + $0x40] sm:$0xff] %v778_v29 }
 0x12d   : > { %818 = vst [vmem:[#allocation2 + $0x10] sm:$0xff] %v786_v30 }
 0x12e   : > { %795 = vst [vmem:[#allocation2 + $0x18] sm:$0xff] %v763_v33 }
 0x12f   : > { %803 = vst [vmem:[#allocation2 + $0xb8] sm:$0xff] %v771_v34 }
 0x131   : > { %v727_v39 = vpop.f32.mrf.mxu2  ;;  %v747_v40 = vpop.f32.mrf.mxu3 }
 0x132   : > { %v779_v41 = vadd.f32 %v727_v39, %v466_v35  ;;  %v787_v42 = vadd.f32 %v747_v40, %v474_v36  ;;  %v690_v43 = vpop.f32.mrf.mxu0  ;;  %v710_v44 = vpop.f32.mrf.mxu1 }
 0x133   : > { %v764_v45 = vadd.f32 %v690_v43, %v451_v37  ;;  %v772_v46 = vadd.f32 %v710_v44, %v459_v38 }
 0x134   : > { %811 = vst [vmem:[#allocation2 + $0xc8] sm:$0xff] %v779_v41 }
 0x135   : > { %819 = vst [vmem:[#allocation2 + $0x28] sm:$0xff] %v787_v42 }
 0x136   : > { %796 = vst [vmem:[#allocation2 + $0x50] sm:$0xff] %v764_v45 }
 0x137   : > { %804 = vst [vmem:[#allocation2 + $0x60] sm:$0xff] %v772_v46 }
 0x139   : > { %v730_v51 = vpop.f32.mrf.mxu2  ;;  %v750_v52 = vpop.f32.mrf.mxu3 }
 0x13a   : > { %v780_v53 = vadd.f32 %v730_v51, %v467_v47  ;;  %v788_v54 = vadd.f32 %v750_v52, %v475_v48  ;;  %v692_v55 = vpop.f32.mrf.mxu0  ;;  %v712_v56 = vpop.f32.mrf.mxu1 }
 0x13b   : > { %v765_v57 = vadd.f32 %v692_v55, %v452_v49  ;;  %v773_v58 = vadd.f32 %v712_v56, %v460_v50 }
 0x13c   : > { %812 = vst [vmem:[#allocation2 + $0xe0] sm:$0xff] %v780_v53 }
 0x13d   : > { %820 = vst [vmem:[#allocation2 + $0xa0] sm:$0xff] %v788_v54 }
 0x13e   : > { %797 = vst [vmem:[#allocation2 + $0x68] sm:$0xff] %v765_v57 }
 0x13f   : > { %805 = vst [vmem:[#allocation2 + $0xf0] sm:$0xff] %v773_v58 }
 0x141   : > { %v732_v63 = vpop.f32.mrf.mxu2  ;;  %v752_v0 = vpop.f32.mrf.mxu3 }
 0x142   : > { %v781_v1 = vadd.f32 %v732_v63, %v468_v59  ;;  %v789_v2 = vadd.f32 %v752_v0, %v476_v60  ;;  %v695_v3 = vpop.f32.mrf.mxu0  ;;  %v715_v4 = vpop.f32.mrf.mxu1 }
 0x143   : > { %v766_v5 = vadd.f32 %v695_v3, %v453_v61  ;;  %v774_v6 = vadd.f32 %v715_v4, %v461_v62 }
 0x144   : > { %813 = vst [vmem:[#allocation2 + $0x90] sm:$0xff] %v781_v1 }
 0x145   : > { %821 = vst [vmem:[#allocation2 + $0xf8] sm:$0xff] %v789_v2 }
 0x146   : > { %798 = vst [vmem:[#allocation2 + $0x30] sm:$0xff] %v766_v5 }
 0x147   : > { %806 = vst [vmem:[#allocation2 + $0x8] sm:$0xff] %v774_v6 }
 0x149   : > { %v735_v11 = vpop.f32.mrf.mxu2  ;;  %v755_v12 = vpop.f32.mrf.mxu3 }
 0x14a   : > { %v782_v13 = vadd.f32 %v735_v11, %v469_v7  ;;  %v790_v14 = vadd.f32 %v755_v12, %v477_v8  ;;  %v697_v15 = vpop.f32.mrf.mxu0  ;;  %v717_v16 = vpop.f32.mrf.mxu1 }
 0x14b   : > { %v767_v17 = vadd.f32 %v697_v15, %v454_v9  ;;  %v775_v18 = vadd.f32 %v717_v16, %v462_v10 }
 0x14c   : > { %814 = vst [vmem:[#allocation2 + $0x70] sm:$0xff] %v782_v13 }
 0x14d   : > { %822 = vst [vmem:[#allocation2 + $0x20] sm:$0xff] %v790_v14 }
 0x14e   : > { %799 = vst [vmem:[#allocation2 + $0x48] sm:$0xff] %v767_v17 }
 0x14f   : > { %807 = vst [vmem:[#allocation2 + $0x78] sm:$0xff] %v775_v18 }
 0x151   : > { %v737_v21 = vpop.f32.mrf.mxu2  ;;  %v757_v22 = vpop.f32.mrf.mxu3  ;;  %827 = sbr.rel (%p1169_p5) target bundleno = 377 (0x179), region = 81 }
 0x152   : > { %v783_v23 = vadd.f32 %v737_v21, %v470_v19  ;;  %v791_v24 = vadd.f32 %v757_v22, %v478_v20 }
 0x154   : > { %815 = vst [vmem:[#allocation2 + $0xc0] sm:$0xff] %v783_v23 }
 0x155   : > { %823 = vst [vmem:[#allocation2 + $0x98] sm:$0xff] %v791_v24 }
 0x156   : > { %v828_v25 = vld [vmem:[#allocation2 + $0xb0] sm:$0xff]  ;;  %v1663_v26 = vld [vmem:[%s1782_s2] ss:$0 sm:$0xff]  ;;  %v830_v28 = vld [vmem:[#allocation2 + $0xd8] sm:$0xff] }
 0x157   : > { %v829_v27 = vld [vmem:[#allocation2] sm:$0xff]  ;;  %v831_v29 = vld [vmem:[#allocation2 + $0x18] sm:$0xff]  ;;  %v864_v30 = vadd.f32 %v1663_v26, %v828_v25  ;;  %v866_v32 = vadd.f32 %v1663_v26, %v830_v28  ;;  %v832_v33 = vld [vmem:[#allocation2 + $0x50] sm:$0xff] }
 0x158   : > { %v865_v31 = vadd.f32 %v1663_v26, %v829_v27  ;;  %v833_v34 = vld [vmem:[#allocation2 + $0x68] sm:$0xff]  ;;  %v867_v35 = vadd.f32 %v1663_v26, %v831_v29  ;;  %v834_v36 = vld [vmem:[#allocation2 + $0x30] sm:$0xff]  ;;  %v868_v37 = vadd.f32 %v1663_v26, %v832_v33  ;;  %v836_v40 = vld [vmem:[#allocation2 + $0x80] sm:$0xff] }
 0x159   : > { %896 = vst [vmem:[%s1632_s26] sm:$0xff] %v864_v30  ;;  %v835_v38 = vld [vmem:[#allocation2 + $0x48] sm:$0xff]  ;;  %v869_v39 = vadd.f32 %v1663_v26, %v833_v34  ;;  %v870_v41 = vadd.f32 %v1663_v26, %v834_v36  ;;  %v872_v45 = vadd.f32 %v1663_v26, %v836_v40  ;;  %v839_v46 = vld [vmem:[#allocation2 + $0xb8] sm:$0xff]  ;;  %v840_v48 = vld [vmem:[#allocation2 + $0x60] sm:$0xff] }
 0x15a   : > { %897 = vst [vmem:[%s1632_s26 + $0x8] sm:$0xff] %v865_v31  ;;  %v837_v42 = vld [vmem:[#allocation2 + $0x88] sm:$0xff]  ;;  %v871_v43 = vadd.f32 %v1663_v26, %v835_v38  ;;  %v841_v50 = vld [vmem:[#allocation2 + $0xf0] sm:$0xff]  ;;  %v875_v51 = vadd.f32 %v1663_v26, %v839_v46  ;;  %v876_v53 = vadd.f32 %v1663_v26, %v840_v48  ;;  %v843_v54 = vld [vmem:[#allocation2 + $0x78] sm:$0xff] }
 0x15b   : > { %898 = vst [vmem:[%s1632_s26 + $0x10] sm:$0xff] %v866_v32  ;;  %v838_v44 = vld [vmem:[#allocation2 + $0xe8] sm:$0xff]  ;;  %v873_v47 = vadd.f32 %v1663_v26, %v837_v42  ;;  %v877_v55 = vadd.f32 %v1663_v26, %v841_v50  ;;  %v844_v56 = vld [vmem:[#allocation2 + $0x38] sm:$0xff]  ;;  %v879_v59 = vadd.f32 %v1663_v26, %v843_v54  ;;  %v846_v60 = vld [vmem:[#allocation2 + $0x40] sm:$0xff] }
 0x15c   : > { %899 = vst [vmem:[%s1632_s26 + $0x18] sm:$0xff] %v867_v35  ;;  %v874_v49 = vadd.f32 %v1663_v26, %v838_v44  ;;  %v842_v52 = vld [vmem:[#allocation2 + $0x8] sm:$0xff]  ;;  %v845_v58 = vld [vmem:[#allocation2 + $0x58] sm:$0xff]  ;;  %v880_v61 = vadd.f32 %v1663_v26, %v844_v56  ;;  %v848_v0 = vld [vmem:[#allocation2 + $0xe0] sm:$0xff]  ;;  %v882_v1 = vadd.f32 %v1663_v26, %v846_v60 }
 0x15d   : > { %900 = vst [vmem:[%s1632_s26 + $0x20] sm:$0xff] %v868_v37  ;;  %v878_v57 = vadd.f32 %v1663_v26, %v842_v52  ;;  %v847_v62 = vld [vmem:[#allocation2 + $0xc8] sm:$0xff]  ;;  %v881_v63 = vadd.f32 %v1663_v26, %v845_v58  ;;  %v849_v2 = vld [vmem:[#allocation2 + $0x90] sm:$0xff]  ;;  %v884_v5 = vadd.f32 %v1663_v26, %v848_v0  ;;  %v851_v6 = vld [vmem:[#allocation2 + $0xc0] sm:$0xff] }
 0x15e   : > { %901 = vst [vmem:[%s1632_s26 + $0x28] sm:$0xff] %v869_v39  ;;  %v883_v3 = vadd.f32 %v1663_v26, %v847_v62  ;;  %v850_v4 = vld [vmem:[#allocation2 + $0x70] sm:$0xff]  ;;  %v885_v7 = vadd.f32 %v1663_v26, %v849_v2  ;;  %v852_v8 = vld [vmem:[#allocation2 + $0xa8] sm:$0xff]  ;;  %v887_v11 = vadd.f32 %v1663_v26, %v851_v6  ;;  %v856_v16 = vld [vmem:[#allocation2 + $0xa0] sm:$0xff] }
 0x15f   : > { %902 = vst [vmem:[%s1632_s26 + $0x30] sm:$0xff] %v870_v41  ;;  %v886_v9 = vadd.f32 %v1663_v26, %v850_v4  ;;  %v853_v10 = vld [vmem:[#allocation2 + $0xd0] sm:$0xff]  ;;  %v888_v13 = vadd.f32 %v1663_v26, %v852_v8  ;;  %v855_v14 = vld [vmem:[#allocation2 + $0x28] sm:$0xff]  ;;  %v857_v18 = vld [vmem:[#allocation2 + $0xf8] sm:$0xff]  ;;  %v892_v21 = vadd.f32 %v1663_v26, %v856_v16 }
 0x160   : > { %903 = vst [vmem:[%s1632_s26 + $0x38] sm:$0xff] %v871_v43  ;;  %v854_v12 = vld [vmem:[#allocation2 + $0x10] sm:$0xff]  ;;  %v889_v15 = vadd.f32 %v1663_v26, %v853_v10  ;;  %v891_v19 = vadd.f32 %v1663_v26, %v855_v14  ;;  %v858_v20 = vld [vmem:[#allocation2 + $0x20] sm:$0xff]  ;;  %v859_v22 = vld [vmem:[#allocation2 + $0x98] sm:$0xff]  ;;  %v893_v23 = vadd.f32 %v1663_v26, %v857_v18 }
 0x161   : > { %904 = vst [vmem:[%s1632_s26 + $0x40] sm:$0xff] %v872_v45  ;;  %v890_v17 = vadd.f32 %v1663_v26, %v854_v12  ;;  %v894_v24 = vadd.f32 %v1663_v26, %v858_v20  ;;  %v895_v25 = vadd.f32 %v1663_v26, %v859_v22 }
 0x162   : > { %905 = vst [vmem:[%s1632_s26 + $0x48] sm:$0xff] %v873_v47 }
 0x163   : > { %906 = vst [vmem:[%s1632_s26 + $0x50] sm:$0xff] %v874_v49 }
 0x164   : > { %907 = vst [vmem:[%s1632_s26 + $0x58] sm:$0xff] %v875_v51 }
 0x165   : > { %908 = vst [vmem:[%s1632_s26 + $0x60] sm:$0xff] %v876_v53 }
 0x166   : > { %909 = vst [vmem:[%s1632_s26 + $0x68] sm:$0xff] %v877_v55 }
 0x167   : > { %910 = vst [vmem:[%s1632_s26 + $0x70] sm:$0xff] %v878_v57 }
 0x168   : > { %911 = vst [vmem:[%s1632_s26 + $0x78] sm:$0xff] %v879_v59 }
 0x169   : > { %912 = vst [vmem:[%s1632_s26 + $0x80] sm:$0xff] %v880_v61 }
 0x16a   : > { %913 = vst [vmem:[%s1632_s26 + $0x88] sm:$0xff] %v881_v63 }
 0x16b   : > { %914 = vst [vmem:[%s1632_s26 + $0x90] sm:$0xff] %v882_v1 }
 0x16c   : > { %915 = vst [vmem:[%s1632_s26 + $0x98] sm:$0xff] %v883_v3 }
 0x16d   : > { %916 = vst [vmem:[%s1632_s26 + $0xa0] sm:$0xff] %v884_v5 }
 0x16e   : > { %917 = vst [vmem:[%s1632_s26 + $0xa8] sm:$0xff] %v885_v7 }
 0x16f   : > { %918 = vst [vmem:[%s1632_s26 + $0xb0] sm:$0xff] %v886_v9 }
 0x170   : > { %919 = vst [vmem:[%s1632_s26 + $0xb8] sm:$0xff] %v887_v11 }
 0x171   : > { %920 = vst [vmem:[%s1632_s26 + $0xc0] sm:$0xff] %v888_v13 }
 0x172   : > { %921 = vst [vmem:[%s1632_s26 + $0xc8] sm:$0xff] %v889_v15 }
 0x173   : > { %922 = vst [vmem:[%s1632_s26 + $0xd0] sm:$0xff] %v890_v17 }
 0x174   : > { %923 = vst [vmem:[%s1632_s26 + $0xd8] sm:$0xff] %v891_v19 }
 0x175   : > { %924 = vst [vmem:[%s1632_s26 + $0xe0] sm:$0xff] %v892_v21 }
 0x176   : > { %925 = vst [vmem:[%s1632_s26 + $0xe8] sm:$0xff] %v893_v23 }
 0x177   : > { %926 = vst [vmem:[%s1632_s26 + $0xf0] sm:$0xff] %v894_v24 }
 0x178   : > { %927 = vst [vmem:[%s1632_s26 + $0xf8] sm:$0xff] %v895_v25 }
 0x179 PF: > { %s1200_s17 = sshll.u32 %s1414_s18, 8  ;;  %s942_s22 = sshll.u32 %s1632_s26, 4  ;;  %s943_s22 = int_to_ptr.vmem [resolvable:$true] %s942_s22 }
 0x17a   : > { %s941_s11 = scalar_lea.hbm %s1783_s3, %s1200_s17  ;;  %s929_s27 = scalar_lea.sflag [#allocation5], %s394_s5 }
 0x17b   : > { %s944_s23 = sshll.u32 %s941_s11, 4  ;;  %s1336_s18 = scalar_lea.hbm %s1783_s3, 512  ;;  %s945_s23 = int_to_ptr.hbm [resolvable:$true] %s944_s23 }
 0x17c   : > { %s1330_s4 = sshra.s32 %s945_s23, 4  ;;  %s1331_s4 = int_to_ptr.hbm [resolvable:$true] %s1330_s4 }
 0x17d   : > { %s1332_s29 = scalar_lea.hbm %s1331_s4, 256  ;;  %p1337_p10 = scmp.lt.s32.totalorder %s1331_s4, %s1783_s3 }
 0x17e   : > { %p1333_p6 = scmp.ne.s32.totalorder %s1331_s4, %s1332_s29  ;;  %p1338_p11 = scmp.lt.s32.totalorder %s1336_s18, %s1332_s29 }
 0x180   : > { %p1334_p8 = pnand %p1333_p6, %p1523_p7  ;;  %p1339_p13 = por %p1338_p11, %p1337_p10 }
 0x182   : > { %p1335_p9 = pneg %p1334_p8 }
 0x184   : > { %p1340_p0 = pnand %p1339_p13, %p1335_p9 }
 0x186   : > { %1343 = shalt.err (!%p1340_p0)
}
 0x187   : > { %s1429_s5 = smov 128   ;;  %s1430_s26 = smov 8  }
 0x188   : > { %1225 = dma.vmem_to_hbm [thread:$0]  (%p1523_p7), %s943_s22, 4096, %s945_s23, %s929_s27, %s1429_s5, %s1429_s5, %s1430_s26  }
 0x189 PF: > { %p1231_p1 = scmp.ge.s32.totalorder %s1426_s21, 2  ;;  %s959_s17 = sand.u32 1, %s1390_s12  }
 0x18a   : > { %s960_s0 = scalar_lea.sflag [#allocation5], %s959_s17 }
 0x18b   : > { %p1228_p2 = pnand %p1231_p1, %p1531_p12 }
 0x18d   : > { %p1229_p3 = pneg %p1228_p2 }
 0x18f   : > { %1385 = dma.done.wait (%p1229_p3), %s960_s0, 4096  }
 0x190   : > { %1387 = vsyncadd (%p1229_p3), %s960_s0, 4294963200  ;;  %s16_s21 = sadd.s32 1, %s1426_s21   ;;  %s1789_s12 = smov %s1394_s13 }
 0x191   : > { %p13_p4 = scmp.ge.s32.totalorder %s16_s21, 6   ;;  %s1790_s13 = smov %s1398_s14 }
 0x192   : > { %s1791_s14 = smov %s1536_s7  ;;  %s1792_s15 = smov %s1406_s16 }
 0x193   : > { %s1793_s16 = smov %s1539_s8  ;;  %s1794_s17 = smov %s1418_s19 }
 0x194   : > { %s1795_s18 = smov %s1422_s20  ;;  %s1796_s19 = smov %s1799_s24 }
 0x195   : > { %s1797_s20 = smov %s1803_s25  ;;  %15 = sbr.rel (!%p13_p4) target bundleno = 8 (0x8), region = 127 }
 0x19a   :  { %966 = vsyncpa [#allocation5], 1 }
 0x19b   :  { %968 = vsyncpa [#allocation5 + $0x1], 1 }

// kernel: _forward_impl.4
= control target key start
LH: loop header
LB: loop body
LE: loop exit
PB: predicated region body
PF: predicated region fallthrough
CT: control target
= control target key end

     0   :  { %s2335_s15 = smov 0   ;;  %s2337_s16 = smov 0   ;;  %s3591_s0 = inlined_call_operand.vmem [shape: f32[128,256], index: 0, kind: input, shape index: {}]   ;;  %s3592_s1 = inlined_call_operand.vmem [shape: f32[128,3], index: 1, kind: input, shape index: {}]   ;;  %s3593_s2 = inlined_call_operand.vmem [shape: f32[128,3], index: 2, kind: input, shape index: {}]   ;;  %s3594_s3 = inlined_call_operand.vmem [shape: f32[128,3], index: 3, kind: input, shape index: {}]   ;;  %s3595_s4 = inlined_call_operand.vmem [shape: bf16[256,128], index: 4, kind: output, shape index: {}]  }
   0x1   :  { %s2339_s17 = smov 0   ;;  %s2341_s18 = smov 0  }
   0x2   :  { %s2343_s19 = smov 0  }
   0x3 LB: > { %s23_s20 = sadd.s32 1, %s2301_s18  ;;  %p42_p1 = scmp.ne.s32.totalorder %s2293_s16, %s2289_s15  ;;  %s2305_s19 = sphi %s2343_s19, %s14_s19   ;;  %s2301_s18 = sphi %s2341_s18, %s3745_s18   ;;  %s2297_s17 = sphi %s2339_s17, %s3744_s17   ;;  %s2293_s16 = sphi %s2337_s16, %s3743_s16   ;;  %s2289_s15 = sphi %s2335_s15, %s3742_s15  }
   0x4   : > { %p24_p0 = scmp.ge.s32.totalorder %s23_s20, 2  ;;  %p43_p2 = scmp.eq.s32.totalorder %s2305_s19, 0 }
   0x5   : > { %s35_s22 = sadd.s32 1, %s2293_s16  ;;  %p1672_p5 = scmp.ge.s32.totalorder %s2305_s19, 2 }
   0x6   : > { %s3747_s20 = smov (%p24_p0, %s23_s20), 0  ;;  %p44_p3 = por %p43_p2, %p42_p1 }
   0x7   : > { %s31_s21 = ssub.s32 %s2301_s18, %s3747_s20  ;;  %201 = sbr.rel (%p1672_p5) target bundleno = 32 (0x20), region = 28 }
   0x8   : > { %p33_p4 = scmp.eq.s32.totalorder %s31_s21, 0 }
   0xa   : > { %s2370_s23 = scalar_select %p33_p4, %s2293_s16, %s35_s22  }
   0xc   : > { %204 = sbr.rel (!%p44_p3) target bundleno = 32 (0x20), region = 32  ;;  %s206_s24 = sand.u32 (%p44_p3), 1, %s2293_s16  }
   0xd   : > { %s1674_s25 = sshll.u32 (%p44_p3), %s2301_s18, 3  ;;  %s1673_s26 = sshll.u32 (%p44_p3), %s206_s24, 7 }
   0xe   : > { %s2378_s29 = scalar_lea.vmem (%p44_p3), %s3591_s0, %s1674_s25  ;;  %s208_s30 = scalar_lea.vmem (%p44_p3), [#allocation2], %s1673_s26 }
   0xf   : > { %v272_v0 = vld [vmem:[%s2378_s29] sm:$0xff] (%p44_p3)  ;;  %v274_v1 = vld [vmem:[%s2378_s29 + $0x10] sm:$0xff] (%p44_p3) }
  0x10   : > { %v276_v2 = vld [vmem:[%s2378_s29 + $0x20] sm:$0xff] (%p44_p3)  ;;  %273 = vst [vmem:[%s208_s30] sm:$0xff] (%p44_p3), %v272_v0  ;;  %v278_v3 = vld [vmem:[%s2378_s29 + $0x30] sm:$0xff] (%p44_p3) }
  0x11   : > { %275 = vst [vmem:[%s208_s30 + $0x8] sm:$0xff] %v274_v1  ;;  %v280_v4 = vld [vmem:[%s2378_s29 + $0x40] sm:$0xff]  ;;  %v282_v5 = vld [vmem:[%s2378_s29 + $0x50] sm:$0xff] }
  0x12   : > { %277 = vst [vmem:[%s208_s30 + $0x10] sm:$0xff] %v276_v2  ;;  %v284_v6 = vld [vmem:[%s2378_s29 + $0x60] sm:$0xff]  ;;  %v286_v7 = vld [vmem:[%s2378_s29 + $0x70] sm:$0xff] }
  0x13   : > { %279 = vst [vmem:[%s208_s30 + $0x18] sm:$0xff] %v278_v3  ;;  %v288_v8 = vld [vmem:[%s2378_s29 + $0x80] sm:$0xff]  ;;  %v290_v9 = vld [vmem:[%s2378_s29 + $0x90] sm:$0xff] }
  0x14   : > { %281 = vst [vmem:[%s208_s30 + $0x20] sm:$0xff] %v280_v4  ;;  %v292_v10 = vld [vmem:[%s2378_s29 + $0xa0] sm:$0xff]  ;;  %v294_v11 = vld [vmem:[%s2378_s29 + $0xb0] sm:$0xff] }
  0x15   : > { %283 = vst [vmem:[%s208_s30 + $0x28] sm:$0xff] %v282_v5  ;;  %v296_v12 = vld [vmem:[%s2378_s29 + $0xc0] sm:$0xff]  ;;  %v298_v13 = vld [vmem:[%s2378_s29 + $0xd0] sm:$0xff] }
  0x16   : > { %285 = vst [vmem:[%s208_s30 + $0x30] sm:$0xff] %v284_v6  ;;  %v300_v14 = vld [vmem:[%s2378_s29 + $0xe0] sm:$0xff]  ;;  %v302_v15 = vld [vmem:[%s2378_s29 + $0xf0] sm:$0xff] }
  0x17   : > { %287 = vst [vmem:[%s208_s30 + $0x38] sm:$0xff] %v286_v7 }
  0x18   : > { %289 = vst [vmem:[%s208_s30 + $0x40] sm:$0xff] %v288_v8 }
  0x19   : > { %291 = vst [vmem:[%s208_s30 + $0x48] sm:$0xff] %v290_v9 }
  0x1a   : > { %293 = vst [vmem:[%s208_s30 + $0x50] sm:$0xff] %v292_v10 }
  0x1b   : > { %295 = vst [vmem:[%s208_s30 + $0x58] sm:$0xff] %v294_v11 }
  0x1c   : > { %297 = vst [vmem:[%s208_s30 + $0x60] sm:$0xff] %v296_v12 }
  0x1d   : > { %299 = vst [vmem:[%s208_s30 + $0x68] sm:$0xff] %v298_v13 }
  0x1e   : > { %301 = vst [vmem:[%s208_s30 + $0x70] sm:$0xff] %v300_v14 }
  0x1f   : > { %303 = vst [vmem:[%s208_s30 + $0x78] sm:$0xff] %v302_v15 }
  0x20 PF: > { %p1675_p6 = scmp.ge.s32.totalorder %s2305_s19, 1  ;;  %p308_p7 = scmp.lt.s32.totalorder %s2305_s19, 3 }
  0x22   : > { %p309_p8 = pnand %p1675_p6, %p308_p7 }
  0x24   : > { %312 = sbr.rel (%p309_p8) target bundleno = 786 (0x312), region = 70 }
  0x29   : > { %v2401_v16 = vld [vmem:[%s3594_s3 + $0x20] sm:$0xff]  ;;  %v2406_v17 = vld [vmem:[%s3594_s3 + $0x10] sm:$0xff]  ;;  %v2307_v19 = vmov 0   ;;  %v2419_v20 = vld [vmem:[%s3594_s3 + $0x28] sm:$0xff]  ;;  %s315_s9 = sand.u32 1, %s2289_s15  }
  0x2a   : > { %3628 = vst [vmem:[#allocation3_spill] sm:$0xff] %v2401_v16  ;;  %v2411_v18 = vld [vmem:[%s3594_s3] sm:$0xff]  ;;  %2205 = vset.pattern.permute.xlu2 %v2307_v19  ;;  %2204 = vset.pattern.permute.xlu1 %v2307_v19  ;;  %v2424_v21 = vld [vmem:[%s3594_s3 + $0x18] sm:$0xff]  ;;  %v2429_v22 = vld [vmem:[%s3594_s3 + $0x8] sm:$0xff]  ;;  %s1676_s14 = sshll.u32 %s315_s9, 7 }
  0x2b   : > { %3629 = vst [vmem:[#allocation4_spill] sm:$0xff] %v2406_v17  ;;  %2203 = vset.pattern.permute.xlu0 %v2307_v19  ;;  %472 = vperm.xlu2 %2205, %v2401_v16   ;;  %v2437_v23 = vld [vmem:[%s3594_s3 + $0x40] sm:$0xff]  ;;  %v2442_v24 = vld [vmem:[%s3594_s3 + $0x38] sm:$0xff]  ;;  %v2447_v25 = vld [vmem:[%s3594_s3 + $0x30] sm:$0xff]  ;;  %s2670_s27 = scalar_lea.vmem [#allocation2], %s1676_s14 }
  0x2c   : > { %3630 = vst [vmem:[#allocation5_spill] sm:$0xff] %v2411_v18  ;;  %462 = vperm.xlu1 %2204, %v2406_v17   ;;  %452 = vperm.xlu0 %2203, %v2411_v18   ;;  %v2455_v26 = vld [vmem:[%s3594_s3 + $0x58] sm:$0xff]  ;;  %v2460_v27 = vld [vmem:[%s3594_s3 + $0x50] sm:$0xff]  ;;  %v2465_v28 = vld [vmem:[%s3594_s3 + $0x48] sm:$0xff] }
  0x2d   : > { %3631 = vst [vmem:[#allocation6_spill] sm:$0xff] %v2419_v20  ;;  %v2473_v29 = vld [vmem:[%s3594_s3 + $0x70] sm:$0xff]  ;;  %v2478_v30 = vld [vmem:[%s3594_s3 + $0x68] sm:$0xff]  ;;  %v2483_v31 = vld [vmem:[%s3594_s3 + $0x60] sm:$0xff] }
  0x2e   : > { %3632 = vst [vmem:[#allocation7_spill] sm:$0xff] %v2424_v21  ;;  %v2491_v32 = vld [vmem:[%s3593_s2 + $0x8] sm:$0xff]  ;;  %v2496_v33 = vld [vmem:[%s3594_s3 + $0x78] sm:$0xff]  ;;  %v2501_v34 = vld [vmem:[%s3593_s2] sm:$0xff] }
  0x2f   : > { %3633 = vst [vmem:[#allocation8_spill] sm:$0xff] %v2429_v22  ;;  %v2509_v35 = vld [vmem:[%s3593_s2 + $0x20] sm:$0xff]  ;;  %v2514_v36 = vld [vmem:[%s3593_s2 + $0x10] sm:$0xff]  ;;  %v2519_v37 = vld [vmem:[%s3593_s2 + $0x18] sm:$0xff] }
  0x30   : > { %3634 = vst [vmem:[#allocation9_spill] sm:$0xff] %v2442_v24  ;;  %v2527_v38 = vld [vmem:[%s3593_s2 + $0x38] sm:$0xff]  ;;  %v2532_v39 = vld [vmem:[%s3593_s2 + $0x28] sm:$0xff]  ;;  %v2537_v40 = vld [vmem:[%s3593_s2 + $0x30] sm:$0xff] }
  0x31   : > { %3635 = vst [vmem:[#allocation10_spill] sm:$0xff] %v2447_v25  ;;  %v2545_v41 = vld [vmem:[%s3593_s2 + $0x50] sm:$0xff]  ;;  %v2550_v42 = vld [vmem:[%s3593_s2 + $0x40] sm:$0xff]  ;;  %v2555_v43 = vld [vmem:[%s3593_s2 + $0x48] sm:$0xff] }
  0x32   : > { %3636 = vst [vmem:[#allocation11_spill] sm:$0xff] %v2460_v27  ;;  %v2563_v44 = vld [vmem:[%s3593_s2 + $0x68] sm:$0xff]  ;;  %v2568_v45 = vld [vmem:[%s3593_s2 + $0x58] sm:$0xff]  ;;  %v2573_v46 = vld [vmem:[%s3593_s2 + $0x60] sm:$0xff] }
  0x33   : > { %477 = vperm.xlu2 %2205, %v2419_v20   ;;  %v2581_v47 = vld [vmem:[%s3592_s1] sm:$0xff]  ;;  %v2586_v48 = vld [vmem:[%s3593_s2 + $0x70] sm:$0xff]  ;;  %v2591_v49 = vld [vmem:[%s3593_s2 + $0x78] sm:$0xff] }
  0x34   : > { %467 = vperm.xlu1 %2204, %v2424_v21   ;;  %457 = vperm.xlu0 %2203, %v2429_v22   ;;  %v2599_v50 = vld [vmem:[%s3592_s1 + $0x18] sm:$0xff]  ;;  %v2604_v51 = vld [vmem:[%s3592_s1 + $0x10] sm:$0xff]  ;;  %v2609_v52 = vld [vmem:[%s3592_s1 + $0x8] sm:$0xff] }
  0x35   : > { %v2617_v54 = vld [vmem:[%s3592_s1 + $0x30] sm:$0xff]  ;;  %v2622_v55 = vld [vmem:[%s3592_s1 + $0x28] sm:$0xff]  ;;  %v2627_v56 = vld [vmem:[%s3592_s1 + $0x20] sm:$0xff] }
  0x36   : > { %3637 = vst [vmem:[#allocation12_spill] sm:$0xff] %v2617_v54  ;;  %v2637_v58 = vld [vmem:[%s3592_s1 + $0x48] sm:$0xff]  ;;  %v2643_v59 = vld [vmem:[%s3592_s1 + $0x40] sm:$0xff]  ;;  %v2648_v60 = vld [vmem:[%s3592_s1 + $0x38] sm:$0xff] }
  0x37   : > { %3638 = vst [vmem:[#allocation13_spill] sm:$0xff] %v2622_v55  ;;  %v2658_v62 = vld [vmem:[%s3592_s1 + $0x60] sm:$0xff]  ;;  %v2663_v63 = vld [vmem:[%s3592_s1 + $0x58] sm:$0xff]  ;;  %v2668_v0 = vld [vmem:[%s3592_s1 + $0x50] sm:$0xff] }
  0x38   : > { %3639 = vst [vmem:[#allocation14_spill] sm:$0xff] %v2627_v56  ;;  %v2673_v1 = vld [vmem:[%s2670_s27 + $0x20] sm:$0xff]  ;;  %v2684_v6 = vld [vmem:[%s3592_s1 + $0x78] sm:$0xff]  ;;  %v2689_v8 = vld [vmem:[%s3592_s1 + $0x70] sm:$0xff] }
  0x39   : > { %3640 = vst [vmem:[#allocation15_spill] sm:$0xff] %v2637_v58  ;;  %v2694_v9 = vld [vmem:[%s3592_s1 + $0x68] sm:$0xff] }
  0x3a   : > { %3641 = vst [vmem:[#allocation16_spill] sm:$0xff] %v2643_v59  ;;  %v2700_v10 = vld [vmem:[%s2670_s27 + $0x8] sm:$0xff] }
  0x3b   : > { %492 = vperm.xlu2 %2205, %v2437_v23   ;;  %3642 = vst [vmem:[#allocation17_spill] sm:$0xff] %v2648_v60 }
  0x3c   : > { %487 = vperm.xlu1 %2204, %v2442_v24   ;;  %482 = vperm.xlu0 %2203, %v2447_v25   ;;  %3643 = vst [vmem:[#allocation18_spill] sm:$0xff] %v2658_v62 }
  0x3d   : > { %3644 = vst [vmem:[#allocation19_spill] sm:$0xff] %v2663_v63 }
  0x3e   : > { %3645 = vst [vmem:[#allocation20_spill] sm:$0xff] %v2668_v0 }
  0x3f   : > { %3646 = vst [vmem:[#allocation21_spill] sm:$0xff] %v2673_v1 }
  0x40   : > { %3647 = vst [vmem:[#allocation22_spill] sm:$0xff] %v2684_v6 }
  0x41   : > { %3648 = vst [vmem:[#allocation23_spill] sm:$0xff] %v2689_v8 }
  0x42   : > { %3649 = vst [vmem:[#allocation24_spill] sm:$0xff] %v2694_v9 }
  0x43   : > { %507 = vperm.xlu2 %2205, %v2455_v26   ;;  %3650 = vst [vmem:[#allocation25_spill] sm:$0xff] %v2700_v10 }
  0x44   : > { %502 = vperm.xlu1 %2204, %v2460_v27   ;;  %497 = vperm.xlu0 %2203, %v2465_v28  }
  0x4b   : > { %522 = vperm.xlu2 %2205, %v2473_v29  }
  0x4c   : > { %517 = vperm.xlu1 %2204, %v2478_v30   ;;  %512 = vperm.xlu0 %2203, %v2483_v31  }
  0x53   : > { %601 = vperm.xlu2 %2205, %v2491_v32  }
  0x54   : > { %527 = vperm.xlu0 %2203, %v2496_v33   ;;  %596 = vperm.xlu1 %2204, %v2501_v34  }
  0x5b   : > { %616 = vperm.xlu2 %2205, %v2509_v35  }
  0x5c   : > { %606 = vperm.xlu0 %2203, %v2514_v36   ;;  %611 = vperm.xlu1 %2204, %v2519_v37  }
  0x63   : > { %631 = vperm.xlu2 %2205, %v2527_v38  }
  0x64   : > { %621 = vperm.xlu0 %2203, %v2532_v39   ;;  %626 = vperm.xlu1 %2204, %v2537_v40  }
  0x6b   : > { %646 = vperm.xlu2 %2205, %v2545_v41  }
  0x6c   : > { %636 = vperm.xlu0 %2203, %v2550_v42   ;;  %641 = vperm.xlu1 %2204, %v2555_v43  }
  0x73   : > { %661 = vperm.xlu2 %2205, %v2563_v44  }
  0x74   : > { %651 = vperm.xlu0 %2203, %v2568_v45   ;;  %656 = vperm.xlu1 %2204, %v2573_v46  }
  0x7b   : > { %692 = vperm.xlu2 %2205, %v2581_v47  }
  0x7c   : > { %666 = vperm.xlu0 %2203, %v2586_v48   ;;  %671 = vperm.xlu1 %2204, %v2591_v49  }
  0x83   : > { %707 = vperm.xlu2 %2205, %v2599_v50  }
  0x84   : > { %702 = vperm.xlu1 %2204, %v2604_v51   ;;  %697 = vperm.xlu0 %2203, %v2609_v52  }
  0x85   : > { %v473_v53 = vpop.permute.xlu2 %472 }
  0x86   : > { %v534_v2 = vmul.f32 %v473_v53, %v2673_v1  ;;  %v2308_v1 = vmov 1  }
  0x88   : > { %v1683_v7 = vclamps-f32 %v534_v2, 1.0  ;;  %v2706_v2 = vld [vmem:[%s2670_s27] sm:$0xff] }
  0x89   : > { %3651 = vst [vmem:[#allocation26_spill] sm:$0xff] %v2706_v2 }
  0x8a   : > { %v1810_v12 = vcvt.f32.s32 %v1683_v7 }
  0x8b   : > { %722 = vperm.xlu2 %2205, %v2617_v54   ;;  %v2722_v54 = vld [vmem:[%s2670_s27 + $0x18] sm:$0xff] }
  0x8c   : > { %717 = vperm.xlu1 %2204, %v2622_v55   ;;  %712 = vperm.xlu0 %2203, %v2627_v56   ;;  %v1811_v53 = vcvt.s32.f32 %v1810_v12  ;;  %3654 = vst [vmem:[#allocation29_spill] sm:$0xff] %v2722_v54 }
  0x8d   : > { %v2632_v57 = vpop.permute.xlu2 %477 }
  0x8e   : > { %v1812_v12 = vand.u32 2147483647, %v1811_v53 }
  0x93   : > { %737 = vperm.xlu2 %2205, %v2637_v58  }
  0x94   : > { %732 = vperm.xlu1 %2204, %v2643_v59   ;;  %727 = vperm.xlu0 %2203, %v2648_v60   ;;  %v1808_v59 = vand.u32 2147483647, %v1683_v7 }
  0x95   : > { %v2653_v61 = vpop.permute.xlu2 %492 }
  0x96   : > { %vm2724_vm1 = vcmp.lt.f32.partialorder %v1808_v59, 8388608.0 }
  0x9b   : > { %752 = vperm.xlu2 %2205, %v2658_v62  }
  0x9c   : > { %747 = vperm.xlu1 %2204, %v2663_v63   ;;  %742 = vperm.xlu0 %2203, %v2668_v0  }
  0x9d   : > { %v2679_v3 = vpop.permute.xlu2 %507 }
  0x9e   : > { %v463_v4 = vpop.permute.xlu1 %462  ;;  %v453_v5 = vpop.permute.xlu0 %452 }
  0xa3   : > { %767 = vperm.xlu2 %2205, %v2684_v6  }
  0xa4   : > { %762 = vperm.xlu1 %2204, %v2689_v8   ;;  %757 = vperm.xlu0 %2203, %v2694_v9   ;;  %v2709_v8 = vld [vmem:[%s2670_s27 + $0x38] sm:$0xff] }
  0xa5   : > { %v2702_v11 = vpop.permute.xlu2 %522  ;;  %3652 = vst [vmem:[#allocation27_spill] sm:$0xff] %v2709_v8 }
  0xa6   : > { %v468_v13 = vpop.permute.xlu1 %467  ;;  %v458_v14 = vpop.permute.xlu0 %457 }
  0xa7   : > { %v531_v15 = vmul.f32 %v458_v14, %v2700_v10  ;;  %v530_v10 = vmul.f32 %v453_v5, %v2706_v2 }
  0xa9   : > { %v1680_v19 = vclamps-f32 %v531_v15, 1.0  ;;  %v1813_v15 = vand.u32 2147483648, %v1683_v7  ;;  %v2719_v53 = vclamps-f32 %v530_v10, 1.0 }
  0xab   : > { %2208 = vset.pattern.permute.xlu2 %v2308_v1  ;;  %v1786_v6 = vcvt.f32.s32 %v1680_v19  ;;  %v1784_v9 = vand.u32 2147483647, %v1680_v19  ;;  %v1789_v14 = vand.u32 2147483648, %v1680_v19  ;;  %v1814_v55 = vor.u32 %v1813_v15, %v1812_v12 }
  0xac   : > { %2207 = vset.pattern.permute.xlu1 %v2308_v1  ;;  %2206 = vset.pattern.permute.xlu0 %v2308_v1 }
  0xad   : > { %807 = vperm.xlu1 %2207, %v2429_v22   ;;  %803 = vperm.xlu0 %2206, %v2411_v18   ;;  %v602_v63 = vpop.permute.xlu2 %601  ;;  %v1787_v62 = vcvt.s32.f32 %v1786_v6  ;;  %vm1785_vm0 = vcmp.lt.f32.partialorder %v1784_v9, 8388608.0  ;;  %v2717_v18 = vld [vmem:[%s2670_s27 + $0x10] sm:$0xff]  ;;  %v1815_v59 = vsel %vm2724_vm1, %v1814_v55, %v1683_v7 }
  0xae   : > { %811 = vperm.xlu2 %2208, %v2406_v17   ;;  %v488_v1 = vpop.permute.xlu1 %487  ;;  %v483_v0 = vpop.permute.xlu0 %482  ;;  %3653 = vst [vmem:[#allocation28_spill] sm:$0xff] %v2717_v18  ;;  %v2729_v17 = vld [vmem:[%s2670_s27 + $0x28] sm:$0xff] }
  0xaf   : > { %v537_v58 = vmul.f32 %v488_v1, %v2709_v8  ;;  %v1788_v22 = vand.u32 2147483647, %v1787_v62  ;;  %3657 = vst [vmem:[#allocation30_spill] sm:$0xff] %v2729_v17  ;;  %v532_v62 = vmul.f32 %v463_v4, %v2717_v18  ;;  %v2735_v1 = vld [vmem:[%s2670_s27 + $0x50] sm:$0xff] }
  0xb0   : > { %3658 = vst [vmem:[#allocation31_spill] sm:$0xff] %v2735_v1 }
  0xb1   : > { %v1686_v6 = vclamps-f32 %v537_v58, 1.0  ;;  %v1790_v60 = vor.u32 %v1789_v14, %v1788_v22  ;;  %v533_v22 = vmul.f32 %v468_v13, %v2722_v54  ;;  %v1778_v13 = vcvt.f32.s32 %v2719_v53  ;;  %v2783_v54 = vld [vmem:[%s2670_s27 + $0x48] sm:$0xff] }
  0xb2   : > { %v2749_v55 = vclamps-f32 %v532_v62, 1.0 }
  0xb3   : > { %v1791_v2 = vsel %vm1785_vm0, %v1790_v60, %v1680_v19  ;;  %v1834_v56 = vcvt.f32.s32 %v1686_v6  ;;  %v535_v60 = vmul.f32 %v2632_v57, %v2729_v17  ;;  %v1837_v12 = vand.u32 2147483648, %v1686_v6 }
  0xb4   : > { %v2732_v9 = vmul.f32 %v1791_v2, %v602_v63  ;;  %v2751_v7 = vclamps-f32 %v533_v22, 1.0 }
  0xb5   : > { %815 = vperm.xlu1 %2207, %v2424_v21   ;;  %823 = vperm.xlu0 %2206, %v2419_v20   ;;  %v617_v58 = vpop.permute.xlu2 %616  ;;  %v1835_v10 = vcvt.s32.f32 %v1834_v56  ;;  %v1832_v56 = vand.u32 2147483647, %v1686_v6  ;;  %v2753_v5 = vclamps-f32 %v535_v60, 1.0  ;;  %v2756_v20 = vld [vmem:[%s2670_s27 + $0x30] sm:$0xff] }
  0xb6   : > { %819 = vperm.xlu2 %2208, %v2401_v16   ;;  %v503_v63 = vpop.permute.xlu1 %502  ;;  %v498_v4 = vpop.permute.xlu0 %497  ;;  %v2745_v19 = vmul.f32 %v1815_v59, %v617_v58  ;;  %3659 = vst [vmem:[#allocation32_spill] sm:$0xff] %v2756_v20  ;;  %v1779_v58 = vcvt.s32.f32 %v1778_v13  ;;  %v2759_v16 = vld [vmem:[%s2670_s27 + $0x68] sm:$0xff]  ;;  %v536_v62 = vmul.f32 %v483_v0, %v2756_v20  ;;  %v1781_v0 = vand.u32 2147483648, %v2719_v53 }
  0xb7   : > { %v540_v2 = vmul.f32 %v503_v63, %v2735_v1  ;;  %v1836_v14 = vand.u32 2147483647, %v1835_v10  ;;  %3660 = vst [vmem:[#allocation33_spill] sm:$0xff] %v2759_v16  ;;  %vm1833_vm2 = vcmp.lt.f32.partialorder %v1832_v56, 8388608.0  ;;  %v1794_v63 = vcvt.f32.s32 %v2749_v55  ;;  %v2763_v10 = vld [vmem:[%s2670_s27 + $0x40] sm:$0xff] }
  0xb8   : > { %3661 = vst [vmem:[#allocation34_spill] sm:$0xff] %v2763_v10  ;;  %v1780_v1 = vand.u32 2147483647, %v1779_v58  ;;  %v2780_v20 = vclamps-f32 %v536_v62, 1.0  ;;  %v1816_v18 = vand.u32 2147483647, %v2753_v5 }
  0xb9   : > { %v1689_v57 = vclamps-f32 %v540_v2, 1.0  ;;  %v1838_v15 = vor.u32 %v1837_v12, %v1836_v14  ;;  %v1802_v14 = vcvt.f32.s32 %v2751_v7  ;;  %v1795_v17 = vcvt.s32.f32 %v1794_v63 }
  0xba   : > { %v1782_v8 = vor.u32 %v1781_v0, %v1780_v1  ;;  %v1826_v0 = vcvt.f32.s32 %v2780_v20  ;;  %vm2848_vm8 = vcmp.lt.f32.partialorder %v1816_v18, 8388608.0 }
  0xbb   : > { %v1858_v59 = vcvt.f32.s32 %v1689_v57  ;;  %v1839_v60 = vsel %vm1833_vm2, %v1838_v15, %v1686_v6  ;;  %v1861_v6 = vand.u32 2147483648, %v1689_v57  ;;  %v1776_v15 = vand.u32 2147483647, %v2719_v53 }
  0xbc   : > { %v1803_v58 = vcvt.s32.f32 %v1802_v14  ;;  %v1796_v63 = vand.u32 2147483647, %v1795_v17 }
  0xbd   : > { %827 = vperm.xlu1 %2207, %v2447_v25   ;;  %835 = vperm.xlu0 %2206, %v2437_v23   ;;  %v632_v22 = vpop.permute.xlu2 %631  ;;  %v1859_v2 = vcvt.s32.f32 %v1858_v59  ;;  %v1818_v25 = vcvt.f32.s32 %v2753_v5  ;;  %v538_v59 = vmul.f32 %v2653_v61, %v2763_v10  ;;  %vm2785_vm3 = vcmp.lt.f32.partialorder %v1776_v15, 8388608.0 }
  0xbe   : > { %831 = vperm.xlu2 %2208, %v2442_v24   ;;  %v518_v13 = vpop.permute.xlu1 %517  ;;  %v2770_v12 = vpop.permute.xlu0 %512  ;;  %v2772_v56 = vmul.f32 %v1839_v60, %v632_v22  ;;  %v1856_v24 = vand.u32 2147483647, %v1689_v57  ;;  %v1792_v61 = vand.u32 2147483647, %v2749_v55  ;;  %v1804_v14 = vand.u32 2147483647, %v1803_v58 }
  0xbf   : > { %v543_v23 = vmul.f32 %v518_v13, %v2759_v16  ;;  %v1860_v21 = vand.u32 2147483647, %v1859_v2  ;;  %v1819_v13 = vcvt.s32.f32 %v1818_v25  ;;  %v2789_v16 = vclamps-f32 %v538_v59, 1.0 }
  0xc0   : > { %vm1857_vm4 = vcmp.lt.f32.partialorder %v1856_v24, 8388608.0  ;;  %v1805_v59 = vand.u32 2147483648, %v2751_v7  ;;  %v1800_v58 = vand.u32 2147483647, %v2751_v7  ;;  %vm2816_vm5 = vcmp.lt.f32.partialorder %v1792_v61, 8388608.0 }
  0xc1   : > { %v1692_v22 = vclamps-f32 %v543_v23, 1.0  ;;  %v1862_v60 = vor.u32 %v1861_v6, %v1860_v21  ;;  %v539_v23 = vmul.f32 %v498_v4, %v2783_v54 }
  0xc2   : > { %vm2827_vm7 = vcmp.lt.f32.partialorder %v1800_v58, 8388608.0  ;;  %v2853_v58 = vld [vmem:[%s2670_s27 + $0x70] sm:$0xff] }
  0xc3   : > { %v1882_v2 = vcvt.f32.s32 %v1692_v22  ;;  %v1863_v1 = vsel %vm1857_vm4, %v1862_v60, %v1689_v57  ;;  %v1885_v15 = vand.u32 2147483648, %v1692_v22  ;;  %v1880_v60 = vand.u32 2147483647, %v1692_v22 }
  0xc4   : > { %v2810_v10 = vclamps-f32 %v539_v23, 1.0 }
  0xc5   : > { %839 = vperm.xlu1 %2207, %v2465_v28   ;;  %847 = vperm.xlu0 %2206, %v2455_v26   ;;  %v647_v21 = vpop.permute.xlu2 %646  ;;  %v1883_v62 = vcvt.s32.f32 %v1882_v2  ;;  %v1783_v26 = vsel %vm2785_vm3, %v1782_v8, %v2719_v53  ;;  %v1797_v28 = vand.u32 2147483648, %v2749_v55  ;;  %v2808_v2 = vld [vmem:[%s2670_s27 + $0x58] sm:$0xff]  ;;  %v2814_v8 = vld [vmem:[%s2670_s27 + $0x60] sm:$0xff]  ;;  %vm1881_vm6 = vcmp.lt.f32.partialorder %v1880_v60, 8388608.0 }
  0xc6   : > { %843 = vperm.xlu2 %2208, %v2460_v27   ;;  %v2797_v25 = vpop.permute.xlu0 %527  ;;  %v2799_v24 = vmul.f32 %v1863_v1, %v647_v21  ;;  %v597_v17 = vpop.permute.xlu1 %596  ;;  %v1806_v1 = vor.u32 %v1805_v59, %v1804_v14  ;;  %v1827_v27 = vcvt.s32.f32 %v1826_v0 }
  0xc7   : > { %v674_v57 = vmul.f32 %v1783_v26, %v597_v17  ;;  %v1884_v6 = vand.u32 2147483647, %v1883_v62  ;;  %v1798_v4 = vor.u32 %v1797_v28, %v1796_v63  ;;  %v1820_v62 = vand.u32 2147483647, %v1819_v13 }
  0xc8   : > { %v1821_v63 = vand.u32 2147483648, %v2753_v5  ;;  %v1842_v17 = vcvt.f32.s32 %v2789_v16  ;;  %v541_v26 = vmul.f32 %v2679_v3, %v2808_v2  ;;  %v1807_v23 = vsel %vm2827_vm7, %v1806_v1, %v2751_v7 }
  0xc9   : > { %v1886_v21 = vor.u32 %v1885_v15, %v1884_v6  ;;  %v1799_v14 = vsel %vm2816_vm5, %v1798_v4, %v2749_v55  ;;  %v1828_v3 = vand.u32 2147483647, %v1827_v27  ;;  %v1829_v28 = vand.u32 2147483648, %v2780_v20 }
  0xca   : > { %v542_v55 = vmul.f32 %v2770_v12, %v2814_v8  ;;  %v1850_v15 = vcvt.f32.s32 %v2810_v10  ;;  %v1822_v7 = vor.u32 %v1821_v63, %v1820_v62  ;;  %v1843_v4 = vcvt.s32.f32 %v1842_v17 }
  0xcb   : > { %v1887_v61 = vsel %vm1881_vm6, %v1886_v21, %v1692_v22  ;;  %v1824_v22 = vand.u32 2147483647, %v2780_v20  ;;  %v2846_v60 = vclamps-f32 %v541_v26, 1.0  ;;  %v1845_v63 = vand.u32 2147483648, %v2789_v16 }
  0xcc   : > { %v2855_v21 = vclamps-f32 %v542_v55, 1.0  ;;  %v1851_v53 = vcvt.s32.f32 %v1850_v15  ;;  %v1823_v62 = vsel %vm2848_vm8, %v1822_v7, %v2753_v5  ;;  %v1844_v18 = vand.u32 2147483647, %v1843_v4 }
  0xcd   : > { %851 = vperm.xlu1 %2207, %v2483_v31   ;;  %859 = vperm.xlu0 %2206, %v2473_v29   ;;  %v662_v13 = vpop.permute.xlu2 %661  ;;  %vm2857_vm9 = vcmp.lt.f32.partialorder %v1824_v22, 8388608.0  ;;  %v544_v17 = vmul.f32 %v2702_v11, %v2853_v58  ;;  %v1864_v12 = vand.u32 2147483647, %v2846_v60 }
  0xce   : > { %855 = vperm.xlu2 %2208, %v2478_v30   ;;  %v607_v6 = vpop.permute.xlu0 %606  ;;  %v2840_v31 = vmul.f32 %v1887_v61, %v662_v13  ;;  %v612_v29 = vpop.permute.xlu1 %611  ;;  %v1830_v30 = vor.u32 %v1829_v28, %v1828_v3  ;;  %v1840_v13 = vand.u32 2147483647, %v2789_v16  ;;  %v1866_v61 = vcvt.f32.s32 %v2846_v60 }
  0xcf   : > { %v2844_v59 = vmul.f32 %v1799_v14, %v607_v6  ;;  %v677_v27 = vmul.f32 %v1807_v23, %v612_v29  ;;  %v2862_v14 = vld [vmem:[%s2670_s27 + $0x78] sm:$0xff]  ;;  %v1846_v55 = vor.u32 %v1845_v63, %v1844_v18  ;;  %v1853_v6 = vand.u32 2147483648, %v2810_v10 }
  0xd0   : > { %v1831_v26 = vsel %vm2857_vm9, %v1830_v30, %v2780_v20  ;;  %v545_v5 = vmul.f32 %v2797_v25, %v2862_v14  ;;  %v2886_v29 = vclamps-f32 %v544_v17, 1.0  ;;  %vm2888_vm10 = vcmp.lt.f32.partialorder %v1840_v13, 8388608.0 }
  0xd1   : > { %v1867_v25 = vcvt.s32.f32 %v1866_v61  ;;  %v1847_v4 = vsel %vm2888_vm10, %v1846_v55, %v2789_v16  ;;  %v1877_v13 = vand.u32 2147483648, %v2855_v21  ;;  %vm2909_vm12 = vcmp.lt.f32.partialorder %v1864_v12, 8388608.0 }
  0xd3   : > { %v1868_v1 = vand.u32 2147483647, %v1867_v25 }
  0xd5   : > { %863 = vperm.xlu1 %2207, %v2496_v33   ;;  %967 = vperm.xlu0 %2206, %v2491_v32   ;;  %v693_v0 = vpop.permute.xlu2 %692  ;;  %v1852_v33 = vand.u32 2147483647, %v1851_v53  ;;  %v1874_v32 = vcvt.f32.s32 %v2855_v21  ;;  %v1869_v53 = vand.u32 2147483648, %v2846_v60 }
  0xd6   : > { %963 = vperm.xlu2 %2208, %v2501_v34   ;;  %v622_v23 = vpop.permute.xlu0 %621  ;;  %v627_v11 = vpop.permute.xlu1 %626  ;;  %v2880_v3 = vmul.f32 %v693_v0, %v674_v57  ;;  %v1848_v34 = vand.u32 2147483647, %v2810_v10  ;;  %v1694_v57 = vclamps-f32 %v545_v5, 1.0  ;;  %v1872_v5 = vand.u32 2147483647, %v2855_v21 }
  0xd7   : > { %v2883_v28 = vmul.f32 %v1823_v62, %v622_v23  ;;  %v680_v20 = vmul.f32 %v1831_v26, %v627_v11  ;;  %v1854_v15 = vor.u32 %v1853_v6, %v1852_v33  ;;  %v1875_v7 = vcvt.s32.f32 %v1874_v32 }
  0xd8   : > { %vm1849_vm11 = vcmp.lt.f32.partialorder %v1848_v34, 8388608.0  ;;  %v1890_v62 = vcvt.f32.s32 %v2886_v29  ;;  %v1898_v0 = vcvt.f32.s32 %v1694_v57  ;;  %v1870_v61 = vor.u32 %v1869_v53, %v1868_v1 }
  0xd9   : > { %v1855_v17 = vsel %vm1849_vm11, %v1854_v15, %v2810_v10  ;;  %v1876_v26 = vand.u32 2147483647, %v1875_v7  ;;  %vm1873_vm13 = vcmp.lt.f32.partialorder %v1872_v5, 8388608.0  ;;  %v1901_v7 = vand.u32 2147483648, %v1694_v57  ;;  %v3680_v5 = vld [vmem:[#allocation15_spill] sm:$0xff] }
  0xda   : > { %v1891_v11 = vcvt.s32.f32 %v1890_v62  ;;  %v1899_v33 = vcvt.s32.f32 %v1898_v0  ;;  %v1871_v10 = vsel %vm2909_vm12, %v1870_v61, %v2846_v60  ;;  %v1888_v60 = vand.u32 2147483647, %v2886_v29 }
  0xdc   : > { %v1892_v34 = vand.u32 2147483647, %v1891_v11  ;;  %v1900_v25 = vand.u32 2147483647, %v1899_v33  ;;  %vm1889_vm14 = vcmp.lt.f32.partialorder %v1888_v60, 8388608.0 }
  0xdd   : > { %971 = vperm.xlu1 %2207, %v2514_v36   ;;  %979 = vperm.xlu0 %2206, %v2509_v35   ;;  %v708_v30 = vpop.permute.xlu2 %707 }
  0xde   : > { %975 = vperm.xlu2 %2208, %v2519_v37   ;;  %v637_v18 = vpop.permute.xlu0 %636  ;;  %v642_v63 = vpop.permute.xlu1 %641  ;;  %v2903_v16 = vmul.f32 %v708_v30, %v677_v27  ;;  %v1878_v37 = vor.u32 %v1877_v13, %v1876_v26  ;;  %v1902_v30 = vor.u32 %v1901_v7, %v1900_v25  ;;  %v3686_v7 = vld [vmem:[#allocation28_spill] sm:$0xff] }
  0xdf   : > { %v2905_v36 = vmul.f32 %v1847_v4, %v637_v18  ;;  %v683_v35 = vmul.f32 %v1855_v17, %v642_v63  ;;  %v1896_v4 = vand.u32 2147483647, %v1694_v57 }
  0xe0   : > { %v1879_v6 = vsel %vm1873_vm13, %v1878_v37, %v2855_v21 }
  0xe1   : > { %vm1897_vm15 = vcmp.lt.f32.partialorder %v1896_v4, 8388608.0 }
  0xe2   : > { %v1903_v53 = vsel %vm1897_vm15, %v1902_v30, %v1694_v57  ;;  %v3688_v30 = vld [vmem:[#allocation24_spill] sm:$0xff] }
  0xe5   : > { %983 = vperm.xlu1 %2207, %v2532_v39   ;;  %991 = vperm.xlu0 %2206, %v2527_v38   ;;  %v723_v27 = vpop.permute.xlu2 %722  ;;  %v1893_v38 = vand.u32 2147483648, %v2886_v29 }
  0xe6   : > { %987 = vperm.xlu2 %2208, %v2537_v40   ;;  %v652_v32 = vpop.permute.xlu0 %651  ;;  %v657_v55 = vpop.permute.xlu1 %656  ;;  %v2920_v22 = vmul.f32 %v723_v27, %v680_v20  ;;  %v3682_v27 = vld [vmem:[#allocation20_spill] sm:$0xff] }
  0xe7   : > { %v685_v15 = vmul.f32 %v1871_v10, %v652_v32  ;;  %v2922_v39 = vmul.f32 %v1879_v6, %v657_v55  ;;  %v1894_v12 = vor.u32 %v1893_v38, %v1892_v34  ;;  %v3683_v32 = vld [vmem:[#allocation18_spill] sm:$0xff] }
  0xe8   : > { %v3685_v34 = vld [vmem:[#allocation26_spill] sm:$0xff] }
  0xe9   : > { %v1895_v20 = vsel %vm1889_vm14, %v1894_v12, %v2886_v29  ;;  %v3687_v12 = vld [vmem:[#allocation21_spill] sm:$0xff] }
  0xed   : > { %995 = vperm.xlu1 %2207, %v2550_v42   ;;  %1003 = vperm.xlu0 %2206, %v2545_v41   ;;  %v738_v40 = vpop.permute.xlu2 %737 }
  0xee   : > { %999 = vperm.xlu2 %2208, %v2555_v43   ;;  %v667_v21 = vpop.permute.xlu0 %666  ;;  %v672_v1 = vpop.permute.xlu1 %671  ;;  %v2930_v62 = vmul.f32 %v738_v40, %v683_v35  ;;  %v3677_v35 = vld [vmem:[#allocation12_spill] sm:$0xff]  ;;  %v3689_v40 = vld [vmem:[#allocation22_spill] sm:$0xff] }
  0xef   : > { %v688_v18 = vmul.f32 %v1895_v20, %v667_v21  ;;  %v689_v63 = vmul.f32 %v1903_v53, %v672_v1  ;;  %v3690_v20 = vld [vmem:[#allocation23_spill] sm:$0xff]  ;;  %v3691_v53 = vld [vmem:[#allocation25_spill] sm:$0xff] }
  0xf5   : > { %1007 = vperm.xlu1 %2207, %v2568_v45   ;;  %1015 = vperm.xlu0 %2206, %v2563_v44   ;;  %v2934_v42 = vpop.permute.xlu2 %752 }
  0xf6   : > { %1011 = vperm.xlu2 %2208, %v2573_v46   ;;  %v703_v41 = vpop.permute.xlu1 %702  ;;  %v698_v17 = vpop.permute.xlu0 %697 }
  0xf7   : > { %v2938_v43 = vmul.f32 %v703_v41, %v2844_v59  ;;  %v2941_v29 = vmul.f32 %v698_v17, %v2732_v9 }
  0xfd   : > { %1019 = vperm.xlu1 %2207, %v2586_v48   ;;  %1043 = vperm.xlu0 %2206, %v2581_v47   ;;  %v768_v57 = vpop.permute.xlu2 %767 }
  0xfe   : > { %1023 = vperm.xlu2 %2208, %v2591_v49   ;;  %v718_v44 = vpop.permute.xlu1 %717  ;;  %v713_v45 = vpop.permute.xlu0 %712  ;;  %v2946_v26 = vmul.f32 %v768_v57, %v689_v63  ;;  %v3692_v57 = vld [vmem:[#allocation29_spill] sm:$0xff] }
  0xff   : > { %v2949_v46 = vmul.f32 %v718_v44, %v2883_v28  ;;  %v2952_v59 = vmul.f32 %v713_v45, %v2745_v19  ;;  %v3676_v28 = vld [vmem:[#allocation14_spill] sm:$0xff]  ;;  %v3678_v19 = vld [vmem:[#allocation13_spill] sm:$0xff] }
 0x105   : > { %1047 = vperm.xlu1 %2207, %v2609_v52   ;;  %1055 = vperm.xlu0 %2206, %v2599_v50  }
 0x106   : > { %1051 = vperm.xlu2 %2208, %v2604_v51   ;;  %v733_v47 = vpop.permute.xlu1 %732  ;;  %v728_v48 = vpop.permute.xlu0 %727 }
 0x107   : > { %v2958_v49 = vmul.f32 %v733_v47, %v2905_v36  ;;  %v2961_v9 = vmul.f32 %v728_v48, %v2772_v56  ;;  %v3679_v36 = vld [vmem:[#allocation17_spill] sm:$0xff]  ;;  %v3681_v56 = vld [vmem:[#allocation16_spill] sm:$0xff] }
 0x108   : > { %v812_v0 = vpop.permute.xlu2 %811 }
 0x109   : > { %v868_v60 = vmul.f32 %v812_v0, %v3686_v7 }
 0x10b   : > { %v1697_v1 = vclamps-f32 %v868_v60, 1.0  ;;  %v3699_v60 = vld [vmem:[#allocation32_spill] sm:$0xff] }
 0x10d   : > { %1059 = vperm.xlu1 %2207, %v3676_v28   ;;  %1067 = vperm.xlu0 %2206, %v3677_v35  }
 0x10e   : > { %1063 = vperm.xlu2 %2208, %v3678_v19   ;;  %v748_v52 = vpop.permute.xlu1 %747  ;;  %v743_v13 = vpop.permute.xlu0 %742  ;;  %v2994_v19 = vmul.f32 7.0, %v1697_v1 }
 0x10f   : > { %v2966_v50 = vmul.f32 %v748_v52, %v685_v15  ;;  %v2969_v51 = vmul.f32 %v743_v13, %v2799_v24  ;;  %v3684_v24 = vld [vmem:[#allocation19_spill] sm:$0xff] }
 0x110   : > { %v820_v61 = vpop.permute.xlu2 %819 }
 0x115   : > { %1071 = vperm.xlu1 %2207, %v3679_v36   ;;  %1079 = vperm.xlu0 %2206, %v3680_v5  }
 0x116   : > { %1075 = vperm.xlu2 %2208, %v3681_v56   ;;  %v763_v23 = vpop.permute.xlu1 %762  ;;  %v758_v37 = vpop.permute.xlu0 %757  ;;  %v3695_v56 = vld [vmem:[#allocation27_spill] sm:$0xff] }
 0x117   : > { %v2974_v11 = vmul.f32 %v763_v23, %v688_v18  ;;  %v2977_v33 = vmul.f32 %v758_v37, %v2840_v31  ;;  %v870_v31 = vmul.f32 %v820_v61, %v3687_v12  ;;  %v2309_v37 = vmov 2  }
 0x118   : > { %v832_v10 = vpop.permute.xlu2 %831 }
 0x119   : > { %v1699_v0 = vclamps-f32 %v870_v31, 1.0  ;;  %v873_v23 = vmul.f32 %v832_v10, %v3695_v56  ;;  %v3702_v56 = vld [vmem:[#allocation9_spill] sm:$0xff] }
 0x11b   : > { %v3000_v5 = vmul.f32 7.0, %v1699_v0  ;;  %v3700_v0 = vld [vmem:[#allocation30_spill] sm:$0xff] }
 0x11d   : > { %1083 = vperm.xlu1 %2207, %v3682_v27   ;;  %1091 = vperm.xlu0 %2206, %v3683_v32   ;;  %v3696_v32 = vld [vmem:[#allocation5_spill] sm:$0xff] }
 0x11e   : > { %1087 = vperm.xlu2 %2208, %v3684_v24  }
 0x11f   : > { %v808_v55 = vpop.permute.xlu1 %807  ;;  %v804_v6 = vpop.permute.xlu0 %803 }
 0x120   : > { %v866_v25 = vmul.f32 %v804_v6, %v3685_v34  ;;  %v2983_v15 = vpop.permute.xlu2 %843  ;;  %v867_v18 = vmul.f32 %v808_v55, %v3691_v53  ;;  %v1922_v55 = vcvt.f32.s32 %v2994_v19  ;;  %v3697_v34 = vld [vmem:[#allocation4_spill] sm:$0xff] }
 0x122   : > { %v1695_v38 = vclamps-f32 %v866_v25, 1.0  ;;  %v1696_v52 = vclamps-f32 %v867_v18, 1.0  ;;  %v3698_v25 = vld [vmem:[#allocation8_spill] sm:$0xff] }
 0x124   : > { %v914_v4 = vmul.f32 7.0, %v1695_v38  ;;  %v3007_v6 = vmul.f32 7.0, %v1696_v52  ;;  %v3701_v52 = vld [vmem:[#allocation7_spill] sm:$0xff] }
 0x125   : > { %1095 = vperm.xlu1 %2207, %v3688_v30   ;;  %1103 = vperm.xlu0 %2206, %v3689_v40   ;;  %v1938_v40 = vcvt.f32.s32 %v3000_v5 }
 0x126   : > { %v1906_v21 = vcvt.f32.s32 %v914_v4  ;;  %1099 = vperm.xlu2 %2208, %v3690_v20   ;;  %v1904_v17 = vand.u32 2147483647, %v914_v4  ;;  %v1909_v48 = vand.u32 2147483648, %v914_v4 }
 0x127   : > { %v816_v63 = vpop.permute.xlu1 %815  ;;  %v824_v41 = vpop.permute.xlu0 %823 }
 0x128   : > { %v869_v44 = vmul.f32 %v816_v63, %v3692_v57  ;;  %v2992_v45 = vpop.permute.xlu2 %855  ;;  %v1907_v47 = vcvt.s32.f32 %v1906_v21  ;;  %vm2996_vm0 = vcmp.lt.f32.partialorder %v1904_v17, 8388608.0  ;;  %v1702_v21 = vclamps-f32 %v873_v23, 1.0  ;;  %v3703_v23 = vld [vmem:[#allocation3_spill] sm:$0xff] }
 0x129   : > { %v1914_v63 = vcvt.f32.s32 %v3007_v6  ;;  %v1923_v17 = vcvt.s32.f32 %v1922_v55 }
 0x12a   : > { %v1698_v28 = vclamps-f32 %v869_v44, 1.0  ;;  %v1908_v35 = vand.u32 2147483647, %v1907_v47  ;;  %v3016_v47 = vmul.f32 7.0, %v1702_v21 }
 0x12b   : > { %v1924_v55 = vand.u32 2147483647, %v1923_v17 }
 0x12c   : > { %v917_v61 = vmul.f32 7.0, %v1698_v28  ;;  %v1910_v36 = vor.u32 %v1909_v48, %v1908_v35  ;;  %v1939_v48 = vcvt.s32.f32 %v1938_v40  ;;  %v871_v28 = vmul.f32 %v824_v41, %v3700_v0 }
 0x12d   : > { %2209 = vset.pattern.permute.xlu1 %v2309_v37  ;;  %2211 = vset.pattern.permute.xlu0 %v2309_v37 }
 0x12e   : > { %v1930_v27 = vcvt.f32.s32 %v917_v61  ;;  %2210 = vset.pattern.permute.xlu2 %v2309_v37  ;;  %1139 = vperm.xlu1 %2209, %v3696_v32   ;;  %v1911_v24 = vsel %vm2996_vm0, %v1910_v36, %v914_v4  ;;  %v1928_v4 = vand.u32 2147483647, %v917_v61  ;;  %v1933_v18 = vand.u32 2147483648, %v917_v61 }
 0x12f   : > { %1147 = vperm.xlu0 %2211, %v3697_v34   ;;  %1143 = vperm.xlu2 %2210, %v3698_v25   ;;  %v828_v38 = vpop.permute.xlu1 %827  ;;  %v836_v10 = vpop.permute.xlu0 %835  ;;  %v946_v7 = vmul.f32 0.14285715, %v1911_v24  ;;  %v1920_v36 = vand.u32 2147483647, %v2994_v19  ;;  %v1915_v24 = vcvt.s32.f32 %v1914_v63  ;;  %v1925_v34 = vand.u32 2147483648, %v2994_v19 }
 0x130   : > { %v872_v12 = vmul.f32 %v828_v38, %v3699_v60  ;;  %v964_v31 = vpop.permute.xlu2 %963  ;;  %v1931_v30 = vcvt.s32.f32 %v1930_v27  ;;  %vm1929_vm1 = vcmp.lt.f32.partialorder %v1928_v4, 8388608.0  ;;  %v1962_v60 = vcvt.f32.s32 %v3016_v47 }
 0x131   : > { %v3013_v20 = vmul.f32 %v964_v31, %v946_v7  ;;  %v1941_v7 = vand.u32 2147483648, %v3000_v5  ;;  %v1700_v40 = vclamps-f32 %v871_v28, 1.0  ;;  %vm3034_vm2 = vcmp.lt.f32.partialorder %v1920_v36, 8388608.0  ;;  %v3709_v36 = vld [vmem:[#allocation6_spill] sm:$0xff] }
 0x132   : > { %v1701_v1 = vclamps-f32 %v872_v12, 1.0  ;;  %v1932_v53 = vand.u32 2147483647, %v1931_v30  ;;  %v1940_v30 = vand.u32 2147483647, %v1939_v48  ;;  %v3038_v0 = vor.u32 %v1925_v34, %v1924_v55  ;;  %v3711_v55 = vld [vmem:[#allocation11_spill] sm:$0xff] }
 0x133   : > { %v1912_v48 = vand.u32 2147483647, %v3007_v6  ;;  %v1917_v28 = vand.u32 2147483648, %v3007_v6  ;;  %v3712_v34 = vld [vmem:[#allocation10_spill] sm:$0xff] }
 0x134   : > { %v920_v57 = vmul.f32 7.0, %v1701_v1  ;;  %v1934_v44 = vor.u32 %v1933_v18, %v1932_v53  ;;  %v3704_v53 = vld [vmem:[#allocation31_spill] sm:$0xff] }
 0x135   : > { %v876_v18 = vmul.f32 %v2983_v15, %v3704_v53  ;;  %v3046_v15 = vmul.f32 7.0, %v1700_v40  ;;  %vm3061_vm5 = vcmp.lt.f32.partialorder %v1912_v48, 8388608.0 }
 0x136   : > { %v1954_v35 = vcvt.f32.s32 %v920_v57  ;;  %1151 = vperm.xlu1 %2209, %v3701_v52   ;;  %v1935_v13 = vsel %vm1929_vm1, %v1934_v44, %v917_v61  ;;  %v1936_v61 = vand.u32 2147483647, %v3000_v5  ;;  %v1952_v31 = vand.u32 2147483647, %v920_v57 }
 0x137   : > { %1167 = vperm.xlu0 %2211, %v3702_v56   ;;  %1155 = vperm.xlu2 %2210, %v3703_v23   ;;  %v840_v37 = vpop.permute.xlu1 %839  ;;  %v3023_v27 = vpop.permute.xlu0 %847  ;;  %v949_v32 = vmul.f32 0.14285715, %v1935_v13  ;;  %v1957_v1 = vand.u32 2147483648, %v920_v57  ;;  %v1963_v52 = vcvt.s32.f32 %v1962_v60  ;;  %v3049_v23 = vor.u32 %v1941_v7, %v1940_v30 }
 0x138   : > { %v875_v41 = vmul.f32 %v840_v37, %v2783_v54  ;;  %v976_v25 = vpop.permute.xlu2 %975  ;;  %v1955_v38 = vcvt.s32.f32 %v1954_v35  ;;  %v1916_v54 = vand.u32 2147483647, %v1915_v24  ;;  %vm3040_vm3 = vcmp.lt.f32.partialorder %v1936_v61, 8388608.0 }
 0x139   : > { %v3030_v12 = vmul.f32 %v976_v25, %v949_v32  ;;  %vm1953_vm4 = vcmp.lt.f32.partialorder %v1952_v31, 8388608.0  ;;  %v1705_v37 = vclamps-f32 %v876_v18, 1.0  ;;  %v3710_v32 = vld [vmem:[#allocation34_spill] sm:$0xff]  ;;  %v1965_v7 = vand.u32 2147483648, %v3016_v47 }
 0x13a   : > { %v1704_v21 = vclamps-f32 %v875_v41, 1.0  ;;  %v1956_v4 = vand.u32 2147483647, %v1955_v38  ;;  %v874_v24 = vmul.f32 %v836_v10, %v3710_v32  ;;  %v1918_v61 = vor.u32 %v1917_v28, %v1916_v54 }
 0x13b   : > { %v1944_v10 = vand.u32 2147483647, %v3046_v15 }
 0x13c   : > { %v923_v17 = vmul.f32 7.0, %v1704_v21  ;;  %v1958_v44 = vor.u32 %v1957_v1, %v1956_v4  ;;  %v1964_v4 = vand.u32 2147483647, %v1963_v52  ;;  %v1946_v1 = vcvt.f32.s32 %v3046_v15 }
 0x13d   : > { %v1919_v28 = vsel %vm3061_vm5, %v1918_v61, %v3007_v6  ;;  %v1927_v52 = vsel %vm3034_vm2, %v3038_v0, %v2994_v19  ;;  %v2212_v19 = vld [vmem:[%s3594_s3 + $0x40] sm:$0xff]  ;;  %vm3130_vm9 = vcmp.lt.f32.partialorder %v1944_v10, 8388608.0 }
 0x13e   : > { %v1978_v13 = vcvt.f32.s32 %v923_v17  ;;  %1159 = vperm.xlu1 %2209, %v3709_v36   ;;  %v1959_v56 = vsel %vm1953_vm4, %v1958_v44, %v920_v57  ;;  %v1960_v57 = vand.u32 2147483647, %v3016_v47  ;;  %v1976_v21 = vand.u32 2147483647, %v923_v17  ;;  %v2216_v6 = vld [vmem:[%s3593_s2] sm:$0xff] }
 0x13f   : > { %1179 = vperm.xlu0 %2211, %v3711_v55   ;;  %1163 = vperm.xlu2 %2210, %v3712_v34   ;;  %v852_v41 = vpop.permute.xlu1 %851  ;;  %v3054_v25 = vpop.permute.xlu0 %859  ;;  %v952_v38 = vmul.f32 0.14285715, %v1959_v56  ;;  %v1981_v54 = vand.u32 2147483648, %v923_v17  ;;  %v1703_v44 = vclamps-f32 %v874_v24, 1.0  ;;  %v947_v63 = vmul.f32 0.14285715, %v1919_v28 }
 0x140   : > { %v878_v60 = vmul.f32 %v852_v41, %v2814_v8  ;;  %v988_v31 = vpop.permute.xlu2 %987  ;;  %v1979_v40 = vcvt.s32.f32 %v1978_v13  ;;  %v3066_v8 = vmul.f32 7.0, %v1705_v37  ;;  %v3715_v13 = vld [vmem:[#allocation33_spill] sm:$0xff]  ;;  %vm3077_vm6 = vcmp.lt.f32.partialorder %v1976_v21, 8388608.0  ;;  %v2213_v34 = vld [vmem:[%s3594_s3 + $0x68] sm:$0xff] }
 0x141   : > { %v3059_v30 = vmul.f32 %v988_v31, %v952_v38  ;;  %v879_v48 = vmul.f32 %v2992_v45, %v3715_v13  ;;  %v1943_v37 = vsel %vm3040_vm3, %v3049_v23, %v3000_v5  ;;  %vm3085_vm7 = vcmp.lt.f32.partialorder %v1960_v57, 8388608.0  ;;  %v2214_v41 = vld [vmem:[%s3594_s3 + $0x48] sm:$0xff] }
 0x142   : > { %v1707_v53 = vclamps-f32 %v878_v60, 1.0  ;;  %v1980_v18 = vand.u32 2147483647, %v1979_v40  ;;  %v3089_v45 = vor.u32 %v1965_v7, %v1964_v4  ;;  %v1947_v55 = vcvt.s32.f32 %v1946_v1 }
 0x143   : > { %v1986_v35 = vcvt.f32.s32 %v3066_v8  ;;  %v3097_v5 = vmul.f32 7.0, %v1703_v44  ;;  %v877_v23 = vmul.f32 %v3023_v27, %v2808_v2  ;;  %v1708_v60 = vclamps-f32 %v879_v48, 1.0 }
 0x144   : > { %v926_v36 = vmul.f32 7.0, %v1707_v53  ;;  %v1982_v56 = vor.u32 %v1981_v54, %v1980_v18  ;;  %v1949_v21 = vand.u32 2147483648, %v3046_v15  ;;  %v1948_v18 = vand.u32 2147483647, %v1947_v55 }
 0x145   : > { %v1970_v54 = vcvt.f32.s32 %v3097_v5  ;;  %v1706_v44 = vclamps-f32 %v877_v23, 1.0  ;;  %v950_v13 = vmul.f32 0.14285715, %v1943_v37  ;;  %v2220_v37 = vld [vmem:[%s3594_s3 + $0x78] sm:$0xff] }
 0x146   : > { %v2002_v24 = vcvt.f32.s32 %v926_v36  ;;  %1171 = vperm.xlu1 %2209, %v2212_v19   ;;  %v1983_v0 = vsel %vm3077_vm6, %v1982_v56, %v923_v17  ;;  %v2000_v7 = vand.u32 2147483647, %v926_v36  ;;  %v2005_v53 = vand.u32 2147483648, %v926_v36 }
 0x147   : > { %1191 = vperm.xlu0 %2211, %v2213_v34   ;;  %1175 = vperm.xlu2 %2210, %v2214_v41   ;;  %v864_v38 = vpop.permute.xlu1 %863  ;;  %v968_v17 = vpop.permute.xlu0 %967  ;;  %v955_v61 = vmul.f32 0.14285715, %v1983_v0  ;;  %v3115_v56 = vmul.f32 7.0, %v1708_v60  ;;  %v1987_v19 = vcvt.s32.f32 %v1986_v35  ;;  %v2215_v0 = vld [vmem:[%s3594_s3 + $0x58] sm:$0xff]  ;;  %v1950_v55 = vor.u32 %v1949_v21, %v1948_v18 }
 0x148   : > { %v881_v31 = vmul.f32 %v864_v38, %v2862_v14  ;;  %v3108_v40 = vmul.f32 %v968_v17, %v947_v63  ;;  %v1000_v57 = vpop.permute.xlu2 %999  ;;  %v2003_v2 = vcvt.s32.f32 %v2002_v24  ;;  %v948_v14 = vmul.f32 0.14285715, %v1927_v52 }
 0x149   : > { %v3110_v27 = vmul.f32 %v1000_v57, %v955_v61  ;;  %vm3117_vm8 = vcmp.lt.f32.partialorder %v2000_v7, 8388608.0  ;;  %v1967_v24 = vsel %vm3085_vm7, %v3089_v45, %v3016_v47  ;;  %v3134_v23 = vmul.f32 7.0, %v1706_v44  ;;  %v2217_v45 = vld [vmem:[%s3594_s3 + $0x60] sm:$0xff] }
 0x14a   : > { %v1710_v4 = vclamps-f32 %v881_v31, 1.0  ;;  %v2004_v1 = vand.u32 2147483647, %v2003_v2  ;;  %v880_v47 = vmul.f32 %v3054_v25, %v2853_v58  ;;  %v1971_v41 = vcvt.s32.f32 %v1970_v54 }
 0x14b   : > { %v1984_v25 = vand.u32 2147483647, %v3066_v8  ;;  %v1988_v57 = vand.u32 2147483647, %v1987_v19  ;;  %v1989_v2 = vand.u32 2147483648, %v3066_v8  ;;  %v2010_v7 = vcvt.f32.s32 %v3115_v56 }
 0x14c   : > { %v929_v28 = vmul.f32 7.0, %v1710_v4  ;;  %v2006_v48 = vor.u32 %v2005_v53, %v2004_v1  ;;  %v1951_v10 = vsel %vm3130_vm9, %v1950_v55, %v3046_v15  ;;  %v1994_v1 = vcvt.f32.s32 %v3134_v23  ;;  %v2218_v15 = vld [vmem:[%s3594_s3 + $0x70] sm:$0xff] }
 0x14d   : > { %v1709_v53 = vclamps-f32 %v880_v47, 1.0  ;;  %v1972_v18 = vand.u32 2147483647, %v1971_v41  ;;  %v1973_v54 = vand.u32 2147483648, %v3097_v5  ;;  %vm3159_vm11 = vcmp.lt.f32.partialorder %v1984_v25, 8388608.0 }
 0x14e   : > { %v2026_v63 = vcvt.f32.s32 %v929_v28  ;;  %1183 = vperm.xlu1 %2209, %v2215_v0   ;;  %v2007_v52 = vsel %vm3117_vm8, %v2006_v48, %v926_v36  ;;  %v2024_v31 = vand.u32 2147483647, %v929_v28  ;;  %v2029_v4 = vand.u32 2147483648, %v929_v28 }
 0x14f   : > { %1299 = vperm.xlu0 %2211, %v2216_v6   ;;  %1187 = vperm.xlu2 %2210, %v2217_v45   ;;  %v972_v36 = vpop.permute.xlu1 %971  ;;  %v980_v35 = vpop.permute.xlu0 %979  ;;  %v958_v34 = vmul.f32 0.14285715, %v2007_v52  ;;  %v951_v32 = vmul.f32 0.14285715, %v1951_v10  ;;  %v2011_v0 = vcvt.s32.f32 %v2010_v7  ;;  %v3166_v52 = vmul.f32 7.0, %v1709_v53  ;;  %v2223_v53 = vld [vmem:[%s3593_s2 + $0x10] sm:$0xff] }
 0x150   : > { %v3144_v38 = vmul.f32 %v972_v36, %v948_v14  ;;  %v3146_v17 = vmul.f32 %v980_v35, %v950_v13  ;;  %v1012_v61 = vpop.permute.xlu2 %1011  ;;  %v2027_v58 = vcvt.s32.f32 %v2026_v63  ;;  %v1968_v14 = vand.u32 2147483647, %v3097_v5 }
 0x151   : > { %v3149_v60 = vmul.f32 %v1012_v61, %v958_v34  ;;  %v953_v13 = vmul.f32 0.14285715, %v1967_v24  ;;  %vm2025_vm10 = vcmp.lt.f32.partialorder %v2024_v31, 8388608.0  ;;  %v1990_v63 = vor.u32 %v1989_v2, %v1988_v57  ;;  %v2219_v24 = vld [vmem:[%s3593_s2 + $0x18] sm:$0xff] }
 0x152   : > { %v2028_v21 = vand.u32 2147483647, %v2027_v58  ;;  %v1974_v45 = vor.u32 %v1973_v54, %v1972_v18  ;;  %v1995_v36 = vcvt.s32.f32 %v1994_v1  ;;  %vm1969_vm12 = vcmp.lt.f32.partialorder %v1968_v14, 8388608.0 }
 0x153   : > { %v1991_v61 = vsel %vm3159_vm11, %v1990_v63, %v3066_v8  ;;  %v2018_v58 = vcvt.f32.s32 %v3166_v52  ;;  %v2012_v57 = vand.u32 2147483647, %v2011_v0  ;;  %v1997_v2 = vand.u32 2147483648, %v3134_v23 }
 0x154   : > { %v2030_v44 = vor.u32 %v2029_v4, %v2028_v21  ;;  %v1975_v25 = vsel %vm1969_vm12, %v1974_v45, %v3097_v5  ;;  %v1996_v31 = vand.u32 2147483647, %v1995_v36  ;;  %v2008_v7 = vand.u32 2147483647, %v3115_v56  ;;  %v2221_v21 = vld [vmem:[%s3593_s2 + $0x8] sm:$0xff]  ;;  %v2222_v5 = vld [vmem:[%s3593_s2 + $0x30] sm:$0xff] }
 0x155   : > { %v2013_v10 = vand.u32 2147483648, %v3115_v56  ;;  %v954_v4 = vmul.f32 0.14285715, %v1975_v25  ;;  %v956_v1 = vmul.f32 0.14285715, %v1991_v61 }
 0x156   : > { %1195 = vperm.xlu1 %2209, %v2218_v15   ;;  %v2031_v19 = vsel %vm2025_vm10, %v2030_v44, %v929_v28  ;;  %v1992_v8 = vand.u32 2147483647, %v3134_v23  ;;  %v1998_v44 = vor.u32 %v1997_v2, %v1996_v31  ;;  %vm2009_vm14 = vcmp.lt.f32.partialorder %v2008_v7, 8388608.0  ;;  %v2227_v7 = vld [vmem:[%s3593_s2 + $0x38] sm:$0xff] }
 0x157   : > { %1311 = vperm.xlu0 %2211, %v2219_v24   ;;  %1199 = vperm.xlu2 %2210, %v2220_v37   ;;  %v984_v55 = vpop.permute.xlu1 %983  ;;  %v992_v47 = vpop.permute.xlu0 %991  ;;  %v961_v6 = vmul.f32 0.14285715, %v2031_v19  ;;  %v2014_v14 = vor.u32 %v2013_v10, %v2012_v57 }
 0x158   : > { %v1031_v28 = vmul.f32 %v984_v55, %v951_v32  ;;  %v3174_v35 = vmul.f32 %v992_v47, %v953_v13  ;;  %v1024_v34 = vpop.permute.xlu2 %1023  ;;  %v2019_v13 = vcvt.s32.f32 %v2018_v58  ;;  %vm1993_vm13 = vcmp.lt.f32.partialorder %v1992_v8, 8388608.0  ;;  %v2224_v47 = vld [vmem:[%s3593_s2 + $0x20] sm:$0xff] }
 0x159   : > { %v3176_v41 = vmul.f32 %v1024_v34, %v961_v6  ;;  %v1999_v0 = vsel %vm1993_vm13, %v1998_v44, %v3134_v23  ;;  %v2015_v24 = vsel %vm2009_vm14, %v2014_v14, %v3115_v56  ;;  %v2021_v55 = vand.u32 2147483648, %v3166_v52  ;;  %v2226_v56 = vld [vmem:[%s3593_s2 + $0x28] sm:$0xff]  ;;  %v2231_v44 = vld [vmem:[%s3593_s2 + $0x78] sm:$0xff] }
 0x15a   : > { %v2020_v37 = vand.u32 2147483647, %v2019_v13  ;;  %v957_v6 = vmul.f32 0.14285715, %v1999_v0  ;;  %v959_v45 = vmul.f32 0.14285715, %v2015_v24 }
 0x15c   : > { %v2022_v34 = vor.u32 %v2021_v55, %v2020_v37  ;;  %v2233_v37 = vld [vmem:[%s3593_s2 + $0x68] sm:$0xff] }
 0x15e   : > { %1303 = vperm.xlu1 %2209, %v2221_v21   ;;  %v2228_v21 = vld [vmem:[%s3593_s2 + $0x60] sm:$0xff] }
 0x15f   : > { %1323 = vperm.xlu0 %2211, %v2222_v5   ;;  %1307 = vperm.xlu2 %2210, %v2223_v53   ;;  %v996_v18 = vpop.permute.xlu1 %995  ;;  %v1004_v54 = vpop.permute.xlu0 %1003 }
 0x160   : > { %v1034_v48 = vmul.f32 %v996_v18, %v954_v4  ;;  %v3196_v15 = vmul.f32 %v1004_v54, %v956_v1  ;;  %v1052_v32 = vpop.permute.xlu2 %1051  ;;  %v2230_v54 = vld [vmem:[%s3593_s2 + $0x50] sm:$0xff] }
 0x161   : > { %v1108_v19 = vmul.f32 %v1052_v32, %v3144_v38  ;;  %v2016_v38 = vand.u32 2147483647, %v3166_v52 }
 0x163   : > { %v3200_v63 = vadd.f32 %v1108_v19, %v2938_v43  ;;  %v2225_v43 = vld [vmem:[%s3593_s2 + $0x48] sm:$0xff]  ;;  %vm2017_vm15 = vcmp.lt.f32.partialorder %v2016_v38, 8388608.0 }
 0x164   : > { %v2023_v2 = vsel %vm2017_vm15, %v2022_v34, %v3166_v52 }
 0x165   : > { %v960_v10 = vmul.f32 0.14285715, %v2023_v2 }
 0x166   : > { %1315 = vperm.xlu1 %2209, %v2224_v47  }
 0x167   : > { %1335 = vperm.xlu0 %2211, %v2225_v43   ;;  %1319 = vperm.xlu2 %2210, %v2226_v56   ;;  %v1008_v23 = vpop.permute.xlu1 %1007  ;;  %v1016_v36 = vpop.permute.xlu0 %1015  ;;  %v2236_v56 = vld [vmem:[%s3592_s1] sm:$0xff] }
 0x168   : > { %v1037_v61 = vmul.f32 %v1008_v23, %v957_v6  ;;  %v3215_v58 = vmul.f32 %v1016_v36, %v959_v45  ;;  %v1064_v25 = vpop.permute.xlu2 %1063 }
 0x169   : > { %v1111_v31 = vmul.f32 %v1064_v25, %v1031_v28  ;;  %v2229_v28 = vld [vmem:[%s3593_s2 + $0x40] sm:$0xff]  ;;  %v2239_v25 = vld [vmem:[%s3592_s1 + $0x18] sm:$0xff] }
 0x16b   : > { %v3218_v57 = vadd.f32 %v1111_v31, %v2949_v46  ;;  %v2240_v31 = vld [vmem:[%s3592_s1 + $0x40] sm:$0xff] }
 0x16e   : > { %1327 = vperm.xlu1 %2209, %v2227_v7  }
 0x16f   : > { %1347 = vperm.xlu0 %2211, %v2228_v21   ;;  %1331 = vperm.xlu2 %2210, %v2229_v28   ;;  %v1020_v46 = vpop.permute.xlu1 %1019  ;;  %v1044_v4 = vpop.permute.xlu0 %1043 }
 0x170   : > { %v1040_v1 = vmul.f32 %v1020_v46, %v960_v10  ;;  %v1106_v52 = vmul.f32 %v1044_v4, %v3013_v20  ;;  %v1076_v8 = vpop.permute.xlu2 %1075  ;;  %v2232_v20 = vld [vmem:[%s3593_s2 + $0x58] sm:$0xff]  ;;  %v2242_v46 = vld [vmem:[%s3592_s1 + $0x30] sm:$0xff] }
 0x171   : > { %v1114_v5 = vmul.f32 %v1076_v8, %v1034_v48  ;;  %v2243_v4 = vld [vmem:[%s3592_s1 + $0x58] sm:$0xff] }
 0x172   : > { %v3232_v53 = vadd.f32 %v1106_v52, %v2880_v3 }
 0x173   : > { %v3235_v18 = vadd.f32 %v1114_v5, %v2958_v49  ;;  %v2245_v5 = vld [vmem:[%s3592_s1 + $0x48] sm:$0xff] }
 0x176   : > { %1339 = vperm.xlu1 %2209, %v2230_v54   ;;  %v2246_v54 = vld [vmem:[%s3592_s1 + $0x70] sm:$0xff] }
 0x177   : > { %1359 = vperm.xlu0 %2211, %v2231_v44   ;;  %1343 = vperm.xlu2 %2210, %v2232_v20   ;;  %v1048_v3 = vpop.permute.xlu1 %1047  ;;  %v1056_v14 = vpop.permute.xlu0 %1055  ;;  %v2248_v44 = vld [vmem:[%s3592_s1 + $0x60] sm:$0xff]  ;;  %v2249_v20 = vld [vmem:[%s3592_s1 + $0x68] sm:$0xff] }
 0x178   : > { %v1107_v49 = vmul.f32 %v1048_v3, %v3108_v40  ;;  %v1109_v13 = vmul.f32 %v1056_v14, %v3030_v12  ;;  %v1088_v48 = vpop.permute.xlu2 %1087  ;;  %v2234_v12 = vld [vmem:[%s3592_s1 + $0x10] sm:$0xff] }
 0x179   : > { %v1117_v32 = vmul.f32 %v1088_v48, %v1037_v61 }
 0x17a   : > { %v3249_v19 = vadd.f32 %v1107_v49, %v2941_v29  ;;  %v3252_v0 = vadd.f32 %v1109_v13, %v2903_v16  ;;  %v2235_v29 = vld [vmem:[%s3593_s2 + $0x70] sm:$0xff]  ;;  %v2250_v13 = vld [vmem:[%s3592_s1 + $0x78] sm:$0xff] }
 0x17b   : > { %v3255_v24 = vadd.f32 %v1117_v32, %v2966_v50 }
 0x17e   : > { %1351 = vperm.xlu1 %2209, %v2233_v37  }
 0x17f   : > { %1387 = vperm.xlu0 %2211, %v2234_v12   ;;  %1355 = vperm.xlu2 %2210, %v2235_v29   ;;  %v1060_v16 = vpop.permute.xlu1 %1059  ;;  %v1068_v40 = vpop.permute.xlu0 %1067  ;;  %v2251_v12 = vld [vmem:[%s2670_s27 + $0x48] sm:$0xff] }
 0x180   : > { %v1110_v50 = vmul.f32 %v1060_v16, %v3146_v17  ;;  %v1112_v55 = vmul.f32 %v1068_v40, %v3059_v30  ;;  %v1100_v47 = vpop.permute.xlu2 %1099  ;;  %v2237_v30 = vld [vmem:[%s3592_s1 + $0x28] sm:$0xff]  ;;  %v2252_v40 = vld [vmem:[%s2670_s27 + $0x40] sm:$0xff] }
 0x181   : > { %v1120_v6 = vmul.f32 %v1100_v47, %v1040_v1 }
 0x182   : > { %v3269_v45 = vadd.f32 %v1110_v50, %v2952_v59  ;;  %v3272_v38 = vadd.f32 %v1112_v55, %v2920_v22  ;;  %v2238_v59 = vld [vmem:[%s3592_s1 + $0x8] sm:$0xff] }
 0x183   : > { %v3275_v43 = vadd.f32 %v1120_v6, %v2974_v11  ;;  %v2253_v6 = vld [vmem:[%s2670_s27 + $0x8] sm:$0xff] }
 0x186   : > { %1379 = vperm.xlu1 %2209, %v2236_v56  }
 0x187   : > { %1399 = vperm.xlu0 %2211, %v2237_v30   ;;  %1383 = vperm.xlu2 %2210, %v2238_v59   ;;  %v1072_v22 = vpop.permute.xlu1 %1071  ;;  %v1080_v17 = vpop.permute.xlu0 %1079 }
 0x188   : > { %v1113_v11 = vmul.f32 %v1072_v22, %v3174_v35  ;;  %v1115_v23 = vmul.f32 %v1080_v17, %v3110_v27  ;;  %v2241_v27 = vld [vmem:[%s3592_s1 + $0x20] sm:$0xff] }
 0x189   : > { %v1144_v36 = vpop.permute.xlu2 %1143 }
 0x18a   : > { %v3289_v34 = vadd.f32 %v1113_v11, %v2961_v9  ;;  %v3292_v61 = vadd.f32 %v1115_v23, %v2930_v62  ;;  %v782_v62 = vmul.f32 %v2934_v42, %v2922_v39  ;;  %v2244_v39 = vld [vmem:[%s3592_s1 + $0x38] sm:$0xff]  ;;  %v1203_v56 = vmul.f32 %v2253_v6, %v1144_v36 }
 0x18c   : > { %v1712_v17 = vclamps-f32 %v1203_v56, 1.0 }
 0x18e   : > { %1391 = vperm.xlu1 %2209, %v2239_v25   ;;  %v2254_v25 = vld [vmem:[%s2670_s27 + $0x20] sm:$0xff] }
 0x18f   : > { %1411 = vperm.xlu0 %2211, %v2240_v31   ;;  %1395 = vperm.xlu2 %2210, %v2241_v27   ;;  %v1084_v9 = vpop.permute.xlu1 %1083  ;;  %v1092_v35 = vpop.permute.xlu0 %1091  ;;  %v2255_v27 = vld [vmem:[%s2670_s27 + $0x38] sm:$0xff] }
 0x190   : > { %v1116_v2 = vmul.f32 %v1084_v9, %v3196_v15  ;;  %v1118_v7 = vmul.f32 %v1092_v35, %v3149_v60 }
 0x191   : > { %v1156_v10 = vpop.permute.xlu2 %1155 }
 0x192   : > { %v3308_v21 = vadd.f32 %v1116_v2, %v2969_v51  ;;  %v3310_v28 = vadd.f32 %v1118_v7, %v782_v62  ;;  %v1206_v31 = vmul.f32 %v2254_v25, %v1156_v10  ;;  %v2256_v62 = vld [vmem:[%s2670_s27 + $0x60] sm:$0xff]  ;;  %v2257_v7 = vld [vmem:[%s2670_s27 + $0x58] sm:$0xff] }
 0x194   : > { %3726 = vst [vmem:[#allocation14_spill] sm:$0xff] %v3310_v28 }
 0x196   : > { %1403 = vperm.xlu1 %2209, %v2242_v46  }
 0x197   : > { %1423 = vperm.xlu0 %2211, %v2243_v4   ;;  %1407 = vperm.xlu2 %2210, %v2244_v39   ;;  %v1096_v42 = vpop.permute.xlu1 %1095  ;;  %v1104_v51 = vpop.permute.xlu0 %1103 }
 0x198   : > { %v1119_v60 = vmul.f32 %v1096_v42, %v3215_v58  ;;  %v1121_v15 = vmul.f32 %v1104_v51, %v3176_v41  ;;  %v2247_v41 = vld [vmem:[%s3592_s1 + $0x50] sm:$0xff]  ;;  %v3374_v42 = vmul.f32 127.0, %v1712_v17 }
 0x199   : > { %v3323_v1 = vpop.permute.xlu2 %1163 }
 0x19a   : > { %v3326_v52 = vadd.f32 %v1119_v60, %v2977_v33  ;;  %v3329_v8 = vadd.f32 %v1121_v15, %v2946_v26 }
 0x19c   : > { %3727 = vst [vmem:[#allocation12_spill] sm:$0xff] %v3329_v8 }
 0x19e   : > { %1415 = vperm.xlu1 %2209, %v2245_v5  }
 0x19f   : > { %1435 = vperm.xlu0 %2211, %v2246_v54   ;;  %1419 = vperm.xlu2 %2210, %v2247_v41   ;;  %v1715_v54 = vclamps-f32 %v1206_v31, 1.0 }
 0x1a0   : > { %v3340_v33 = vpop.permute.xlu1 %1139 }
 0x1a1   : > { %v3342_v26 = vpop.permute.xlu0 %1147  ;;  %v1176_v58 = vpop.permute.xlu2 %1175 }
 0x1a2   : > { %v1211_v29 = vmul.f32 %v2251_v12, %v1176_v58 }
 0x1a4   : > { %v1720_v30 = vclamps-f32 %v1211_v29, 1.0  ;;  %v3378_v29 = vmul.f32 127.0, %v1715_v54 }
 0x1a6   : > { %1427 = vperm.xlu1 %2209, %v2248_v44   ;;  %v3364_v11 = vmul.f32 127.0, %v1720_v30 }
 0x1a7   : > { %1431 = vperm.xlu2 %2210, %v2249_v20  }
 0x1a8   : > { %v3350_v3 = vpop.permute.xlu1 %1151  ;;  %v2106_v51 = vcvt.f32.s32 %v3364_v11 }
 0x1a9   : > { %v1168_v14 = vpop.permute.xlu0 %1167  ;;  %v1188_v49 = vpop.permute.xlu2 %1187 }
 0x1aa   : > { %v1209_v9 = vmul.f32 %v2255_v27, %v1168_v14  ;;  %v1214_v2 = vmul.f32 %v2256_v62, %v1188_v49  ;;  %v2042_v14 = vcvt.f32.s32 %v3374_v42  ;;  %v2107_v49 = vcvt.s32.f32 %v2106_v51 }
 0x1ab   : > { %v2066_v51 = vcvt.f32.s32 %v3378_v29 }
 0x1ac   : > { %v1718_v41 = vclamps-f32 %v1209_v9, 1.0  ;;  %v1723_v58 = vclamps-f32 %v1214_v2, 1.0  ;;  %v2108_v2 = vand.u32 2147483647, %v2107_v49 }
 0x1ae   : > { %1439 = vperm.xlu1 %2209, %v2250_v13   ;;  %v3383_v30 = vmul.f32 127.0, %v1723_v58  ;;  %v2040_v58 = vand.u32 2147483647, %v3374_v42 }
 0x1b0   : > { %v3355_v48 = vpop.permute.xlu1 %1159  ;;  %vm3427_vm3 = vcmp.lt.f32.partialorder %v2040_v58, 8388608.0 }
 0x1b1   : > { %v1180_v32 = vpop.permute.xlu0 %1179  ;;  %v1200_v37 = vpop.permute.xlu2 %1199 }
 0x1b8   : > { %v1172_v16 = vpop.permute.xlu1 %1171 }
 0x1b9   : > { %v1210_v50 = vmul.f32 %v2252_v40, %v1172_v16  ;;  %v3359_v55 = vpop.permute.xlu0 %1191  ;;  %v3361_v47 = vpop.permute.xlu2 %1307  ;;  %v3380_v16 = vmul.f32 127.0, %v1718_v41  ;;  %v2258_v40 = vld [vmem:[%s2670_s27 + $0x50] sm:$0xff] }
 0x1bb   : > { %v1719_v59 = vclamps-f32 %v1210_v50, 1.0  ;;  %v1212_v50 = vmul.f32 %v2258_v40, %v1180_v32 }
 0x1bd   : > { %v1258_v22 = vmul.f32 127.0, %v1719_v59  ;;  %v2259_v59 = vld [vmem:[%s2670_s27 + $0x78] sm:$0xff] }
 0x1be   : > { %v1217_v17 = vmul.f32 %v2259_v59, %v1200_v37  ;;  %v2090_v37 = vcvt.f32.s32 %v3380_v16 }
 0x1bf   : > { %v2098_v23 = vcvt.f32.s32 %v1258_v22  ;;  %v2096_v60 = vand.u32 2147483647, %v1258_v22  ;;  %v2101_v5 = vand.u32 2147483648, %v1258_v22 }
 0x1c0   : > { %v1184_v35 = vpop.permute.xlu1 %1183 }
 0x1c1   : > { %v1213_v46 = vmul.f32 %v2257_v7, %v1184_v35  ;;  %v3370_v4 = vpop.permute.xlu0 %1299  ;;  %v3372_v39 = vpop.permute.xlu2 %1319  ;;  %v2099_v36 = vcvt.s32.f32 %v2098_v23  ;;  %vm2097_vm0 = vcmp.lt.f32.partialorder %v2096_v60, 8388608.0  ;;  %v2260_v23 = vld [vmem:[%s2670_s27 + $0x70] sm:$0xff]  ;;  %v1721_v60 = vclamps-f32 %v1212_v50, 1.0  ;;  %v2261_v50 = vld [vmem:[%s2670_s27 + $0x68] sm:$0xff] }
 0x1c3   : > { %v1722_v15 = vclamps-f32 %v1213_v46, 1.0  ;;  %v2100_v10 = vand.u32 2147483647, %v2099_v36  ;;  %v2109_v36 = vand.u32 2147483648, %v3364_v11 }
 0x1c5   : > { %v1261_v44 = vmul.f32 127.0, %v1722_v15  ;;  %v2102_v20 = vor.u32 %v2101_v5, %v2100_v10  ;;  %v2104_v15 = vand.u32 2147483647, %v3364_v11  ;;  %v2130_v10 = vcvt.f32.s32 %v3383_v30 }
 0x1c6   : > { %v1726_v5 = vclamps-f32 %v1217_v17, 1.0  ;;  %v2110_v40 = vor.u32 %v2109_v36, %v2108_v2 }
 0x1c7   : > { %v2122_v13 = vcvt.f32.s32 %v1261_v44  ;;  %v2103_v12 = vsel %vm2097_vm0, %v2102_v20, %v1258_v22  ;;  %v2043_v22 = vcvt.s32.f32 %v2042_v14  ;;  %v2120_v62 = vand.u32 2147483647, %v1261_v44 }
 0x1c8   : > { %v1196_v6 = vpop.permute.xlu1 %1195  ;;  %v1290_v56 = vmul.f32 0.007874016, %v2103_v12  ;;  %v2125_v32 = vand.u32 2147483648, %v1261_v44  ;;  %v2045_v14 = vand.u32 2147483648, %v3374_v42  ;;  %v2064_v12 = vand.u32 2147483647, %v3378_v29 }
 0x1c9   : > { %v1216_v25 = vmul.f32 %v2260_v23, %v1196_v6  ;;  %v3387_v31 = vpop.permute.xlu0 %1311  ;;  %v1332_v27 = vpop.permute.xlu2 %1331  ;;  %v2123_v9 = vcvt.s32.f32 %v2122_v13  ;;  %v2044_v20 = vand.u32 2147483647, %v2043_v22  ;;  %vm2121_vm1 = vcmp.lt.f32.partialorder %v2120_v62, 8388608.0 }
 0x1ca   : > { %v3389_v35 = vmul.f32 %v1332_v27, %v1290_v56  ;;  %v3399_v6 = vmul.f32 127.0, %v1721_v60  ;;  %v1215_v56 = vmul.f32 %v2261_v50, %v3359_v55  ;;  %v2091_v23 = vcvt.s32.f32 %v2090_v37 }
 0x1cb   : > { %v1725_v7 = vclamps-f32 %v1216_v25, 1.0  ;;  %v2124_v46 = vand.u32 2147483647, %v2123_v9  ;;  %v3405_v25 = vmul.f32 127.0, %v1726_v5  ;;  %vm3409_vm2 = vcmp.lt.f32.partialorder %v2104_v15, 8388608.0 }
 0x1cc   : > { %v2131_v62 = vcvt.s32.f32 %v2130_v10  ;;  %v2069_v55 = vand.u32 2147483648, %v3378_v29  ;;  %v2093_v5 = vand.u32 2147483648, %v3380_v16  ;;  %v2114_v15 = vcvt.f32.s32 %v3399_v6 }
 0x1cd   : > { %v1264_v54 = vmul.f32 127.0, %v1725_v7  ;;  %v2126_v41 = vor.u32 %v2125_v32, %v2124_v46  ;;  %v2067_v7 = vcvt.s32.f32 %v2066_v51  ;;  %v2262_v32 = vld [vmem:[%s2670_s27 + $0x28] sm:$0xff]  ;;  %v2111_v10 = vsel %vm3409_vm2, %v2110_v40, %v3364_v11 }
 0x1ce   : > { %v1207_v36 = vmul.f32 %v2262_v32, %v3355_v48  ;;  %v2154_v51 = vcvt.f32.s32 %v3405_v25  ;;  %v2088_v50 = vand.u32 2147483647, %v3380_v16  ;;  %v2046_v32 = vor.u32 %v2045_v14, %v2044_v20 }
 0x1cf   : > { %v2146_v49 = vcvt.f32.s32 %v1264_v54  ;;  %v2127_v13 = vsel %vm2121_vm1, %v2126_v41, %v1261_v44  ;;  %v2144_v46 = vand.u32 2147483647, %v1264_v54  ;;  %v2149_v60 = vand.u32 2147483648, %v1264_v54 }
 0x1d0   : > { %v3403_v59 = vpop.permute.xlu1 %1303  ;;  %v1293_v17 = vmul.f32 0.007874016, %v2127_v13  ;;  %v1724_v41 = vclamps-f32 %v1215_v56, 1.0  ;;  %v1291_v56 = vmul.f32 0.007874016, %v2111_v10  ;;  %v2133_v40 = vand.u32 2147483648, %v3383_v30 }
 0x1d1   : > { %v3407_v27 = vpop.permute.xlu0 %1323  ;;  %v1344_v9 = vpop.permute.xlu2 %1343  ;;  %v2147_v22 = vcvt.s32.f32 %v2146_v49  ;;  %v2092_v49 = vand.u32 2147483647, %v2091_v23  ;;  %vm2145_vm4 = vcmp.lt.f32.partialorder %v2144_v46, 8388608.0  ;;  %v2128_v11 = vand.u32 2147483647, %v3383_v30 }
 0x1d2   : > { %v3413_v2 = vmul.f32 %v1344_v9, %v1293_v17  ;;  %v2132_v17 = vand.u32 2147483647, %v2131_v62  ;;  %v2263_v9 = vld [vmem:[%s2670_s27] sm:$0xff]  ;;  %v3433_v23 = vmul.f32 127.0, %v1724_v41  ;;  %vm3437_vm5 = vcmp.lt.f32.partialorder %v2088_v50, 8388608.0 }
 0x1d3   : > { %v2148_v37 = vand.u32 2147483647, %v2147_v22  ;;  %v1202_v48 = vmul.f32 %v2263_v9, %v3340_v33  ;;  %v1716_v33 = vclamps-f32 %v1207_v36, 1.0  ;;  %v2068_v46 = vand.u32 2147483647, %v2067_v7 }
 0x1d4   : > { %v2134_v20 = vor.u32 %v2133_v40, %v2132_v17  ;;  %vm3448_vm6 = vcmp.lt.f32.partialorder %v2064_v12, 8388608.0  ;;  %vm3452_vm7 = vcmp.lt.f32.partialorder %v2128_v11, 8388608.0  ;;  %v2112_v12 = vand.u32 2147483647, %v3399_v6 }
 0x1d5   : > { %v2150_v13 = vor.u32 %v2149_v60, %v2148_v37  ;;  %v2094_v37 = vor.u32 %v2093_v5, %v2092_v49  ;;  %v2115_v60 = vcvt.s32.f32 %v2114_v15  ;;  %v1711_v14 = vclamps-f32 %v1202_v48, 1.0  ;;  %v2264_v48 = vld [vmem:[%s2670_s27 + $0x18] sm:$0xff] }
 0x1d6   : > { %v2138_v15 = vcvt.f32.s32 %v3433_v23  ;;  %v1205_v22 = vmul.f32 %v2264_v48, %v3350_v3  ;;  %v2070_v28 = vor.u32 %v2069_v55, %v2068_v46  ;;  %v2152_v40 = vand.u32 2147483647, %v3405_v25 }
 0x1d7   : > { %v2151_v8 = vsel %vm2145_vm4, %v2150_v13, %v1264_v54  ;;  %v2155_v54 = vcvt.s32.f32 %v2154_v51  ;;  %v2095_v7 = vsel %vm3437_vm5, %v2094_v37, %v3380_v16  ;;  %v2116_v49 = vand.u32 2147483647, %v2115_v60  ;;  %v2265_v16 = vld [vmem:[%s2670_s27 + $0x10] sm:$0xff] }
 0x1d8   : > { %v3435_v44 = vpop.permute.xlu1 %1315  ;;  %v1296_v62 = vmul.f32 0.007874016, %v2151_v8  ;;  %v2047_v8 = vsel %vm3427_vm3, %v2046_v32, %v3374_v42  ;;  %v2117_v51 = vand.u32 2147483648, %v3399_v6  ;;  %v3461_v13 = vmul.f32 127.0, %v1716_v33 }
 0x1d9   : > { %v1336_v58 = vpop.permute.xlu0 %1335  ;;  %v1356_v9 = vpop.permute.xlu2 %1355  ;;  %v2135_v42 = vsel %vm3452_vm7, %v2134_v20, %v3383_v30  ;;  %v2156_v50 = vand.u32 2147483647, %v2155_v54  ;;  %v3467_v17 = vmul.f32 127.0, %v1711_v14  ;;  %v1283_v32 = vmul.f32 0.007874016, %v2047_v8 }
 0x1da   : > { %v3441_v10 = vmul.f32 %v1336_v58, %v1291_v56  ;;  %v3443_v41 = vmul.f32 %v1356_v9, %v1296_v62  ;;  %v1204_v56 = vmul.f32 %v2265_v16, %v3342_v26  ;;  %v1289_v11 = vmul.f32 0.007874016, %v2095_v7 }
 0x1db   : > { %v2157_v62 = vand.u32 2147483648, %v3405_v25  ;;  %v1363_v30 = vmul.f32 %v3403_v59, %v1283_v32  ;;  %v1294_v60 = vmul.f32 0.007874016, %v2135_v42  ;;  %v2118_v33 = vor.u32 %v2117_v51, %v2116_v49  ;;  %v2266_v51 = vld [vmem:[%s2670_s27 + $0x30] sm:$0xff]  ;;  %s1677_s27 = sshll.u32 %s2297_s17, 4 }
 0x1dc   : > { %v2139_v58 = vcvt.s32.f32 %v2138_v15  ;;  %v2074_v9 = vcvt.f32.s32 %v3461_v13  ;;  %vm3479_vm8 = vcmp.lt.f32.partialorder %v2112_v12, 8388608.0  ;;  %v2034_v14 = vcvt.f32.s32 %v3467_v17  ;;  %p378_p9 = scmp.lt.s32.totalorder %s1677_s27, 31 }
 0x1dd   : > { %v2158_v54 = vor.u32 %v2157_v62, %v2156_v50  ;;  %v1714_v46 = vclamps-f32 %v1205_v22, 1.0  ;;  %v2071_v5 = vsel %vm3448_vm6, %v2070_v28, %v3378_v29  ;;  %v2119_v7 = vsel %vm3479_vm8, %v2118_v33, %v3399_v6 }
 0x1de   : > { %vm2153_vm9 = vcmp.lt.f32.partialorder %v2152_v40, 8388608.0  ;;  %v2140_v49 = vand.u32 2147483647, %v2139_v58  ;;  %v1208_v42 = vmul.f32 %v2266_v51, %v3323_v1  ;;  %v1713_v12 = vclamps-f32 %v1204_v56, 1.0  ;;  %s3749_s27 = smov (!%p378_p9, %s1677_s27), 31 }
 0x1df   : > { %v2075_v50 = vcvt.s32.f32 %v2074_v9  ;;  %v2159_v48 = vsel %vm2153_vm9, %v2158_v54, %v3405_v25  ;;  %v3498_v22 = vmul.f32 127.0, %v1714_v46  ;;  %v2035_v36 = vcvt.s32.f32 %v2034_v14  ;;  %s1678_s10 = sshll.u32 %s3749_s27, 2 }
 0x1e0   : > { %v1328_v37 = vpop.permute.xlu1 %1327  ;;  %v1286_v29 = vmul.f32 0.007874016, %v2071_v5  ;;  %v1292_v32 = vmul.f32 0.007874016, %v2119_v7  ;;  %v2136_v28 = vand.u32 2147483647, %v3433_v23  ;;  %s3566_s13 = scalar_lea.vmem %s3595_s4, %s1678_s10 }
 0x1e1   : > { %v3477_v3 = vmul.f32 %v1328_v37, %v1289_v11  ;;  %v1348_v55 = vpop.permute.xlu0 %1347  ;;  %v1384_v20 = vpop.permute.xlu2 %1383  ;;  %v1297_v11 = vmul.f32 0.007874016, %v2159_v48  ;;  %v1717_v62 = vclamps-f32 %v1208_v42, 1.0  ;;  %v3503_v1 = vmul.f32 127.0, %v1713_v12 }
 0x1e2   : > { %v3484_v59 = vmul.f32 %v1348_v55, %v1294_v60  ;;  %v1443_v8 = vmul.f32 %v1384_v20, %v1363_v30  ;;  %v1366_v6 = vmul.f32 %v3435_v44, %v1286_v29  ;;  %v2076_v56 = vand.u32 2147483647, %v2075_v50 }
 0x1e3   : > { %v2058_v60 = vcvt.f32.s32 %v3498_v22  ;;  %v2036_v33 = vand.u32 2147483647, %v2035_v36  ;;  %v2077_v55 = vand.u32 2147483648, %v3461_v13  ;;  %vm2137_vm10 = vcmp.lt.f32.partialorder %v2136_v28, 8388608.0 }
 0x1e4   : > { %v3490_v15 = vadd.f32 %v1443_v8, %v3249_v19  ;;  %v2141_v19 = vand.u32 2147483648, %v3433_v23  ;;  %v2037_v44 = vand.u32 2147483648, %v3467_v17  ;;  %v2072_v20 = vand.u32 2147483647, %v3461_v13 }
 0x1e5   : > { %v3515_v14 = vmul.f32 127.0, %v1717_v62  ;;  %v2032_v46 = vand.u32 2147483647, %v3467_v17  ;;  %v2078_v8 = vor.u32 %v2077_v55, %v2076_v56  ;;  %v2050_v5 = vcvt.f32.s32 %v3503_v1 }
 0x1e6   : > { %v2142_v40 = vor.u32 %v2141_v19, %v2140_v49  ;;  %v2038_v7 = vor.u32 %v2037_v44, %v2036_v33  ;;  %v2059_v49 = vcvt.s32.f32 %v2058_v60  ;;  %vm2073_vm11 = vcmp.lt.f32.partialorder %v2072_v20, 8388608.0 }
 0x1e7   : > { %v2082_v12 = vcvt.f32.s32 %v3515_v14  ;;  %vm2033_vm12 = vcmp.lt.f32.partialorder %v2032_v46, 8388608.0  ;;  %v2051_v36 = vcvt.s32.f32 %v2050_v5  ;;  %v2053_v56 = vand.u32 2147483648, %v3503_v1 }
 0x1e8   : > { %v1340_v16 = vpop.permute.xlu1 %1339  ;;  %v2143_v54 = vsel %vm2137_vm10, %v2142_v40, %v3433_v23  ;;  %v2039_v29 = vsel %vm2033_vm12, %v2038_v7, %v3467_v17  ;;  %v2060_v19 = vand.u32 2147483647, %v2059_v49  ;;  %v2056_v40 = vand.u32 2147483647, %v3498_v22 }
 0x1e9   : > { %v1372_v30 = vmul.f32 %v1340_v16, %v1292_v32  ;;  %v1360_v25 = vpop.permute.xlu0 %1359  ;;  %v1396_v37 = vpop.permute.xlu2 %1395  ;;  %v1295_v51 = vmul.f32 0.007874016, %v2143_v54  ;;  %v2083_v62 = vcvt.s32.f32 %v2082_v12  ;;  %v2080_v5 = vand.u32 2147483647, %v3515_v14 }
 0x1ea   : > { %v3506_v58 = vmul.f32 %v1360_v25, %v1297_v11  ;;  %v1446_v9 = vmul.f32 %v1396_v37, %v1366_v6  ;;  %v2061_v6 = vand.u32 2147483648, %v3498_v22  ;;  %v1282_v11 = vmul.f32 0.007874016, %v2039_v29 }
 0x1eb   : > { %v2048_v37 = vand.u32 2147483647, %v3503_v1  ;;  %vm2057_vm13 = vcmp.lt.f32.partialorder %v2056_v40, 8388608.0  ;;  %v2084_v33 = vand.u32 2147483647, %v2083_v62  ;;  %vm2081_vm15 = vcmp.lt.f32.partialorder %v2080_v5, 8388608.0 }
 0x1ec   : > { %v3512_v26 = vadd.f32 %v1446_v9, %v3269_v45  ;;  %v2079_v45 = vsel %vm2073_vm11, %v2078_v8, %v3461_v13  ;;  %v2052_v13 = vand.u32 2147483647, %v2051_v36  ;;  %v2062_v25 = vor.u32 %v2061_v6, %v2060_v19 }
 0x1ed   : > { %v1287_v28 = vmul.f32 0.007874016, %v2079_v45  ;;  %v1362_v17 = vmul.f32 %v3370_v4, %v1282_v11  ;;  %vm2049_vm14 = vcmp.lt.f32.partialorder %v2048_v37, 8388608.0 }
 0x1ee   : > { %v2054_v20 = vor.u32 %v2053_v56, %v2052_v13  ;;  %v2063_v54 = vsel %vm2057_vm13, %v2062_v25, %v3498_v22 }
 0x1ef   : > { %v1285_v49 = vmul.f32 0.007874016, %v2063_v54 }
 0x1f0   : > { %v1352_v42 = vpop.permute.xlu1 %1351 }
 0x1f1   : > { %v1375_v50 = vmul.f32 %v1352_v42, %v1295_v51  ;;  %v1388_v48 = vpop.permute.xlu0 %1387  ;;  %v1408_v23 = vpop.permute.xlu2 %1407  ;;  %v2055_v51 = vsel %vm2049_vm14, %v2054_v20, %v3503_v1  ;;  %v1365_v12 = vmul.f32 %v3387_v31, %v1285_v49 }
 0x1f2   : > { %v1449_v32 = vmul.f32 %v1408_v23, %v3477_v3  ;;  %v1367_v3 = vmul.f32 %v3372_v39, %v1287_v28  ;;  %v1284_v45 = vmul.f32 0.007874016, %v2055_v51 }
 0x1f4   : > { %v3525_v16 = vadd.f32 %v1449_v32, %v3289_v34  ;;  %v2085_v34 = vand.u32 2147483648, %v3515_v14  ;;  %v1364_v32 = vmul.f32 %v3361_v47, %v1284_v45 }
 0x1f6   : > { %v2086_v42 = vor.u32 %v2085_v34, %v2084_v33  ;;  %v1444_v6 = vmul.f32 %v1388_v48, %v1364_v32 }
 0x1f8   : > { %v1380_v60 = vpop.permute.xlu1 %1379  ;;  %v2087_v29 = vsel %vm2081_vm15, %v2086_v42, %v3515_v14 }
 0x1f9   : > { %v1442_v9 = vmul.f32 %v1380_v60, %v1362_v17  ;;  %v1400_v55 = vpop.permute.xlu0 %1399  ;;  %v1420_v44 = vpop.permute.xlu2 %1419  ;;  %v1288_v31 = vmul.f32 0.007874016, %v2087_v29 }
 0x1fa   : > { %v1447_v46 = vmul.f32 %v1400_v55, %v1367_v3  ;;  %v1452_v8 = vmul.f32 %v1420_v44, %v1372_v30 }
 0x1fb   : > { %v1458_v4 = vadd.f32 %v1442_v9, %v3232_v53  ;;  %v1368_v28 = vmul.f32 %v3407_v27, %v1288_v31 }
 0x1fc   : > { %v1463_v39 = vadd.f32 %v1447_v46, %v3218_v57  ;;  %v1468_v7 = vadd.f32 %v1452_v8, %v3308_v21 }
 0x1fd   : > { %1474 = vxpose.xlu2.b32.start [1/16] %v1458_v4, 128 }
 0x200   : > { %v1392_v22 = vpop.permute.xlu1 %1391 }
 0x201   : > { %v1445_v30 = vmul.f32 %v1392_v22, %v1365_v12  ;;  %v1412_v23 = vpop.permute.xlu0 %1411  ;;  %v1432_v36 = vpop.permute.xlu2 %1431 }
 0x202   : > { %v1450_v53 = vmul.f32 %v1412_v23, %v3389_v35  ;;  %v1455_v57 = vmul.f32 %v1432_v36, %v1375_v50  ;;  %v1460_v50 = vadd.f32 %v1444_v6, %v3200_v63  ;;  %v3740_v63 = vld [vmem:[#allocation14_spill] sm:$0xff] }
 0x203   : > { %v1461_v21 = vadd.f32 %v1445_v30, %v3252_v0 }
 0x204   : > { %v1466_v19 = vadd.f32 %v1450_v53, %v3235_v18  ;;  %v1471_v1 = vadd.f32 %v1455_v57, %v3326_v52 }
 0x205   : > { %1475 = vxpose.xlu2.b32.cont [2/16] %v3490_v15, 128 }
 0x208   : > { %v1404_v11 = vpop.permute.xlu1 %1403 }
 0x209   : > { %v1448_v40 = vmul.f32 %v1404_v11, %v1368_v28  ;;  %v1424_v14 = vpop.permute.xlu0 %1423 }
 0x20a   : > { %v1453_v35 = vmul.f32 %v1424_v14, %v3413_v2 }
 0x20b   : > { %v1464_v0 = vadd.f32 %v1448_v40, %v3272_v38 }
 0x20c   : > { %v1469_v18 = vadd.f32 %v1453_v35, %v3255_v24 }
 0x20d   : > { %1476 = vxpose.xlu2.b32.cont [3/16] %v1460_v50, 128 }
 0x210   : > { %v1416_v52 = vpop.permute.xlu1 %1415 }
 0x211   : > { %v1451_v47 = vmul.f32 %v1416_v52, %v3441_v10  ;;  %v1436_v62 = vpop.permute.xlu0 %1435  ;;  %v3741_v10 = vld [vmem:[#allocation12_spill] sm:$0xff] }
 0x212   : > { %v1456_v15 = vmul.f32 %v1436_v62, %v3443_v41 }
 0x213   : > { %v1467_v27 = vadd.f32 %v1451_v47, %v3292_v61 }
 0x214   : > { %v1472_v48 = vadd.f32 %v1456_v15, %v3275_v43 }
 0x215   : > { %1477 = vxpose.xlu2.b32.cont [4/16] %v1461_v21, 128 }
 0x218   : > { %v1428_v13 = vpop.permute.xlu1 %1427 }
 0x219   : > { %v1454_v2 = vmul.f32 %v1428_v13, %v3484_v59 }
 0x21b   : > { %v1470_v56 = vadd.f32 %v1454_v2, %v3740_v63 }
 0x21d   : > { %1478 = vxpose.xlu2.b32.cont [5/16] %v3512_v26, 128 }
 0x220   : > { %v1440_v24 = vpop.permute.xlu1 %1439 }
 0x221   : > { %v1457_v38 = vmul.f32 %v1440_v24, %v3506_v58 }
 0x223   : > { %v1473_v25 = vadd.f32 %v1457_v38, %v3741_v10 }
 0x225   : > { %1479 = vxpose.xlu2.b32.cont [6/16] %v1463_v39, 128 }
 0x22d   : > { %1480 = vxpose.xlu2.b32.cont [7/16] %v1464_v0, 128 }
 0x235   : > { %1481 = vxpose.xlu2.b32.cont [8/16] %v3525_v16, 128 }
 0x23d   : > { %1482 = vxpose.xlu2.b32.cont [9/16] %v1466_v19, 128 }
 0x245   : > { %1483 = vxpose.xlu2.b32.cont [10/16] %v1467_v27, 128 }
 0x24d   : > { %1484 = vxpose.xlu2.b32.cont [11/16] %v1468_v7, 128 }
 0x255   : > { %1485 = vxpose.xlu2.b32.cont [12/16] %v1469_v18, 128 }
 0x25d   : > { %1486 = vxpose.xlu2.b32.cont [13/16] %v1470_v56, 128 }
 0x265   : > { %1487 = vxpose.xlu2.b32.cont [14/16] %v1471_v1, 128 }
 0x26d   : > { %1488 = vxpose.xlu2.b32.cont [15/16] %v1472_v48, 128 }
 0x275   : > { %1489 = vxpose.xlu2.b32.end [16/16] %v1473_v25, 128 }
 0x296   : > { %v1490_v43 = vpop.trf.xlu2 }
 0x29e   : > { %v1491_v61 = vpop.trf.xlu2 }
 0x29f   : > { %v1732_v41 = vpack.c.bf16 %v1491_v61, %v1490_v43 }
 0x2a1   : > { %1733 = vst [vmem:[%s3566_s13] sm:$0xff] %v1732_v41  }
 0x2a6   : > { %v1492_v59 = vpop.trf.xlu2 }
 0x2ae   : > { %v1493_v58 = vpop.trf.xlu2 }
 0x2af   : > { %v1737_v26 = vpack.c.bf16 %v1493_v58, %v1492_v59 }
 0x2b1   : > { %1769 = vst [vmem:[%s3566_s13 + $0x8] sm:$0xff] %v1737_v26  }
 0x2b6   : > { %v1494_v16 = vpop.trf.xlu2 }
 0x2be   : > { %v1495_v37 = vpop.trf.xlu2 }
 0x2bf   : > { %v1742_v17 = vpack.c.bf16 %v1495_v37, %v1494_v16 }
 0x2c1   : > { %1770 = vst [vmem:[%s3566_s13 + $0x10] sm:$0xff] %v1742_v17  }
 0x2c6   : > { %v1496_v3 = vpop.trf.xlu2 }
 0x2ce   : > { %v1497_v60 = vpop.trf.xlu2 }
 0x2cf   : > { %v1747_v33 = vpack.c.bf16 %v1497_v60, %v1496_v3 }
 0x2d1   : > { %1771 = vst [vmem:[%s3566_s13 + $0x18] sm:$0xff] %v1747_v33  }
 0x2d6   : > { %v1498_v34 = vpop.trf.xlu2 }
 0x2de   : > { %v1499_v9 = vpop.trf.xlu2 }
 0x2df   : > { %v1752_v55 = vpack.c.bf16 %v1499_v9, %v1498_v34 }
 0x2e1   : > { %1772 = vst [vmem:[%s3566_s13 + $0x20] sm:$0xff] %v1752_v55  }
 0x2e6   : > { %v1500_v44 = vpop.trf.xlu2 }
 0x2ee   : > { %v1501_v20 = vpop.trf.xlu2 }
 0x2ef   : > { %v1757_v54 = vpack.c.bf16 %v1501_v20, %v1500_v44 }
 0x2f1   : > { %1773 = vst [vmem:[%s3566_s13 + $0x28] sm:$0xff] %v1757_v54  }
 0x2f6   : > { %v1502_v46 = vpop.trf.xlu2 }
 0x2fe   : > { %v1503_v8 = vpop.trf.xlu2 }
 0x2ff   : > { %v1762_v5 = vpack.c.bf16 %v1503_v8, %v1502_v46 }
 0x301   : > { %1774 = vst [vmem:[%s3566_s13 + $0x30] sm:$0xff] %v1762_v5  }
 0x306   : > { %v1504_v4 = vpop.trf.xlu2 }
 0x30e   : > { %v1505_v39 = vpop.trf.xlu2 }
 0x30f   : > { %v1767_v7 = vpack.c.bf16 %v1505_v39, %v1504_v4 }
 0x311   : > { %1775 = vst [vmem:[%s3566_s13 + $0x38] sm:$0xff] %v1767_v7  }
 0x312 PF: > { %s14_s19 = sadd.s32 1, %s2305_s19   ;;  %s3742_s15 = smov %s2293_s16 }
 0x313   : > { %p11_p10 = scmp.ge.s32.totalorder %s14_s19, 4   ;;  %s3743_s16 = smov %s2370_s23 }
 0x314   : > { %s3744_s17 = smov %s2301_s18  ;;  %s3745_s18 = smov %s3747_s20 }
 0x315   :  { %13 = sbr.rel (!%p11_p10) target bundleno = 3 (0x3), region = 118 }

</bundles_post_ra>
